<compile_context>
chip_gen: v6e
topology: v6e:2x2x1
jax: 0.10.0
libtpu: 0.0.40
codegen_flags: <defaults>
</compile_context>

<pallas_src>
import jax
import jax.numpy as jnp
from jax.experimental import pallas as pl
from jax.experimental.pallas import tpu as pltpu


# Padded, lane-friendly sizes.
C1 = 32                 # conv1 out channels, padded 10 -> 32
C2 = 32                 # conv2 out channels, padded 20 -> 32
F1 = 128                # fc1 width, padded 50 -> 128
NOUT = 128              # logits, padded 10 -> 128
HP1 = 16                # pooled conv1 rows per image (12 real + 4 pad, 8-aligned)
K1 = 6 * 28             # conv1 contraction depth (6 input rows x 28 pixels)
N1 = 2 * 2 * 12 * C1    # 1536 conv1 output lanes, ordered (u, v, jw, c)
H1 = 12 * C1            # 384 lanes of one 2x2-pool quadrant (jw, c)
K2 = 5 * H1             # 1920 conv2 contraction depth (dy, jw_in, ci)
N2 = 2 * 4 * C2         # 256 conv2 output lanes, ordered (v, jw2, co)


# ---------------------------------------------------------------------------
# Fused Pallas kernel
# ---------------------------------------------------------------------------
def _cnn_kernel(xw_ref, w1t_ref, b1t_ref, w2t_ref, b2t_ref,
                fc1w_ref, fb1_ref, fc2w_ref, fb2_ref,
                o_ref, p1_ref, m2_ref):
    f32 = jnp.float32
    tb = o_ref.shape[0]

    # ---- conv1 (5x5, Cin=1) + bias + 2x2 maxpool + ReLU ---------------------
    # One K=168 bf16 MXU matmul.  Rows are (batch, pooled-H hp), 16 per image;
    # output columns are ordered (H-parity u, W-parity v, pooled-W jw, chan c),
    # so the whole 2x2 pool is a max of four 128-aligned lane quarters.
    a1 = jnp.dot(xw_ref[...], w1t_ref[...], preferred_element_type=f32)
    a1 = a1 + b1t_ref[...]                                      # (tb*16, 1536)
    p1 = jnp.maximum(jnp.maximum(a1[:, 0 * H1:1 * H1], a1[:, 1 * H1:2 * H1]),
                     jnp.maximum(a1[:, 2 * H1:3 * H1], a1[:, 3 * H1:4 * H1]))
    p1 = jnp.maximum(p1, 0.0)                                   # (tb*16, 384)
    p1_ref[...] = p1.astype(p1_ref.dtype).reshape(tb, HP1, H1)

    # ---- conv2 (5x5, 10->20) + bias + W-direction pool ----------------------
    # The five dy row windows of the pooled map are plain sublane slices of the
    # VMEM scratch (no selection matmuls) lane-concatenated into one K=1920
    # matmul.  Output columns (v, jw2, co): W-pool = max of lane halves.
    lhs2 = jnp.concatenate(
        [p1_ref[:, dy:dy + 8, :].reshape(tb * 8, H1) for dy in range(5)],
        axis=-1)                                                # (tb*8, 1920)
    a2 = jnp.dot(lhs2, w2t_ref[...], preferred_element_type=f32)
    a2 = a2 + b2t_ref[...]                                      # (tb*8, 256)
    m2 = jnp.maximum(a2[:, :N2 // 2], a2[:, N2 // 2:])          # (tb*8, 128)
    m2_ref[...] = m2.reshape(tb, 8, N2 // 2)

    # ---- H-direction pool + ReLU + NCHW flatten + fc1 -----------------------
    # Row pairs (2k, 2k+1) are single-row reads of the scratch; the four pooled
    # rows are lane-concatenated so fc1 is a single K=512 matmul.
    p2 = jnp.concatenate(
        [jnp.maximum(jnp.maximum(m2_ref[:, 2 * k, :], m2_ref[:, 2 * k + 1, :]),
                     0.0) for k in range(4)], axis=-1)          # (tb, 512)
    h = jnp.dot(p2.astype(jnp.bfloat16), fc1w_ref[...],
                preferred_element_type=f32) + fb1_ref[...]
    h = jnp.maximum(h, 0.0)                                     # (tb, 128)

    # ---- fc2 + log_softmax (padded classes carry a -1e9 bias -> prob 0) -----
    logits = jnp.dot(h.astype(jnp.bfloat16), fc2w_ref[...],
                     preferred_element_type=f32) + fb2_ref[...]
    mx = jnp.max(logits, axis=-1, keepdims=True)
    lse = mx + jnp.log(jnp.sum(jnp.exp(logits - mx), axis=-1, keepdims=True))
    o_ref[...] = (logits - lse).astype(o_ref.dtype)


# ---------------------------------------------------------------------------
# Weight preparation (PyTorch layouts -> padded Toeplitz / lane-major form)
# ---------------------------------------------------------------------------
def _prepare_weights(params):
    """O(weight-size) transform, independent of the activations / batch."""
    f32, bf16 = jnp.float32, jnp.bfloat16
    w1 = params["w1"].astype(f32)        # (10, 1, 5, 5)   [co, ci, dy, dx]
    b1 = params["b1"].astype(f32)        # (10,)
    w2 = params["w2"].astype(f32)        # (20, 10, 5, 5)
    b2 = params["b2"].astype(f32)        # (20,)
    fw1 = params["fc1_w"].astype(f32)    # (50, 320)  PyTorch [out, in]
    fb1 = params["fc1_b"].astype(f32)    # (50,)
    fw2 = params["fc2_w"].astype(f32)    # (10, 50)
    fb2 = params["fc2_b"].astype(f32)    # (10,)

    # conv1 Toeplitz: rows (k=window row 0..5, w_in 0..27); cols (u, v, jw, c).
    # value = w1[c, k-u, w_in-(2*jw+v)] when that kernel offset is in range.
    w1p = jnp.zeros((C1, 5, 5), f32).at[:10].set(w1[:, 0])
    k_ = jnp.arange(6).reshape(6, 1, 1, 1, 1, 1, 1)
    wi_ = jnp.arange(28).reshape(1, 28, 1, 1, 1, 1, 1)
    u_ = jnp.arange(2).reshape(1, 1, 2, 1, 1, 1, 1)
    v_ = jnp.arange(2).reshape(1, 1, 1, 2, 1, 1, 1)
    jw_ = jnp.arange(12).reshape(1, 1, 1, 1, 12, 1, 1)
    dy_ = jnp.arange(5).reshape(1, 1, 1, 1, 1, 5, 1)
    dx_ = jnp.arange(5).reshape(1, 1, 1, 1, 1, 1, 5)
    t1 = ((k_ - u_ == dy_) & (wi_ - 2 * jw_ - v_ == dx_)).astype(f32)
    w1t = jnp.einsum("kwuvjyx,cyx->kwuvjc", t1, w1p).reshape(K1, N1)
    b1t = jnp.tile(jnp.zeros((C1,), f32).at[:10].set(b1), 48)[None, :]

    # conv2 Toeplitz: rows (dy, jw_in, ci); cols (v, jw2, co).
    w2p = jnp.zeros((C2, C1, 5, 5), f32).at[:20, :10].set(w2)
    a_ = jnp.arange(12).reshape(12, 1, 1, 1)
    v2 = jnp.arange(2).reshape(1, 2, 1, 1)
    w_ = jnp.arange(4).reshape(1, 1, 4, 1)
    d2 = jnp.arange(5).reshape(1, 1, 1, 5)
    t2 = (a_ - 2 * w_ - v2 == d2).astype(f32)                   # (12, 2, 4, 5)
    w2t = jnp.einsum("avwd,oiyd->yaivwo", t2, w2p).reshape(K2, N2)
    b2t = jnp.tile(jnp.zeros((C2,), f32).at[:20].set(b2), 8)[None, :]

    # fc1: rows ordered (hhp, wwp=jw2, co) to match the kernel's p2 concat
    # layout, mapped from PyTorch's NCHW x.view(-1, 320) order (co, hhp, wwp).
    fw1r = jnp.transpose(fw1.reshape(50, 20, 4, 4), (2, 3, 1, 0))
    fc1w = jnp.zeros((4, 4, C2, F1), f32).at[:, :, :20, :50].set(fw1r)
    fc1w = fc1w.reshape(4 * 4 * C2, F1)
    fb1p = jnp.zeros((1, F1), f32).at[0, :50].set(fb1)

    # fc2: padded classes get zero weights and a -1e9 bias so log_softmax over
    # 128 lanes equals log_softmax over the 10 real classes.
    fc2w = jnp.zeros((F1, NOUT), f32).at[:50, :10].set(fw2.T)
    fb2p = jnp.full((1, NOUT), -1e9, f32).at[0, :10].set(fb2)

    return (w1t.astype(bf16), b1t, w2t.astype(bf16), b2t,
            fc1w.astype(bf16), fb1p, fc2w.astype(bf16), fb2p)


# ---------------------------------------------------------------------------
# Forward pass wrapper (single fused pallas_call, batch-tiled grid)
# ---------------------------------------------------------------------------
def cnn_forward(params, x_nchw):
    """x_nchw: (B, 1, 28, 28) float32 -> (B, 10) log-probabilities."""
    B = x_nchw.shape[0]
    # Batch tile: up to 32 images/step, always >= 2 grid steps (v7x megacore).
    tb = min(32, max(8, ((B + 15) // 16) * 8))
    nsteps = max(2, (B + tb - 1) // tb)
    bpad = nsteps * tb

    # Input layout plumbing (tiny, O(input)): per pooled output row hp gather
    # the 6 input rows 2*hp .. 2*hp+5 lane-major, so conv1 + its 2x2 pool is a
    # single lane-aligned matmul + lane-quarter max inside the kernel.
    x = x_nchw.reshape(B, 28, 28).astype(jnp.float32)
    rows = 2 * jnp.arange(12)[:, None] + jnp.arange(6)[None, :]      # (12, 6)
    xw = x[:, rows, :].reshape(B, 12, K1)
    xw = jnp.pad(xw, ((0, bpad - B), (0, HP1 - 12), (0, 0)))         # zeros
    xw = xw.reshape(bpad * HP1, K1).astype(jnp.bfloat16)

    wts = _prepare_weights(params)

    def resident(a):                       # whole 2-D array, reused every step
        return pl.BlockSpec(a.shape, lambda i: (0, 0))

    in_specs = [pl.BlockSpec((tb * HP1, K1), lambda i: (i, 0))]
    in_specs += [resident(w) for w in wts]
    out_specs = pl.BlockSpec((tb, NOUT), lambda i: (i, 0))

    macs_per_image = (HP1 * K1 * N1) + (8 * K2 * N2) + (4 * F1 * F1) + (F1 * NOUT)
    cost = pl.CostEstimate(
        flops=int(2 * macs_per_image * bpad),
        transcendentals=int(bpad * (NOUT + 1)),
        bytes_accessed=int(xw.size * xw.dtype.itemsize
                           + bpad * NOUT * 4
                           + sum(int(w.size) * w.dtype.itemsize for w in wts)))

    out = pl.pallas_call(
        _cnn_kernel,
        out_shape=jax.ShapeDtypeStruct((bpad, NOUT), jnp.float32),
        grid_spec=pltpu.PrefetchScalarGridSpec(
            num_scalar_prefetch=0,
            grid=(nsteps,),
            in_specs=in_specs,
            out_specs=out_specs,
            scratch_shapes=[pltpu.VMEM((tb, HP1, H1), jnp.bfloat16),
                            pltpu.VMEM((tb, 8, N2 // 2), jnp.float32)]),
        compiler_params=pltpu.CompilerParams(
            dimension_semantics=("parallel",),          # 2-TC sharding on v7x
            vmem_limit_bytes=32 * 1024 * 1024),
        cost_estimate=cost,
    )(xw, *wts)
    return out[:B, :10]


# ---------------------------------------------------------------------------
# Parameters (PyTorch layouts) and a plain-JAX reference for validation
# ---------------------------------------------------------------------------
def init_params(key):
    ks = jax.random.split(key, 8)
    s = 0.1
    return {
        "w1": jax.random.normal(ks[0], (10, 1, 5, 5), jnp.float32) * s,
        "b1": jax.random.normal(ks[1], (10,), jnp.float32) * s,
        "w2": jax.random.normal(ks[2], (20, 10, 5, 5), jnp.float32) * s,
        "b2": jax.random.normal(ks[3], (20,), jnp.float32) * s,
        "fc1_w": jax.random.normal(ks[4], (50, 320), jnp.float32) * s,
        "fc1_b": jax.random.normal(ks[5], (50,), jnp.float32) * s,
        "fc2_w": jax.random.normal(ks[6], (10, 50), jnp.float32) * s,
        "fc2_b": jax.random.normal(ks[7], (10,), jnp.float32) * s,
    }


def cnn_reference(params, x_nchw):
    """Plain-JAX reference matching the PyTorch module in eval mode."""
    neg_inf = jnp.array(-jnp.inf, jnp.float32)
    y = jax.lax.conv_general_dilated(
        x_nchw.astype(jnp.float32), params["w1"], (1, 1), "VALID",
        dimension_numbers=("NCHW", "OIHW", "NCHW"))
    y = y + params["b1"][None, :, None, None]
    y = jax.lax.reduce_window(y, neg_inf, jax.lax.max,
                              (1, 1, 2, 2), (1, 1, 2, 2), "VALID")
    y = jnp.maximum(y, 0.0)
    y = jax.lax.conv_general_dilated(
        y, params["w2"], (1, 1), "VALID",
        dimension_numbers=("NCHW", "OIHW", "NCHW"))
    y = y + params["b2"][None, :, None, None]
    y = jax.lax.reduce_window(y, neg_inf, jax.lax.max,
                              (1, 1, 2, 2), (1, 1, 2, 2), "VALID")
    y = jnp.maximum(y, 0.0)
    y = y.reshape(y.shape[0], -1)
    y = jnp.maximum(y @ params["fc1_w"].T + params["fc1_b"], 0.0)
    y = y @ params["fc2_w"].T + params["fc2_b"]
    return jax.nn.log_softmax(y, axis=-1)


if __name__ == "__main__":
    key = jax.random.PRNGKey(0)
    pkey, xkey = jax.random.split(key)
    params = init_params(pkey)

    # MNIST-shaped input: (batch=2, channels=1, 28, 28)
    x = jax.random.normal(xkey, (2, 1, 28, 28), jnp.float32)

    out = jax.jit(cnn_forward)(params, x)
    out = jax.block_until_ready(out)

    assert out.shape == (2, 10)
    assert bool(jnp.all(jnp.isfinite(out)))
    # log_softmax rows must (approximately) sum to 1 in probability space
    assert jnp.allclose(jnp.sum(jnp.exp(out), axis=1), 1.0, atol=1e-4)
    # structural correctness vs. a plain-JAX f32 reference; the kernel uses
    # bf16 matmul operands (f32 accumulation), so allow a few 1e-2 absolute.
    ref = cnn_reference(params, x)
    assert float(jnp.max(jnp.abs(out - ref))) < 5e-2
    print("KERNEL_OK")
</pallas_src>

<mosaic_0001>
module attributes {stable_mosaic.version = 11 : i64} {
  func.func @_cnn_kernel(%arg0: i32, %arg1: memref<128x168xbf16, #tpu.memory_space<vmem>>, %arg2: memref<168x1536xbf16, #tpu.memory_space<vmem>>, %arg3: memref<1x1536xf32, #tpu.memory_space<vmem>>, %arg4: memref<1920x256xbf16, #tpu.memory_space<vmem>>, %arg5: memref<1x256xf32, #tpu.memory_space<vmem>>, %arg6: memref<512x128xbf16, #tpu.memory_space<vmem>>, %arg7: memref<1x128xf32, #tpu.memory_space<vmem>>, %arg8: memref<128x128xbf16, #tpu.memory_space<vmem>>, %arg9: memref<1x128xf32, #tpu.memory_space<vmem>>, %arg10: memref<8x128xf32, #tpu.memory_space<vmem>>, %arg11: memref<8x16x384xbf16, #tpu.memory_space<vmem>>, %arg12: memref<8x8x128xf32, #tpu.memory_space<vmem>>) attributes {dimension_semantics = [#tpu.dimension_semantics<parallel>], iteration_bounds = array<i64: 2>, scalar_prefetch = 0 : i64, scratch_operands = 2 : i64, tpu.core_type = #tpu.core_type<tc>, window_params = [{transform_indices = @transform_0, window_bounds = array<i64: 128, 168>}, {pipeline_mode = #tpu.pipeline_mode<synchronous>, transform_indices = @transform_1, window_bounds = array<i64: 168, 1536>}, {pipeline_mode = #tpu.pipeline_mode<synchronous>, transform_indices = @transform_2, window_bounds = array<i64: 1, 1536>}, {pipeline_mode = #tpu.pipeline_mode<synchronous>, transform_indices = @transform_3, window_bounds = array<i64: 1920, 256>}, {pipeline_mode = #tpu.pipeline_mode<synchronous>, transform_indices = @transform_4, window_bounds = array<i64: 1, 256>}, {pipeline_mode = #tpu.pipeline_mode<synchronous>, transform_indices = @transform_5, window_bounds = array<i64: 512, 128>}, {pipeline_mode = #tpu.pipeline_mode<synchronous>, transform_indices = @transform_6, window_bounds = array<i64: 1, 128>}, {pipeline_mode = #tpu.pipeline_mode<synchronous>, transform_indices = @transform_7, window_bounds = array<i64: 128, 128>}, {pipeline_mode = #tpu.pipeline_mode<synchronous>, transform_indices = @transform_8, window_bounds = array<i64: 1, 128>}, {transform_indices = @transform_9, window_bounds = array<i64: 8, 128>}]} {
    %c0 = arith.constant 0 : index
    %c0_0 = arith.constant 0 : index
    %0 = vector.load %arg1[%c0, %c0_0] : memref<128x168xbf16, #tpu.memory_space<vmem>>, vector<128x168xbf16>
    %c0_1 = arith.constant 0 : index
    %c0_2 = arith.constant 0 : index
    %1 = vector.load %arg2[%c0_1, %c0_2] : memref<168x1536xbf16, #tpu.memory_space<vmem>>, vector<168x1536xbf16>
    %cst = arith.constant dense<0.000000e+00> : vector<128x1536xf32>
    %2 = tpu.matmul %0, %1, %cst {dimension_numbers = #tpu.dot_dimension_numbers<[1], [0], [0], [1], [0, 0, 1, 1], [], []>} : vector<128x168xbf16>, vector<168x1536xbf16>, vector<128x1536xf32> -> vector<128x1536xf32>
    %c0_3 = arith.constant 0 : index
    %c0_4 = arith.constant 0 : index
    %3 = vector.load %arg3[%c0_3, %c0_4] : memref<1x1536xf32, #tpu.memory_space<vmem>>, vector<1x1536xf32>
    %4 = vector.broadcast %3 : vector<1x1536xf32> to vector<128x1536xf32>
    %5 = arith.addf %2, %4 : vector<128x1536xf32>
    %6 = vector.extract_strided_slice %5 {offsets = [0, 0], sizes = [128, 384], strides = [1, 1]} : vector<128x1536xf32> to vector<128x384xf32>
    %7 = vector.extract_strided_slice %5 {offsets = [0, 384], sizes = [128, 384], strides = [1, 1]} : vector<128x1536xf32> to vector<128x384xf32>
    %8 = arith.maximumf %6, %7 : vector<128x384xf32>
    %9 = vector.extract_strided_slice %5 {offsets = [0, 768], sizes = [128, 384], strides = [1, 1]} : vector<128x1536xf32> to vector<128x384xf32>
    %10 = vector.extract_strided_slice %5 {offsets = [0, 1152], sizes = [128, 384], strides = [1, 1]} : vector<128x1536xf32> to vector<128x384xf32>
    %11 = arith.maximumf %9, %10 : vector<128x384xf32>
    %12 = arith.maximumf %8, %11 : vector<128x384xf32>
    %cst_5 = arith.constant 0.000000e+00 : f32
    %13 = vector.broadcast %cst_5 : f32 to vector<128x384xf32>
    %14 = arith.maximumf %12, %13 : vector<128x384xf32>
    %15 = arith.truncf %14 : vector<128x384xf32> to vector<128x384xbf16>
    %16 = vector.shape_cast %15 : vector<128x384xbf16> to vector<8x16x384xbf16>
    %c0_6 = arith.constant 0 : index
    %c0_7 = arith.constant 0 : index
    %c0_8 = arith.constant 0 : index
    %17 = vector.load %arg11[%c0_6, %c0_7, %c0_8] : memref<8x16x384xbf16, #tpu.memory_space<vmem>>, vector<8x16x384xbf16>
    tpu.vector_store %arg11[%c0_6, %c0_7, %c0_8], %16 {strides = array<i32>} : memref<8x16x384xbf16, #tpu.memory_space<vmem>>, vector<8x16x384xbf16>,
    %c0_9 = arith.constant 0 : index
    %c0_10 = arith.constant 0 : index
    %c0_11 = arith.constant 0 : index
    %18 = vector.load %arg11[%c0_9, %c0_10, %c0_11] : memref<8x16x384xbf16, #tpu.memory_space<vmem>>, vector<8x8x384xbf16>
    %19 = vector.shape_cast %18 : vector<8x8x384xbf16> to vector<64x384xbf16>
    %c0_12 = arith.constant 0 : index
    %c1 = arith.constant 1 : index
    %c0_13 = arith.constant 0 : index
    %20 = vector.load %arg11[%c0_12, %c1, %c0_13] : memref<8x16x384xbf16, #tpu.memory_space<vmem>>, vector<8x8x384xbf16>
    %21 = vector.shape_cast %20 : vector<8x8x384xbf16> to vector<64x384xbf16>
    %c0_14 = arith.constant 0 : index
    %c2 = arith.constant 2 : index
    %c0_15 = arith.constant 0 : index
    %22 = vector.load %arg11[%c0_14, %c2, %c0_15] : memref<8x16x384xbf16, #tpu.memory_space<vmem>>, vector<8x8x384xbf16>
    %23 = vector.shape_cast %22 : vector<8x8x384xbf16> to vector<64x384xbf16>
    %c0_16 = arith.constant 0 : index
    %c3 = arith.constant 3 : index
    %c0_17 = arith.constant 0 : index
    %24 = vector.load %arg11[%c0_16, %c3, %c0_17] : memref<8x16x384xbf16, #tpu.memory_space<vmem>>, vector<8x8x384xbf16>
    %25 = vector.shape_cast %24 : vector<8x8x384xbf16> to vector<64x384xbf16>
    %c0_18 = arith.constant 0 : index
    %c4 = arith.constant 4 : index
    %c0_19 = arith.constant 0 : index
    %26 = vector.load %arg11[%c0_18, %c4, %c0_19] : memref<8x16x384xbf16, #tpu.memory_space<vmem>>, vector<8x8x384xbf16>
    %27 = vector.shape_cast %26 : vector<8x8x384xbf16> to vector<64x384xbf16>
    %28 = tpu.concatenate %19, %21, %23, %25, %27 in 1 : vector<64x384xbf16>, vector<64x384xbf16>, vector<64x384xbf16>, vector<64x384xbf16>, vector<64x384xbf16> -> vector<64x1920xbf16>
    %c0_20 = arith.constant 0 : index
    %c0_21 = arith.constant 0 : index
    %29 = vector.load %arg4[%c0_20, %c0_21] : memref<1920x256xbf16, #tpu.memory_space<vmem>>, vector<1920x256xbf16>
    %cst_22 = arith.constant dense<0.000000e+00> : vector<64x256xf32>
    %30 = tpu.matmul %28, %29, %cst_22 {dimension_numbers = #tpu.dot_dimension_numbers<[1], [0], [0], [1], [0, 0, 1, 1], [], []>} : vector<64x1920xbf16>, vector<1920x256xbf16>, vector<64x256xf32> -> vector<64x256xf32>
    %c0_23 = arith.constant 0 : index
    %c0_24 = arith.constant 0 : index
    %31 = vector.load %arg5[%c0_23, %c0_24] : memref<1x256xf32, #tpu.memory_space<vmem>>, vector<1x256xf32>
    %32 = vector.broadcast %31 : vector<1x256xf32> to vector<64x256xf32>
    %33 = arith.addf %30, %32 : vector<64x256xf32>
    %34 = vector.extract_strided_slice %33 {offsets = [0, 0], sizes = [64, 128], strides = [1, 1]} : vector<64x256xf32> to vector<64x128xf32>
    %35 = vector.extract_strided_slice %33 {offsets = [0, 128], sizes = [64, 128], strides = [1, 1]} : vector<64x256xf32> to vector<64x128xf32>
    %36 = arith.maximumf %34, %35 : vector<64x128xf32>
    %37 = vector.shape_cast %36 : vector<64x128xf32> to vector<8x8x128xf32>
    %c0_25 = arith.constant 0 : index
    %c0_26 = arith.constant 0 : index
    %c0_27 = arith.constant 0 : index
    %38 = vector.load %arg12[%c0_25, %c0_26, %c0_27] : memref<8x8x128xf32, #tpu.memory_space<vmem>>, vector<8x8x128xf32>
    tpu.vector_store %arg12[%c0_25, %c0_26, %c0_27], %37 {strides = array<i32>} : memref<8x8x128xf32, #tpu.memory_space<vmem>>, vector<8x8x128xf32>,
    %c0_28 = arith.constant 0 : index
    %c0_29 = arith.constant 0 : index
    %c0_30 = arith.constant 0 : index
    %39 = vector.load %arg12[%c0_28, %c0_29, %c0_30] : memref<8x8x128xf32, #tpu.memory_space<vmem>>, vector<8x1x128xf32>
    %40 = vector.shape_cast %39 : vector<8x1x128xf32> to vector<8x128xf32>
    %c0_31 = arith.constant 0 : index
    %c1_32 = arith.constant 1 : index
    %c0_33 = arith.constant 0 : index
    %41 = vector.load %arg12[%c0_31, %c1_32, %c0_33] : memref<8x8x128xf32, #tpu.memory_space<vmem>>, vector<8x1x128xf32>
    %42 = vector.shape_cast %41 : vector<8x1x128xf32> to vector<8x128xf32>
    %43 = arith.maximumf %40, %42 : vector<8x128xf32>
    %cst_34 = arith.constant 0.000000e+00 : f32
    %44 = vector.broadcast %cst_34 : f32 to vector<8x128xf32>
    %45 = arith.maximumf %43, %44 : vector<8x128xf32>
    %c0_35 = arith.constant 0 : index
    %c2_36 = arith.constant 2 : index
    %c0_37 = arith.constant 0 : index
    %46 = vector.load %arg12[%c0_35, %c2_36, %c0_37] : memref<8x8x128xf32, #tpu.memory_space<vmem>>, vector<8x1x128xf32>
    %47 = vector.shape_cast %46 : vector<8x1x128xf32> to vector<8x128xf32>
    %c0_38 = arith.constant 0 : index
    %c3_39 = arith.constant 3 : index
    %c0_40 = arith.constant 0 : index
    %48 = vector.load %arg12[%c0_38, %c3_39, %c0_40] : memref<8x8x128xf32, #tpu.memory_space<vmem>>, vector<8x1x128xf32>
    %49 = vector.shape_cast %48 : vector<8x1x128xf32> to vector<8x128xf32>
    %50 = arith.maximumf %47, %49 : vector<8x128xf32>
    %cst_41 = arith.constant 0.000000e+00 : f32
    %51 = vector.broadcast %cst_41 : f32 to vector<8x128xf32>
    %52 = arith.maximumf %50, %51 : vector<8x128xf32>
    %c0_42 = arith.constant 0 : index
    %c4_43 = arith.constant 4 : index
    %c0_44 = arith.constant 0 : index
    %53 = vector.load %arg12[%c0_42, %c4_43, %c0_44] : memref<8x8x128xf32, #tpu.memory_space<vmem>>, vector<8x1x128xf32>
    %54 = vector.shape_cast %53 : vector<8x1x128xf32> to vector<8x128xf32>
    %c0_45 = arith.constant 0 : index
    %c5 = arith.constant 5 : index
    %c0_46 = arith.constant 0 : index
    %55 = vector.load %arg12[%c0_45, %c5, %c0_46] : memref<8x8x128xf32, #tpu.memory_space<vmem>>, vector<8x1x128xf32>
    %56 = vector.shape_cast %55 : vector<8x1x128xf32> to vector<8x128xf32>
    %57 = arith.maximumf %54, %56 : vector<8x128xf32>
    %cst_47 = arith.constant 0.000000e+00 : f32
    %58 = vector.broadcast %cst_47 : f32 to vector<8x128xf32>
    %59 = arith.maximumf %57, %58 : vector<8x128xf32>
    %c0_48 = arith.constant 0 : index
    %c6 = arith.constant 6 : index
    %c0_49 = arith.constant 0 : index
    %60 = vector.load %arg12[%c0_48, %c6, %c0_49] : memref<8x8x128xf32, #tpu.memory_space<vmem>>, vector<8x1x128xf32>
    %61 = vector.shape_cast %60 : vector<8x1x128xf32> to vector<8x128xf32>
    %c0_50 = arith.constant 0 : index
    %c7 = arith.constant 7 : index
    %c0_51 = arith.constant 0 : index
    %62 = vector.load %arg12[%c0_50, %c7, %c0_51] : memref<8x8x128xf32, #tpu.memory_space<vmem>>, vector<8x1x128xf32>
    %63 = vector.shape_cast %62 : vector<8x1x128xf32> to vector<8x128xf32>
    %64 = arith.maximumf %61, %63 : vector<8x128xf32>
    %cst_52 = arith.constant 0.000000e+00 : f32
    %65 = vector.broadcast %cst_52 : f32 to vector<8x128xf32>
    %66 = arith.maximumf %64, %65 : vector<8x128xf32>
    %67 = tpu.concatenate %45, %52, %59, %66 in 1 : vector<8x128xf32>, vector<8x128xf32>, vector<8x128xf32>, vector<8x128xf32> -> vector<8x512xf32>
    %68 = arith.truncf %67 : vector<8x512xf32> to vector<8x512xbf16>
    %c0_53 = arith.constant 0 : index
    %c0_54 = arith.constant 0 : index
    %69 = vector.load %arg6[%c0_53, %c0_54] : memref<512x128xbf16, #tpu.memory_space<vmem>>, vector<512x128xbf16>
    %cst_55 = arith.constant dense<0.000000e+00> : vector<8x128xf32>
    %70 = tpu.matmul %68, %69, %cst_55 {dimension_numbers = #tpu.dot_dimension_numbers<[1], [0], [0], [1], [0, 0, 1, 1], [], []>} : vector<8x512xbf16>, vector<512x128xbf16>, vector<8x128xf32> -> vector<8x128xf32>
    %c0_56 = arith.constant 0 : index
    %c0_57 = arith.constant 0 : index
    %71 = vector.load %arg7[%c0_56, %c0_57] : memref<1x128xf32, #tpu.memory_space<vmem>>, vector<1x128xf32>
    %72 = vector.broadcast %71 : vector<1x128xf32> to vector<8x128xf32>
    %73 = arith.addf %70, %72 : vector<8x128xf32>
    %cst_58 = arith.constant 0.000000e+00 : f32
    %74 = vector.broadcast %cst_58 : f32 to vector<8x128xf32>
    %75 = arith.maximumf %73, %74 : vector<8x128xf32>
    %76 = arith.truncf %75 : vector<8x128xf32> to vector<8x128xbf16>
    %c0_59 = arith.constant 0 : index
    %c0_60 = arith.constant 0 : index
    %77 = vector.load %arg8[%c0_59, %c0_60] : memref<128x128xbf16, #tpu.memory_space<vmem>>, vector<128x128xbf16>
    %cst_61 = arith.constant dense<0.000000e+00> : vector<8x128xf32>
    %78 = tpu.matmul %76, %77, %cst_61 {dimension_numbers = #tpu.dot_dimension_numbers<[1], [0], [0], [1], [0, 0, 1, 1], [], []>} : vector<8x128xbf16>, vector<128x128xbf16>, vector<8x128xf32> -> vector<8x128xf32>
    %c0_62 = arith.constant 0 : index
    %c0_63 = arith.constant 0 : index
    %79 = vector.load %arg9[%c0_62, %c0_63] : memref<1x128xf32, #tpu.memory_space<vmem>>, vector<1x128xf32>
    %80 = vector.broadcast %79 : vector<1x128xf32> to vector<8x128xf32>
    %81 = arith.addf %78, %80 : vector<8x128xf32>
    %cst_64 = arith.constant dense<0xFF800000> : vector<8xf32>
    %82 = vector.multi_reduction <maximumf>, %81, %cst_64 [1] : vector<8x128xf32> to vector<8xf32>
    %83 = vector.shape_cast %82 : vector<8xf32> to vector<8x1xf32>
    %84 = vector.broadcast %83 : vector<8x1xf32> to vector<8x128xf32>
    %85 = arith.subf %81, %84 : vector<8x128xf32>
    %86 = math.exp %85 : vector<8x128xf32>
    %cst_65 = arith.constant dense<0.000000e+00> : vector<8xf32>
    %87 = vector.multi_reduction <add>, %86, %cst_65 [1] : vector<8x128xf32> to vector<8xf32>
    %88 = vector.shape_cast %87 : vector<8xf32> to vector<8x1xf32>
    %89 = math.log %88 : vector<8x1xf32>
    %90 = arith.addf %83, %89 : vector<8x1xf32>
    %91 = vector.broadcast %90 : vector<8x1xf32> to vector<8x128xf32>
    %92 = arith.subf %81, %91 : vector<8x128xf32>
    %c0_66 = arith.constant 0 : index
    %c0_67 = arith.constant 0 : index
    %93 = vector.load %arg10[%c0_66, %c0_67] : memref<8x128xf32, #tpu.memory_space<vmem>>, vector<8x128xf32>
    tpu.vector_store %arg10[%c0_66, %c0_67], %92 {strides = array<i32>} : memref<8x128xf32, #tpu.memory_space<vmem>>, vector<8x128xf32>,
    return
  }
  func.func @transform_0(%arg0: i32) -> (i32, i32) {
    %c0_i32 = arith.constant 0 : i32
    %c0_i32_0 = arith.constant 0 : i32
    return %arg0, %c0_i32 : i32, i32
  }
  func.func @transform_1(%arg0: i32) -> (i32, i32) {
    %c0_i32 = arith.constant 0 : i32
    %c0_i32_0 = arith.constant 0 : i32
    %c0_i32_1 = arith.constant 0 : i32
    return %c0_i32, %c0_i32_0 : i32, i32
  }
  func.func @transform_2(%arg0: i32) -> (i32, i32) {
    %c0_i32 = arith.constant 0 : i32
    %c0_i32_0 = arith.constant 0 : i32
    %c0_i32_1 = arith.constant 0 : i32
    return %c0_i32, %c0_i32_0 : i32, i32
  }
  func.func @transform_3(%arg0: i32) -> (i32, i32) {
    %c0_i32 = arith.constant 0 : i32
    %c0_i32_0 = arith.constant 0 : i32
    %c0_i32_1 = arith.constant 0 : i32
    return %c0_i32, %c0_i32_0 : i32, i32
  }
  func.func @transform_4(%arg0: i32) -> (i32, i32) {
    %c0_i32 = arith.constant 0 : i32
    %c0_i32_0 = arith.constant 0 : i32
    %c0_i32_1 = arith.constant 0 : i32
    return %c0_i32, %c0_i32_0 : i32, i32
  }
  func.func @transform_5(%arg0: i32) -> (i32, i32) {
    %c0_i32 = arith.constant 0 : i32
    %c0_i32_0 = arith.constant 0 : i32
    %c0_i32_1 = arith.constant 0 : i32
    return %c0_i32, %c0_i32_0 : i32, i32
  }
  func.func @transform_6(%arg0: i32) -> (i32, i32) {
    %c0_i32 = arith.constant 0 : i32
    %c0_i32_0 = arith.constant 0 : i32
    %c0_i32_1 = arith.constant 0 : i32
    return %c0_i32, %c0_i32_0 : i32, i32
  }
  func.func @transform_7(%arg0: i32) -> (i32, i32) {
    %c0_i32 = arith.constant 0 : i32
    %c0_i32_0 = arith.constant 0 : i32
    %c0_i32_1 = arith.constant 0 : i32
    return %c0_i32, %c0_i32_0 : i32, i32
  }
  func.func @transform_8(%arg0: i32) -> (i32, i32) {
    %c0_i32 = arith.constant 0 : i32
    %c0_i32_0 = arith.constant 0 : i32
    %c0_i32_1 = arith.constant 0 : i32
    return %c0_i32, %c0_i32_0 : i32, i32
  }
  func.func @transform_9(%arg0: i32) -> (i32, i32) {
    %c0_i32 = arith.constant 0 : i32
    %c0_i32_0 = arith.constant 0 : i32
    return %arg0, %c0_i32 : i32, i32
  }
}

</mosaic_0001>

<bundles_post_ra>
// kernel: tile.13
= control target key start
LH: loop header
LB: loop body
LE: loop exit
PB: predicated region body
PF: predicated region fallthrough
CT: control target
= control target key end

     0   :  { %s52_s0 = inlined_call_operand.vmem [shape: f32[32], index: 0, kind: input, shape index: {}]   ;;  %s53_s1 = inlined_call_operand.vmem [shape: f32[48,32], index: 1, kind: output, shape index: {}]  }
   0x1   :  { %v4_v0 = vld [vmem:[%s52_s0] ss:$0 sm:$0xff] }
   0x2   :  { %5 = vst [vmem:[%s53_s1] sm:$0xff] %v4_v0  ;;  %16 = vst [vmem:[%s53_s1 + $0x8] sm:$0xff] %v4_v0 }
   0x3   :  { %17 = vst [vmem:[%s53_s1 + $0x10] sm:$0xff] %v4_v0  ;;  %18 = vst [vmem:[%s53_s1 + $0x18] sm:$0xff] %v4_v0 }
   0x4   :  { %19 = vst [vmem:[%s53_s1 + $0x20] sm:$0xff] %v4_v0  ;;  %20 = vst [vmem:[%s53_s1 + $0x28] sm:$0xff] %v4_v0 }

// kernel: tile.14
= control target key start
LH: loop header
LB: loop body
LE: loop exit
PB: predicated region body
PF: predicated region fallthrough
CT: control target
= control target key end

     0   :  { %s168_s10 = smov 64   ;;  %s169_s11 = smov 96   ;;  %vm3_vm0 = vcmask 261120   ;;  %vm15_vm1 = vcmask 1048320   ;;  %vm29_vm2 = vcmask 785920   ;;  %vm43_vm3 = vcmask 523520   ;;  %s241_s0 = inlined_call_operand.vmem [shape: f32[48,32], index: 0, kind: input, shape index: {}]   ;;  %s242_s1 = inlined_call_operand.vmem [shape: f32[1,1536], index: 1, kind: output, shape index: {}]  }
   0x1   :  { %v150_v0 = vld [vmem:[%s241_s0 + $0x2] ss:$4 sm:$0xff]   ;;  %v148_v1 = vld [vmem:[%s241_s0 + $0x3] ss:$4 sm:$0xff]   ;;  %v2_v4 = vld [vmem:[%s241_s0] ss:$4 sm:$0xff]  }
   0x2   :  { %27 = vrot.lane.b32.xlu1 %v150_v0, %s168_s10  ;;  %13 = vrot.lane.b32.xlu0 %v148_v1, %s169_s11  ;;  %v151_v2 = vld [vmem:[%s241_s0 + $0x22] ss:$4 sm:$0xf]   ;;  %v149_v3 = vld [vmem:[%s241_s0 + $0x23] ss:$4 sm:$0xf]  }
   0x3   :  { %4 = vst.msk [vmem:[#allocation0] ss:$8 sm:$0xf] %vm3_vm0, %v2_v4   ;;  %5 = vst.msk [vmem:[#allocation0] ss:$8 sm:$0xf0] %vm3_vm0, %v2_v4  }
   0x4   :  { %v147_v5 = vld [vmem:[%s241_s0 + $0x20] ss:$4 sm:$0xf]   ;;  %v153_v6 = vld [vmem:[%s241_s0 + $0x21] ss:$4 sm:$0xf]  }
   0x5   :  { %10 = vst.msk [vmem:[#allocation0 + $0x40] ss:$8 sm:$0xf] %vm3_vm0, %v147_v5   ;;  %v152_v7 = vld [vmem:[%s241_s0 + $0x1] ss:$4 sm:$0xff]   ;;  %s170_s0 = smov 32  }
   0x6   :  { %34 = vrot.lane.b32.xlu1 %v151_v2, %s168_s10  ;;  %20 = vrot.lane.b32.xlu0 %v149_v3, %s169_s11 }
   0xa   :  { %48 = vrot.lane.b32.xlu1 %v153_v6, %s170_s0  ;;  %41 = vrot.lane.b32.xlu0 %v152_v7, %s170_s0 }
  0x74   :  { %v28_v8 = vpop.permute.xlu1 %27   ;;  %v14_v9 = vpop.permute.xlu0 %13  }
  0x75   :  { %16 = vst.msk [vmem:[#allocation0] ss:$8 sm:$0xf] %vm15_vm1, %v14_v9   ;;  %17 = vst.msk [vmem:[#allocation0] ss:$8 sm:$0xf0] %vm15_vm1, %v14_v9  }
  0x76   :  { %30 = vst.msk [vmem:[#allocation0] ss:$8 sm:$0xf] %vm29_vm2, %v28_v8   ;;  %31 = vst.msk [vmem:[#allocation0] ss:$8 sm:$0xf0] %vm29_vm2, %v28_v8  }
  0x78   :  { %v35_v10 = vpop.permute.xlu1 %34   ;;  %v21_v11 = vpop.permute.xlu0 %20  }
  0x79   :  { %24 = vst.msk [vmem:[#allocation0 + $0x40] ss:$8 sm:$0xf] %vm15_vm1, %v21_v11  }
  0x7a   :  { %38 = vst.msk [vmem:[#allocation0 + $0x40] ss:$8 sm:$0xf] %vm29_vm2, %v35_v10  }
  0x7c   :  { %v49_v12 = vpop.permute.xlu1 %48   ;;  %v42_v13 = vpop.permute.xlu0 %41  }
  0x7d   :  { %52 = vst.msk [vmem:[#allocation0 + $0x40] ss:$8 sm:$0xf] %vm43_vm3, %v49_v12   ;;  %44 = vst.msk [vmem:[#allocation0] ss:$8 sm:$0xf] %vm43_vm3, %v42_v13  }
  0x7e   :  { %45 = vst.msk [vmem:[#allocation0] ss:$8 sm:$0xf0] %vm43_vm3, %v42_v13  }
  0x84   :  { %v110_v14 = vld [vmem:[#allocation0 + $0x40] sm:$0x1]  ;;  %v117_v15 = vld [vmem:[#allocation0 + $0x48] sm:$0x1]  ;;  %v124_v16 = vld [vmem:[#allocation0 + $0x50] sm:$0x1] }
  0x85   :  { %161 = vst [vmem:[%s242_s1 + $0x8] sm:$0x1] %v110_v14  ;;  %162 = vst [vmem:[%s242_s1 + $0x9] sm:$0x1] %v117_v15  ;;  %v131_v17 = vld [vmem:[#allocation0 + $0x58] sm:$0x1] }
  0x86   :  { %163 = vst [vmem:[%s242_s1 + $0xa] sm:$0x1] %v124_v16  ;;  %v57_v18 = vld [vmem:[#allocation0] sm:$0x1]  ;;  %v62_v19 = vld [vmem:[#allocation0 + $0x8] sm:$0x1] }
  0x87   :  { %164 = vst [vmem:[%s242_s1 + $0xb] sm:$0x1] %v131_v17  ;;  %60 = vst [vmem:[%s242_s1] sm:$0x1] %v57_v18  ;;  %v68_v20 = vld [vmem:[#allocation0 + $0x10] sm:$0x1] }
  0x88   :  { %154 = vst [vmem:[%s242_s1 + $0x1] sm:$0x1] %v62_v19  ;;  %v75_v21 = vld [vmem:[#allocation0 + $0x18] sm:$0x1]  ;;  %v82_v22 = vld [vmem:[#allocation0 + $0x20] sm:$0x1] }
  0x89   :  { %155 = vst [vmem:[%s242_s1 + $0x2] sm:$0x1] %v68_v20  ;;  %156 = vst [vmem:[%s242_s1 + $0x3] sm:$0x1] %v75_v21  ;;  %v89_v23 = vld [vmem:[#allocation0 + $0x28] sm:$0x1] }
  0x8a   :  { %157 = vst [vmem:[%s242_s1 + $0x4] sm:$0x1] %v82_v22  ;;  %v96_v24 = vld [vmem:[#allocation0 + $0x30] sm:$0x1]  ;;  %v103_v25 = vld [vmem:[#allocation0 + $0x38] sm:$0x1] }
  0x8b   :  { %158 = vst [vmem:[%s242_s1 + $0x5] sm:$0x1] %v89_v23  ;;  %159 = vst [vmem:[%s242_s1 + $0x6] sm:$0x1] %v96_v24 }
  0x8c   :  { %160 = vst [vmem:[%s242_s1 + $0x7] sm:$0x1] %v103_v25 }

// kernel: tile.18
= control target key start
LH: loop header
LB: loop body
LE: loop exit
PB: predicated region body
PF: predicated region fallthrough
CT: control target
= control target key end

     0   :  { %s22_s0 = inlined_call_operand.vmem [shape: f32[32], index: 0, kind: input, shape index: {}]   ;;  %s23_s1 = inlined_call_operand.vmem [shape: f32[8,32], index: 1, kind: output, shape index: {}]  }
   0x1   :  { %v4_v0 = vld [vmem:[%s22_s0] ss:$0 sm:$0xff] }
   0x2   :  { %5 = vst [vmem:[%s23_s1] sm:$0xff] %v4_v0 }

// kernel: tile.19
= control target key start
LH: loop header
LB: loop body
LE: loop exit
PB: predicated region body
PF: predicated region fallthrough
CT: control target
= control target key end

     0   :  { %s7_s6 = smov 3  ;;  %s14_s9 = smov 3  ;;  %vm4_vm0 = vcmask 261120   ;;  %vm11_vm1 = vcmask 1048320   ;;  %vm18_vm2 = vcmask 785920   ;;  %vm25_vm3 = vcmask 523520   ;;  %s79_s0 = inlined_call_operand.vmem [shape: f32[8,32], index: 0, kind: input, shape index: {}]   ;;  %s80_s1 = inlined_call_operand.vmem [shape: f32[1,256], index: 1, kind: output, shape index: {}]  }
   0x1   :  { %v41_v0 = vld [vmem:[%s79_s0 + $0x3] ss:$4 sm:%s7_s6]   ;;  %s48_s10 = smov 96   ;;  %s21_s11 = smov 3  ;;  %v42_v1 = vld [vmem:[%s79_s0 + $0x2] ss:$4 sm:%s14_s9]  }
   0x2   :  { %9 = vrot.lane.b32.xlu0 %v41_v0, %s48_s10  ;;  %v43_v2 = vld [vmem:[%s79_s0 + $0x1] ss:$4 sm:%s21_s11]   ;;  %s2_s16 = smov 3  ;;  %s49_s17 = smov 32  }
   0x3   :  { %23 = vrot.lane.b32.xlu1 %v43_v2, %s49_s17  ;;  %v3_v3 = vld [vmem:[%s79_s0] ss:$4 sm:%s2_s16]   ;;  %s50_s0 = smov 64  }
   0x4   :  { %5 = vst.msk [vmem:[#allocation0] ss:$8 sm:$0x3] %vm4_vm0, %v3_v3  }
   0x6   :  { %16 = vrot.lane.b32.xlu0 %v42_v1, %s50_s0 }
  0x74   :  { %v10_v4 = vpop.permute.xlu0 %9  }
  0x75   :  { %12 = vst.msk [vmem:[#allocation0] ss:$8 sm:$0x3] %vm11_vm1, %v10_v4   ;;  %v24_v5 = vpop.permute.xlu1 %23  }
  0x78   :  { %v17_v6 = vpop.permute.xlu0 %16  }
  0x79   :  { %19 = vst.msk [vmem:[#allocation0] ss:$8 sm:$0x3] %vm18_vm2, %v17_v6  }
  0x7a   :  { %26 = vst.msk [vmem:[#allocation0] ss:$8 sm:$0x3] %vm25_vm3, %v24_v5  }
  0x81   :  { %v31_v7 = vld [vmem:[#allocation0] sm:$0x1]  ;;  %v36_v8 = vld [vmem:[#allocation0 + $0x8] sm:$0x1] }
  0x82   :  { %34 = vst [vmem:[%s80_s1] sm:$0x1] %v31_v7  ;;  %44 = vst [vmem:[%s80_s1 + $0x1] sm:$0x1] %v36_v8 }

// kernel: cnn_forward.1
= control target key start
LH: loop header
LB: loop body
LE: loop exit
PB: predicated region body
PF: predicated region fallthrough
CT: control target
= control target key end

     0   :  { %s7686_s30 = smov 0   ;;  %s11269_s0 = inlined_call_operand.vmem [shape: bf16[256,168], index: 0, kind: input, shape index: {}]   ;;  %s11270_s1 = inlined_call_operand.vmem [shape: bf16[168,1536], index: 1, kind: input, shape index: {}]   ;;  %s11271_s2 = inlined_call_operand.vmem [shape: f32[1,1536], index: 2, kind: input, shape index: {}]   ;;  %s11272_s3 = inlined_call_operand.vmem [shape: bf16[1920,256], index: 3, kind: input, shape index: {}]   ;;  %s11273_s4 = inlined_call_operand.vmem [shape: f32[1,256], index: 4, kind: input, shape index: {}]   ;;  %s11274_s5 = inlined_call_operand.vmem [shape: bf16[512,128], index: 5, kind: input, shape index: {}]   ;;  %s11275_s6 = inlined_call_operand.vmem [shape: f32[1,128], index: 6, kind: input, shape index: {}]   ;;  %s11276_s7 = inlined_call_operand.vmem [shape: bf16[128,128], index: 7, kind: input, shape index: {}]   ;;  %s11277_s8 = inlined_call_operand.vmem [shape: f32[1,128], index: 8, kind: input, shape index: {}]   ;;  %s11278_s9 = inlined_call_operand.vmem [shape: f32[16,128], index: 9, kind: output, shape index: {}]  }
   0x1 LB: > { %s7692_s10 = sadd.s32 4294967295, %s7631_s30   ;;  %p6245_p0 = scmp.ge.s32.totalorder %s7631_s30, 1  ;;  %s7631_s30 = sphi %s7686_s30, %s19_s30  }
   0x2   : > { %p289_p1 = scmp.lt.s32.totalorder %s7631_s30, 3 }
   0x4   : > { %p290_p2 = pnand %p6245_p0, %p289_p1 }
   0x6   : > { %293 = sbr.rel (%p290_p2) target bundleno = 1578 (0x62a), region = 56 }
   0xb   : > { %v6977_v0 = vld [vmem:[%s11270_s1 + $0x2a4] ss:$48 sps:$4 sm:$0xff]   ;;  %v6979_v1 = vld [vmem:[%s11270_s1 + $0x2ac] ss:$48 sps:$4 sm:$0xff]   ;;  %v6981_v2 = vld [vmem:[%s11270_s1 + $0x2a0] ss:$48 sps:$4 sm:$0xff]  }
   0xc   : > { %1307 = vmatprep.subr.bf16.mxu0 %v6977_v0  ;;  %v6982_v3 = vld [vmem:[%s11270_s1 + $0x2a8] ss:$48 sps:$4 sm:$0xff]   ;;  %1420 = vmatprep.subr.bf16.mxu1 %v6979_v1  ;;  %v6983_v4 = vld [vmem:[%s11270_s1 + $0x244] ss:$48 sps:$4 sm:$0xff]   ;;  %v6985_v5 = vld [vmem:[%s11270_s1 + $0x24c] ss:$48 sps:$4 sm:$0xff]  }
   0xd   : > { %1308 = vmatpush1.bf16.msra.mxu0 %v6981_v2  ;;  %1421 = vmatpush1.bf16.msra.mxu1 %v6982_v3  ;;  %v6987_v6 = vld [vmem:[%s11270_s1 + $0x240] ss:$48 sps:$4 sm:$0xff]   ;;  %v6988_v7 = vld [vmem:[%s11270_s1 + $0x248] ss:$48 sps:$4 sm:$0xff]   ;;  %v6989_v8 = vld [vmem:[%s11270_s1 + $0x1e4] ss:$48 sps:$4 sm:$0xff]  }
   0xe   : > { %1309 = vmatprep.subr.bf16.mxu0 %v6983_v4  ;;  %1422 = vmatprep.subr.bf16.mxu1 %v6985_v5  ;;  %v6991_v9 = vld [vmem:[%s11270_s1 + $0x1ec] ss:$48 sps:$4 sm:$0xff]   ;;  %v6993_v10 = vld [vmem:[%s11270_s1 + $0x1e0] ss:$48 sps:$4 sm:$0xff]   ;;  %v6994_v11 = vld [vmem:[%s11270_s1 + $0x1e8] ss:$48 sps:$4 sm:$0xff]  }
   0xf   : > { %v6995_v12 = vld [vmem:[%s11270_s1 + $0x184] ss:$48 sps:$4 sm:$0xff]   ;;  %v6997_v13 = vld [vmem:[%s11270_s1 + $0x18c] ss:$48 sps:$4 sm:$0xff]   ;;  %v6999_v14 = vld [vmem:[%s11270_s1 + $0x180] ss:$48 sps:$4 sm:$0xff]  }
  0x10   : > { %s6246_s22 = sshll.u32 %s7692_s10, 4  ;;  %v7000_v15 = vld [vmem:[%s11270_s1 + $0x188] ss:$48 sps:$4 sm:$0xff]   ;;  %v7001_v16 = vld [vmem:[%s11270_s1 + $0x124] ss:$48 sps:$4 sm:$0xff]   ;;  %vm1245_vm0 = vcmask 326656  }
  0x11   : > { %1310 = vmatpush1.bf16.msra.mxu0 %v6987_v6  ;;  %1423 = vmatpush1.bf16.msra.mxu1 %v6988_v7  ;;  %v7003_v17 = vld [vmem:[%s11270_s1 + $0x12c] ss:$48 sps:$4 sm:$0xff]   ;;  %p326_p3 = scmp.lt.s32.totalorder %s6246_s22, 31  ;;  %v7005_v18 = vld [vmem:[%s11270_s1 + $0x120] ss:$48 sps:$4 sm:$0xff]   ;;  %vm1270_vm1 = vcmask 1043456  }
  0x12   : > { %1311 = vmatprep.subr.bf16.mxu0 %v6989_v8  ;;  %1424 = vmatprep.subr.bf16.mxu1 %v6991_v9  ;;  %v7006_v19 = vld [vmem:[%s11270_s1 + $0x128] ss:$48 sps:$4 sm:$0xff]   ;;  %v7007_v20 = vld [vmem:[%s11270_s1 + $0xc4] ss:$48 sps:$4 sm:$0xff]   ;;  %v7009_v21 = vld [vmem:[%s11270_s1 + $0xcc] ss:$48 sps:$4 sm:$0xff]  }
  0x13   : > { %s11702_s22 = smov (!%p326_p3, %s6246_s22), 31  ;;  %v7011_v22 = vld [vmem:[%s11270_s1 + $0xc0] ss:$48 sps:$4 sm:$0xff]   ;;  %v7012_v23 = vld [vmem:[%s11270_s1 + $0xc8] ss:$48 sps:$4 sm:$0xff]   ;;  %vm2692_vm5 = vcmask 1042432  }
  0x14   : > { %v7013_v24 = vld [vmem:[%s11270_s1 + $0x64] ss:$48 sps:$4 sm:$0xff]   ;;  %v7015_v25 = vld [vmem:[%s11270_s1 + $0x6c] ss:$48 sps:$4 sm:$0xff]   ;;  %s6860_s27 = sshll.u32 %s11702_s22, 3  ;;  %vm2693_vm6 = vcmask 1046532  }
  0x15   : > { %1312 = vmatpush1.bf16.msra.mxu0 %v6993_v10  ;;  %1425 = vmatpush1.bf16.msra.mxu1 %v6994_v11  ;;  %v7017_v26 = vld [vmem:[%s11270_s1 + $0x60] ss:$48 sps:$4 sm:$0xff]   ;;  %v7018_v27 = vld [vmem:[%s11270_s1 + $0x68] ss:$48 sps:$4 sm:$0xff]   ;;  %v7019_v28 = vld [vmem:[%s11270_s1 + $0x4] ss:$48 sps:$4 sm:$0xff]   ;;  %s7793_s20 = scalar_lea.vmem %s11269_s0, %s6860_s27 }
  0x16   : > { %1313 = vmatprep.subr.bf16.mxu0 %v6995_v12  ;;  %1426 = vmatprep.subr.bf16.mxu1 %v6997_v13  ;;  %v7021_v29 = vld [vmem:[%s11270_s1 + $0xc] ss:$48 sps:$4 sm:$0xff]   ;;  %v473_v30 = vld [vmem:[%s11270_s1 + $0x3c0] sm:$0xff]  ;;  %v7024_v33 = vld [vmem:[%s11270_s1 + $0x8] ss:$48 sps:$4 sm:$0xff]   ;;  %vm3114_vm11 = vcmask 1041408  }
  0x17   : > { %v474_v31 = vld [vmem:[%s11270_s1 + $0x3c8] sm:$0xff]  ;;  %v7023_v32 = vld [vmem:[%s11270_s1] ss:$48 sps:$4 sm:$0xff]   ;;  %v6387_v34 = vcombine.high %v473_v30, %v473_v30  ;;  %v6386_v37 = vcombine.low %v473_v30, %v473_v30  ;;  %v7029_v39 = vld [vmem:[%s11270_s1 + $0x364] ss:$48 sps:$4 sm:$0xff]   ;;  %vm3115_vm12 = vcmask 1045508  }
  0x18   : > { %v7805_v35 = vld [vmem:[%s7793_s20 + $0x4] ss:$8 sps:$4 sm:$0xff]   ;;  %v6389_v36 = vcombine.high %v474_v31, %v474_v31  ;;  %v6388_v38 = vcombine.low %v474_v31, %v474_v31  ;;  %v7033_v43 = vld [vmem:[%s11270_s1 + $0x360] ss:$48 sps:$4 sm:$0xff]   ;;  %v7034_v44 = vld [vmem:[%s11270_s1 + $0x368] ss:$48 sps:$4 sm:$0xff]  }
  0x19   : > { %1314 = vmatpush1.bf16.msra.mxu0 %v6999_v14  ;;  %1427 = vmatpush1.bf16.msra.mxu1 %v7000_v15  ;;  %v1272_v40 = vsel %vm1270_vm1, %v6386_v37, 0  ;;  %v7031_v42 = vld [vmem:[%s11270_s1 + $0x36c] ss:$48 sps:$4 sm:$0xff]   ;;  %v7035_v45 = vld [vmem:[%s11270_s1 + $0x304] ss:$48 sps:$4 sm:$0xff]   ;;  %vm9894_vm7 = vmor %vm2692_vm5, %vm2693_vm6  ;;  %vm5626_vm14 = vcmask 1041409  }
  0x1a   : > { %1315 = vmatprep.subr.bf16.mxu0 %v7001_v16  ;;  %1428 = vmatprep.subr.bf16.mxu1 %v7003_v17  ;;  %v1278_v41 = vsel %vm1270_vm1, %v6388_v38, 0  ;;  %v7037_v46 = vld [vmem:[%s11270_s1 + $0x30c] ss:$48 sps:$4 sm:$0xff]   ;;  %v7039_v47 = vld [vmem:[%s11270_s1 + $0x300] ss:$48 sps:$4 sm:$0xff]   ;;  %vm10488_vm13 = vmor %vm3114_vm11, %vm3115_vm12  ;;  %vm5629_vm15 = vcmask 1042434  }
  0x1b   : > { %6399 = vmatprep.mubr.msk.bf16.mxu0 %vm1245_vm0, %v7805_v35  ;;  %6408 = vmatprep.mubr.msk.bf16.mxu1 %vm1245_vm0, %v7805_v35  ;;  %v7040_v48 = vld [vmem:[%s11270_s1 + $0x308] ss:$48 sps:$4 sm:$0xff]   ;;  %v7046_v49 = vld [vmem:[%s11270_s1 + $0x2b4] ss:$48 sps:$4 sm:$0xff]   ;;  %v7049_v50 = vld [vmem:[%s11270_s1 + $0x2bc] ss:$48 sps:$4 sm:$0xff]  }
  0x1c   : > { %v7846_v51 = vld [vmem:[%s7793_s20] ss:$8 sps:$4 sm:$0xff]   ;;  %v7052_v54 = vld [vmem:[%s11270_s1 + $0x254] ss:$48 sps:$4 sm:$0xff]   ;;  %v7058_v56 = vld [vmem:[%s11270_s1 + $0x25c] ss:$48 sps:$4 sm:$0xff]  }
  0x1d   : > { %1316 = vmatpush1.bf16.msra.mxu0 %v7005_v18  ;;  %1429 = vmatpush1.bf16.msra.mxu1 %v7006_v19  ;;  %v7044_v52 = vld [vmem:[%s11270_s1 + $0x2b0] ss:$48 sps:$4 sm:$0xff]   ;;  %v7047_v53 = vld [vmem:[%s11270_s1 + $0x2b8] ss:$48 sps:$4 sm:$0xff]   ;;  %v7858_v55 = vld [vmem:[%s7793_s20 + $0x14] ss:$8 sps:$4 sm:$0xff]  }
  0x1e   : > { %1317 = vmatprep.subr.bf16.mxu0 %v7007_v20  ;;  %1430 = vmatprep.subr.bf16.mxu1 %v7009_v21  ;;  %v7050_v57 = vld [vmem:[%s11270_s1 + $0x250] ss:$48 sps:$4 sm:$0xff]   ;;  %v7056_v58 = vld [vmem:[%s11270_s1 + $0x258] ss:$48 sps:$4 sm:$0xff]   ;;  %v7061_v59 = vld [vmem:[%s11270_s1 + $0x1f4] ss:$48 sps:$4 sm:$0xff]  }
  0x1f   : > { %v7064_v60 = vld [vmem:[%s11270_s1 + $0x1fc] ss:$48 sps:$4 sm:$0xff]   ;;  %v7882_v61 = vld [vmem:[%s7793_s20 + $0x10] ss:$8 sps:$4 sm:$0xff]   ;;  %v7070_v1 = vld [vmem:[%s11270_s1 + $0x194] ss:$48 sps:$4 sm:$0xff]  }
  0x20   : > { %v7059_v62 = vld [vmem:[%s11270_s1 + $0x1f0] ss:$48 sps:$4 sm:$0xff]   ;;  %v7062_v63 = vld [vmem:[%s11270_s1 + $0x1f8] ss:$48 sps:$4 sm:$0xff]   ;;  %v7891_v0 = vld [vmem:[%s7793_s20 + $0x24] ss:$8 sps:$4 sm:$0xff]  }
  0x21   : > { %1318 = vmatpush1.bf16.msra.mxu0 %v7011_v22  ;;  %1431 = vmatpush1.bf16.msra.mxu1 %v7012_v23  ;;  %v7073_v2 = vld [vmem:[%s11270_s1 + $0x19c] ss:$48 sps:$4 sm:$0xff]   ;;  %v7068_v3 = vld [vmem:[%s11270_s1 + $0x190] ss:$48 sps:$4 sm:$0xff]   ;;  %v7071_v4 = vld [vmem:[%s11270_s1 + $0x198] ss:$48 sps:$4 sm:$0xff]  }
  0x22   : > { %1319 = vmatprep.subr.bf16.mxu0 %v7013_v24  ;;  %1432 = vmatprep.subr.bf16.mxu1 %v7015_v25  ;;  %v7079_v5 = vld [vmem:[%s11270_s1 + $0x134] ss:$48 sps:$4 sm:$0xff]   ;;  %v7915_v6 = vld [vmem:[%s7793_s20 + $0x20] ss:$8 sps:$4 sm:$0xff]   ;;  %v7082_v7 = vld [vmem:[%s11270_s1 + $0x13c] ss:$48 sps:$4 sm:$0xff]  }
  0x23   : > { %v7921_v8 = vld [vmem:[%s7793_s20 + $0x34] ss:$8 sps:$4 sm:$0xff]   ;;  %v7077_v9 = vld [vmem:[%s11270_s1 + $0x130] ss:$48 sps:$4 sm:$0xff]   ;;  %v7080_v10 = vld [vmem:[%s11270_s1 + $0x138] ss:$48 sps:$4 sm:$0xff]  }
  0x24   : > { %v7085_v11 = vld [vmem:[%s11270_s1 + $0xd4] ss:$48 sps:$4 sm:$0xff]   ;;  %v7091_v12 = vld [vmem:[%s11270_s1 + $0xdc] ss:$48 sps:$4 sm:$0xff]   ;;  %v7942_v13 = vld [vmem:[%s7793_s20 + $0x30] ss:$8 sps:$4 sm:$0xff]  }
  0x25   : > { %1320 = vmatpush1.bf16.msra.mxu0 %v7017_v26  ;;  %1433 = vmatpush1.bf16.msra.mxu1 %v7018_v27  ;;  %v7083_v14 = vld [vmem:[%s11270_s1 + $0xd0] ss:$48 sps:$4 sm:$0xff]   ;;  %v7089_v15 = vld [vmem:[%s11270_s1 + $0xd8] ss:$48 sps:$4 sm:$0xff]   ;;  %v7094_v16 = vld [vmem:[%s11270_s1 + $0x74] ss:$48 sps:$4 sm:$0xff]  }
  0x26   : > { %1321 = vmatprep.subr.bf16.mxu0 %v7019_v28  ;;  %1434 = vmatprep.subr.bf16.mxu1 %v7021_v29  ;;  %v7097_v17 = vld [vmem:[%s11270_s1 + $0x7c] ss:$48 sps:$4 sm:$0xff]   ;;  %v7092_v19 = vld [vmem:[%s11270_s1 + $0x70] ss:$48 sps:$4 sm:$0xff]   ;;  %v7095_v20 = vld [vmem:[%s11270_s1 + $0x78] ss:$48 sps:$4 sm:$0xff]  }
  0x27   : > { %v7957_v18 = vld [vmem:[%s7793_s20 + $0x44] ss:$8 sps:$4 sm:$0xff]   ;;  %v475_v23 = vld [vmem:[%s11270_s1 + $0x3d0] sm:$0xff]  ;;  %v476_v24 = vld [vmem:[%s11270_s1 + $0x3d8] sm:$0xff]  ;;  %vm2417_vm2 = vsmask.f32 3328 }
  0x28   : > { %v7103_v21 = vld [vmem:[%s11270_s1 + $0x14] ss:$48 sps:$4 sm:$0xff]   ;;  %v7106_v22 = vld [vmem:[%s11270_s1 + $0x1c] ss:$48 sps:$4 sm:$0xff]   ;;  %v7101_v25 = vld [vmem:[%s11270_s1 + $0x10] ss:$48 sps:$4 sm:$0xff]   ;;  %v6391_v27 = vcombine.high %v475_v23, %v475_v23  ;;  %v6390_v28 = vcombine.low %v475_v23, %v475_v23  ;;  %v6393_v29 = vcombine.high %v476_v24, %v476_v24  ;;  %v6392_v30 = vcombine.low %v476_v24, %v476_v24 }
  0x29   : > { %1322 = vmatpush1.bf16.msra.mxu0 %v7023_v32  ;;  %1435 = vmatpush1.bf16.msra.mxu1 %v7024_v33  ;;  %v7104_v26 = vld [vmem:[%s11270_s1 + $0x18] ss:$48 sps:$4 sm:$0xff]   ;;  %v7993_v32 = vld [vmem:[%s7793_s20 + $0x54] ss:$8 sps:$4 sm:$0xff]   ;;  %v7114_v38 = vld [vmem:[%s11270_s1 + $0x370] ss:$48 sps:$4 sm:$0xff]  }
  0x2a   : > { %6398 = vmatprep.subr.msk.bf16.mxu0 %vm1270_vm1, %v6387_v34  ;;  %6407 = vmatprep.subr.msk.bf16.mxu1 %vm1270_vm1, %v6389_v36  ;;  %v7990_v31 = vld [vmem:[%s7793_s20 + $0x40] ss:$8 sps:$4 sm:$0xff]   ;;  %v7116_v33 = vld [vmem:[%s11270_s1 + $0x374] ss:$48 sps:$4 sm:$0xff]   ;;  %v1284_v34 = vsel %vm1270_vm1, %v6390_v28, 0  ;;  %v1290_v36 = vsel %vm1270_vm1, %v6392_v30, 0 }
  0x2b   : > { %v7121_v37 = vld [vmem:[%s11270_s1 + $0x37c] ss:$48 sps:$4 sm:$0xff]   ;;  %v7183_v23 = vld [vmem:[%s11270_s1 + $0x384] ss:$48 sps:$4 sm:$0xff]   ;;  %v7187_v30 = vld [vmem:[%s11270_s1 + $0x320] ss:$48 sps:$4 sm:$0xff]  }
  0x2c   : > { %v7186_v24 = vld [vmem:[%s11270_s1 + $0x38c] ss:$48 sps:$4 sm:$0xff]   ;;  %v7189_v28 = vld [vmem:[%s11270_s1 + $0x324] ss:$48 sps:$4 sm:$0xff]   ;;  %vm2418_vm3 = vsmask.f32 7440 }
  0x2d   : > { %1334 = vmatpush2.bf16.msra.mxu0 %v1272_v40  ;;  %1447 = vmatpush2.bf16.msra.mxu1 %v1278_v41  ;;  %v7125_v40 = vld [vmem:[%s11270_s1 + $0x314] ss:$48 sps:$4 sm:$0xff]   ;;  %v7128_v41 = vld [vmem:[%s11270_s1 + $0x31c] ss:$48 sps:$4 sm:$0xff]   ;;  %vm9519_vm4 = vmor %vm2417_vm2, %vm2418_vm3  ;;  %vm2775_vm8 = vsmask.f32 2304 }
  0x2e   : > { %1335 = vmatprep.subr.bf16.mxu0 %v7029_v39  ;;  %1448 = vmatprep.subr.bf16.mxu1 %v7031_v42  ;;  %v7119_v39 = vld [vmem:[%s11270_s1 + $0x378] ss:$48 sps:$4 sm:$0xff]   ;;  %vm2776_vm9 = vsmask.f32 6416  ;;  %vm5638_vm2 = vcmask 1045509   ;;  %vm5641_vm3 = vcmask 1046534  }
  0x2f   : > { %v8024_v42 = vld [vmem:[%s7793_s20 + $0x50] ss:$8 sps:$4 sm:$0xff]   ;;  %vm10074_vm10 = vmor %vm2775_vm8, %vm2776_vm9  ;;  %vm7635_vm5 = vmmov 0   ;;  %p332_p4 = scmp.lt.s32.totalorder %s7692_s10, 1 }
  0x31   : > { %1336 = vmatpush2.bf16.msra.mxu0 %v7033_v43  ;;  %1449 = vmatpush2.bf16.msra.mxu1 %v7034_v44  ;;  %v8027_v43 = vld [vmem:[%s7793_s20 + $0x64] ss:$8 sps:$4 sm:$0xff]   ;;  %v7123_v44 = vld [vmem:[%s11270_s1 + $0x310] ss:$48 sps:$4 sm:$0xff]   ;;  %s11704_s10 = smov (!%p332_p4, %s7692_s10), 1 }
  0x32   : > { %1337 = vmatprep.subr.bf16.mxu0 %v7035_v45  ;;  %1450 = vmatprep.subr.bf16.mxu1 %v7037_v46  ;;  %v7126_v45 = vld [vmem:[%s11270_s1 + $0x318] ss:$48 sps:$4 sm:$0xff]   ;;  %v7131_v46 = vld [vmem:[%s11270_s1 + $0x2c4] ss:$48 sps:$4 sm:$0xff]   ;;  %s6249_s16 = sshll.u32 %s11704_s10, 3 }
  0x33   : > { %s335_s18 = scalar_lea.vmem %s11278_s9, %s6249_s16 }
  0x35   : > { %1338 = vmatpush2.bf16.msra.mxu0 %v7039_v47  ;;  %1451 = vmatpush2.bf16.msra.mxu1 %v7040_v48  ;;  %v7134_v47 = vld [vmem:[%s11270_s1 + $0x2cc] ss:$48 sps:$4 sm:$0xff]   ;;  %v8048_v48 = vld [vmem:[%s7793_s20 + $0x60] ss:$8 sps:$4 sm:$0xff]  }
  0x36   : > { %1533 = vmatprep.subr.bf16.mxu0 %v7046_v49  ;;  %1646 = vmatprep.subr.bf16.mxu1 %v7049_v50  ;;  %v8051_v49 = vld [vmem:[%s7793_s20 + $0x74] ss:$8 sps:$4 sm:$0xff]   ;;  %v8060_v50 = vld [vmem:[%s7793_s20 + $0x70] ss:$8 sps:$4 sm:$0xff]  }
  0x38   : > { %1340 = vmatmul.mubr.bf16.vlgmr.msra.gmra.mxu0 %v7846_v51  ;;  %1453 = vmatmul.mubr.bf16.vlgmr.msra.gmra.mxu1 %v7846_v51 }
  0x39   : > { %1534 = vmatpush1.bf16.msra.mxu0 %v7044_v52  ;;  %1647 = vmatpush1.bf16.msra.mxu1 %v7047_v53  ;;  %v7129_v52 = vld [vmem:[%s11270_s1 + $0x2c0] ss:$48 sps:$4 sm:$0xff]   ;;  %v7132_v53 = vld [vmem:[%s11270_s1 + $0x2c8] ss:$48 sps:$4 sm:$0xff]  }
  0x3a   : > { %1535 = vmatprep.subr.bf16.mxu0 %v7052_v54  ;;  %6400 = vmatprep.mubr.msk.bf16.mxu0 %vm1245_vm0, %v7858_v55  ;;  %v7137_v54 = vld [vmem:[%s11270_s1 + $0x264] ss:$48 sps:$4 sm:$0xff]  }
  0x3b   : > { %6409 = vmatprep.mubr.msk.bf16.mxu1 %vm1245_vm0, %v7858_v55  ;;  %1648 = vmatprep.subr.bf16.mxu1 %v7058_v56  ;;  %v7140_v56 = vld [vmem:[%s11270_s1 + $0x26c] ss:$48 sps:$4 sm:$0xff]  }
  0x3d   : > { %1536 = vmatpush1.bf16.msra.mxu0 %v7050_v57  ;;  %1649 = vmatpush1.bf16.msra.mxu1 %v7056_v58  ;;  %v7138_v57 = vld [vmem:[%s11270_s1 + $0x268] ss:$48 sps:$4 sm:$0xff]   ;;  %v7143_v58 = vld [vmem:[%s11270_s1 + $0x204] ss:$48 sps:$4 sm:$0xff]  }
  0x3e   : > { %1537 = vmatprep.subr.bf16.mxu0 %v7061_v59  ;;  %1650 = vmatprep.subr.bf16.mxu1 %v7064_v60  ;;  %v7146_v59 = vld [vmem:[%s11270_s1 + $0x20c] ss:$48 sps:$4 sm:$0xff]   ;;  %v7144_v60 = vld [vmem:[%s11270_s1 + $0x208] ss:$48 sps:$4 sm:$0xff]  }
  0x40   : > { %1350 = vmatmul.mubr.bf16.gmra.mxu0 %v7882_v61  ;;  %1463 = vmatmul.mubr.bf16.gmra.mxu1 %v7882_v61 }
  0x41   : > { %1538 = vmatpush1.bf16.msra.mxu0 %v7059_v62  ;;  %6401 = vmatprep.mubr.msk.bf16.mxu0 %vm1245_vm0, %v7891_v0  ;;  %v7149_v62 = vld [vmem:[%s11270_s1 + $0x1a4] ss:$48 sps:$4 sm:$0xff]  }
  0x42   : > { %6410 = vmatprep.mubr.msk.bf16.mxu1 %vm1245_vm0, %v7891_v0  ;;  %1651 = vmatpush1.bf16.msra.mxu1 %v7062_v63  ;;  %v7152_v63 = vld [vmem:[%s11270_s1 + $0x1ac] ss:$48 sps:$4 sm:$0xff]  }
  0x43   : > { %1539 = vmatprep.subr.bf16.mxu0 %v7070_v1  ;;  %1652 = vmatprep.subr.bf16.mxu1 %v7073_v2  ;;  %v7150_v1 = vld [vmem:[%s11270_s1 + $0x1a8] ss:$48 sps:$4 sm:$0xff]   ;;  %v7155_v2 = vld [vmem:[%s11270_s1 + $0x144] ss:$48 sps:$4 sm:$0xff]  }
  0x45   : > { %1540 = vmatpush1.bf16.msra.mxu0 %v7068_v3  ;;  %v7158_v3 = vld [vmem:[%s11270_s1 + $0x14c] ss:$48 sps:$4 sm:$0xff]  }
  0x46   : > { %1653 = vmatpush1.bf16.msra.mxu1 %v7071_v4  ;;  %1541 = vmatprep.subr.bf16.mxu0 %v7079_v5  ;;  %v7156_v4 = vld [vmem:[%s11270_s1 + $0x148] ss:$48 sps:$4 sm:$0xff]   ;;  %v7161_v5 = vld [vmem:[%s11270_s1 + $0xe4] ss:$48 sps:$4 sm:$0xff]  }
  0x47   : > { %1654 = vmatprep.subr.bf16.mxu1 %v7082_v7  ;;  %v7159_v7 = vld [vmem:[%s11270_s1 + $0xe0] ss:$48 sps:$4 sm:$0xff]  }
  0x48   : > { %1360 = vmatmul.mubr.bf16.gmra.mxu0 %v7915_v6  ;;  %1473 = vmatmul.mubr.bf16.gmra.mxu1 %v7915_v6 }
  0x49   : > { %6402 = vmatprep.mubr.msk.bf16.mxu0 %vm1245_vm0, %v7921_v8  ;;  %6411 = vmatprep.mubr.msk.bf16.mxu1 %vm1245_vm0, %v7921_v8 }
  0x4a   : > { %1542 = vmatpush1.bf16.msra.mxu0 %v7077_v9  ;;  %1655 = vmatpush1.bf16.msra.mxu1 %v7080_v10  ;;  %v7162_v9 = vld [vmem:[%s11270_s1 + $0xe8] ss:$48 sps:$4 sm:$0xff]   ;;  %v7167_v10 = vld [vmem:[%s11270_s1 + $0x84] ss:$48 sps:$4 sm:$0xff]  }
  0x4b   : > { %1543 = vmatprep.subr.bf16.mxu0 %v7085_v11  ;;  %1656 = vmatprep.subr.bf16.mxu1 %v7091_v12  ;;  %v7165_v11 = vld [vmem:[%s11270_s1 + $0x80] ss:$48 sps:$4 sm:$0xff]   ;;  %v7173_v12 = vld [vmem:[%s11270_s1 + $0x24] ss:$48 sps:$4 sm:$0xff]  }
  0x4e   : > { %1544 = vmatpush1.bf16.msra.mxu0 %v7083_v14  ;;  %1657 = vmatpush1.bf16.msra.mxu1 %v7089_v15  ;;  %v7176_v14 = vld [vmem:[%s11270_s1 + $0x2c] ss:$48 sps:$4 sm:$0xff]   ;;  %v477_v15 = vld [vmem:[%s11270_s1 + $0x3e0] sm:$0xff] }
  0x4f   : > { %1545 = vmatprep.subr.bf16.mxu0 %v7094_v16  ;;  %1658 = vmatprep.subr.bf16.mxu1 %v7097_v17  ;;  %v478_v16 = vld [vmem:[%s11270_s1 + $0x3e8] sm:$0xff]  ;;  %v7171_v17 = vld [vmem:[%s11270_s1 + $0x20] ss:$48 sps:$4 sm:$0xff]  }
  0x50   : > { %1370 = vmatmul.mubr.bf16.gmra.mxu0 %v7942_v13  ;;  %1483 = vmatmul.mubr.bf16.gmra.mxu1 %v7942_v13 }
  0x51   : > { %6403 = vmatprep.mubr.msk.bf16.mxu0 %vm1245_vm0, %v7957_v18  ;;  %6412 = vmatprep.mubr.msk.bf16.mxu1 %vm1245_vm0, %v7957_v18 }
  0x52   : > { %1546 = vmatpush1.bf16.msra.mxu0 %v7092_v19  ;;  %1659 = vmatpush1.bf16.msra.mxu1 %v7095_v20  ;;  %v7174_v19 = vld [vmem:[%s11270_s1 + $0x28] ss:$48 sps:$4 sm:$0xff]   ;;  %v6395_v20 = vcombine.high %v477_v15, %v477_v15 }
  0x53   : > { %1547 = vmatprep.subr.bf16.mxu0 %v7103_v21  ;;  %1660 = vmatprep.subr.bf16.mxu1 %v7106_v22  ;;  %v6397_v21 = vcombine.high %v478_v16, %v478_v16  ;;  %v6396_v22 = vcombine.low %v478_v16, %v478_v16  ;;  %v7234_v16 = vld [vmem:[%s11272_s3 + $0x124] ss:$8 sps:$4 sm:$0xff]  }
  0x56   : > { %1548 = vmatpush1.bf16.msra.mxu0 %v7101_v25  ;;  %1661 = vmatpush1.bf16.msra.mxu1 %v7104_v26  ;;  %v1302_v25 = vsel %vm1270_vm1, %v6396_v22, 0  ;;  %v7181_v26 = vld [vmem:[%s11270_s1 + $0x380] ss:$48 sps:$4 sm:$0xff]   ;;  %v7240_v22 = vld [vmem:[%s11272_s3 + $0x114] ss:$8 sps:$4 sm:$0xff]  }
  0x57   : > { %6416 = vmatprep.subr.msk.bf16.mxu0 %vm1270_vm1, %v6391_v27  ;;  %6425 = vmatprep.subr.msk.bf16.mxu1 %vm1270_vm1, %v6393_v29  ;;  %v7184_v27 = vld [vmem:[%s11270_s1 + $0x388] ss:$48 sps:$4 sm:$0xff]   ;;  %v7192_v29 = vld [vmem:[%s11270_s1 + $0x32c] ss:$48 sps:$4 sm:$0xff]  }
  0x58   : > { %1380 = vmatmul.mubr.bf16.gmra.mxu0 %v7990_v31  ;;  %1493 = vmatmul.mubr.bf16.gmra.mxu1 %v7990_v31 }
  0x59   : > { %6404 = vmatprep.mubr.msk.bf16.mxu0 %vm1245_vm0, %v7993_v32  ;;  %6413 = vmatprep.mubr.msk.bf16.mxu1 %vm1245_vm0, %v7993_v32 }
  0x5a   : > { %1560 = vmatpush2.bf16.msra.mxu0 %v1284_v34  ;;  %1673 = vmatpush2.bf16.msra.mxu1 %v1290_v36  ;;  %v7603_v34 = vld [vmem:[%s7793_s20 + $0x14] ss:$8 sps:$4 sm:$0xff]   ;;  %v7604_v36 = vld [vmem:[%s7793_s20 + $0x10] ss:$8 sps:$4 sm:$0xff]  }
  0x5b   : > { %1561 = vmatprep.subr.bf16.mxu0 %v7116_v33  ;;  %1674 = vmatprep.subr.bf16.mxu1 %v7121_v37  ;;  %v7602_v33 = vld [vmem:[%s7793_s20] ss:$8 sps:$4 sm:$0xff]   ;;  %v7605_v37 = vld [vmem:[%s7793_s20 + $0x24] ss:$8 sps:$4 sm:$0xff]  }
  0x5e   : > { %1562 = vmatpush2.bf16.msra.mxu0 %v7114_v38  ;;  %1675 = vmatpush2.bf16.msra.mxu1 %v7119_v39  ;;  %v7606_v38 = vld [vmem:[%s7793_s20 + $0x20] ss:$8 sps:$4 sm:$0xff]   ;;  %v7607_v39 = vld [vmem:[%s7793_s20 + $0x34] ss:$8 sps:$4 sm:$0xff]  }
  0x5f   : > { %1563 = vmatprep.subr.bf16.mxu0 %v7125_v40  ;;  %1676 = vmatprep.subr.bf16.mxu1 %v7128_v41  ;;  %v7195_v40 = vld [vmem:[%s11272_s3 + $0x74] ss:$8 sps:$4 sm:$0xff]   ;;  %v7193_v41 = vld [vmem:[%s11272_s3 + $0x70] ss:$8 sps:$4 sm:$0xff]  }
  0x60   : > { %1390 = vmatmul.mubr.bf16.gmra.mxu0 %v8024_v42  ;;  %1503 = vmatmul.mubr.bf16.gmra.mxu1 %v8024_v42 }
  0x61   : > { %6405 = vmatprep.mubr.msk.bf16.mxu0 %vm1245_vm0, %v8027_v43  ;;  %6414 = vmatprep.mubr.msk.bf16.mxu1 %vm1245_vm0, %v8027_v43 }
  0x62   : > { %1564 = vmatpush2.bf16.msra.mxu0 %v7123_v44  ;;  %1677 = vmatpush2.bf16.msra.mxu1 %v7126_v45  ;;  %v7198_v44 = vld [vmem:[%s11272_s3 + $0x64] ss:$8 sps:$4 sm:$0xff]   ;;  %v7196_v45 = vld [vmem:[%s11272_s3 + $0x60] ss:$8 sps:$4 sm:$0xff]  }
  0x63   : > { %1759 = vmatprep.subr.bf16.mxu0 %v7131_v46  ;;  %1872 = vmatprep.subr.bf16.mxu1 %v7134_v47  ;;  %v7201_v46 = vld [vmem:[%s11272_s3 + $0x54] ss:$8 sps:$4 sm:$0xff]   ;;  %v7199_v47 = vld [vmem:[%s11272_s3 + $0x50] ss:$8 sps:$4 sm:$0xff]  }
  0x68   : > { %1400 = vmatmul.mubr.bf16.gmra.mxu0 %v8048_v48  ;;  %1513 = vmatmul.mubr.bf16.gmra.mxu1 %v8048_v48 }
  0x69   : > { %6406 = vmatprep.mubr.msk.bf16.mxu0 %vm1245_vm0, %v8051_v49  ;;  %6415 = vmatprep.mubr.msk.bf16.mxu1 %vm1245_vm0, %v8051_v49 }
  0x70   : > { %1410 = vmatmul.mubr.bf16.gmra.mxu0 %v8060_v50  ;;  %1523 = vmatmul.mubr.bf16.gmra.mxu1 %v8060_v50 }
  0x71   : > { %6417 = vmatprep.mubr.msk.bf16.mxu0 %vm1245_vm0, %v7805_v35  ;;  %6426 = vmatprep.mubr.msk.bf16.mxu1 %vm1245_vm0, %v7805_v35  ;;  %v7135_v35 = vld [vmem:[%s11270_s1 + $0x260] ss:$48 sps:$4 sm:$0xff]  }
  0x78   : > { %1566 = vmatmul.mubr.bf16.vlgmr.msra.gmra.mxu0 %v7846_v51  ;;  %1679 = vmatmul.mubr.bf16.vlgmr.msra.gmra.mxu1 %v7846_v51  ;;  %v7141_v51 = vld [vmem:[%s11270_s1 + $0x200] ss:$48 sps:$4 sm:$0xff]  }
  0x79   : > { %1760 = vmatpush1.bf16.msra.mxu0 %v7129_v52  ;;  %1873 = vmatpush1.bf16.msra.mxu1 %v7132_v53  ;;  %v7205_v52 = vld [vmem:[%s11272_s3 + $0x40] ss:$8 sps:$4 sm:$0xff]   ;;  %v7213_v53 = vld [vmem:[%s11272_s3 + $0x34] ss:$8 sps:$4 sm:$0xff]  }
  0x7a   : > { %1761 = vmatprep.subr.bf16.mxu0 %v7137_v54  ;;  %6418 = vmatprep.mubr.msk.bf16.mxu0 %vm1245_vm0, %v7858_v55  ;;  %v7204_v54 = vld [vmem:[%s11272_s3 + $0x174] ss:$8 sps:$4 sm:$0xff]  }
  0x7b   : > { %6427 = vmatprep.mubr.msk.bf16.mxu1 %vm1245_vm0, %v7858_v55  ;;  %1874 = vmatprep.subr.bf16.mxu1 %v7140_v56  ;;  %v7147_v55 = vld [vmem:[%s11270_s1 + $0x1a0] ss:$48 sps:$4 sm:$0xff]  }
  0x7c   : > { %v7211_v56 = vld [vmem:[%s11272_s3 + $0x30] ss:$8 sps:$4 sm:$0xff]  }
  0x7d   : > { %1762 = vmatpush1.bf16.msra.mxu0 %v7135_v35  ;;  %1875 = vmatpush1.bf16.msra.mxu1 %v7138_v57  ;;  %v7202_v35 = vld [vmem:[%s11272_s3 + $0x170] ss:$8 sps:$4 sm:$0xff]  }
  0x7e   : > { %1763 = vmatprep.subr.bf16.mxu0 %v7143_v58  ;;  %1876 = vmatprep.subr.bf16.mxu1 %v7146_v59  ;;  %v7612_v57 = vld [vmem:[%s7793_s20 + $0x50] ss:$8 sps:$4 sm:$0xff]   ;;  %v7613_v58 = vld [vmem:[%s7793_s20 + $0x64] ss:$8 sps:$4 sm:$0xff]  }
  0x7f   : > { %v7219_v59 = vld [vmem:[%s11272_s3 + $0x24] ss:$8 sps:$4 sm:$0xff]  }
  0x80   : > { %1576 = vmatmul.mubr.bf16.gmra.mxu0 %v7882_v61  ;;  %1689 = vmatmul.mubr.bf16.gmra.mxu1 %v7882_v61  ;;  %v7153_v61 = vld [vmem:[%s11270_s1 + $0x140] ss:$48 sps:$4 sm:$0xff]  }
  0x81   : > { %1764 = vmatpush1.bf16.msra.mxu0 %v7141_v51  ;;  %6419 = vmatprep.mubr.msk.bf16.mxu0 %vm1245_vm0, %v7891_v0  ;;  %v7210_v51 = vld [vmem:[%s11272_s3 + $0x164] ss:$8 sps:$4 sm:$0xff]  }
  0x82   : > { %6428 = vmatprep.mubr.msk.bf16.mxu1 %vm1245_vm0, %v7891_v0  ;;  %1877 = vmatpush1.bf16.msra.mxu1 %v7144_v60  ;;  %v7164_v0 = vld [vmem:[%s11270_s1 + $0xec] ss:$48 sps:$4 sm:$0xff]   ;;  %v7217_v60 = vld [vmem:[%s11272_s3 + $0x20] ss:$8 sps:$4 sm:$0xff]  }
  0x83   : > { %1765 = vmatprep.subr.bf16.mxu0 %v7149_v62  ;;  %1878 = vmatprep.subr.bf16.mxu1 %v7152_v63  ;;  %v7208_v62 = vld [vmem:[%s11272_s3 + $0x160] ss:$8 sps:$4 sm:$0xff]   ;;  %v7225_v63 = vld [vmem:[%s11272_s3 + $0x14] ss:$8 sps:$4 sm:$0xff]  }
  0x85   : > { %1766 = vmatpush1.bf16.msra.mxu0 %v7147_v55  ;;  %v7216_v55 = vld [vmem:[%s11272_s3 + $0x154] ss:$8 sps:$4 sm:$0xff]  }
  0x86   : > { %1879 = vmatpush1.bf16.msra.mxu1 %v7150_v1  ;;  %1767 = vmatprep.subr.bf16.mxu0 %v7155_v2  ;;  %v7223_v1 = vld [vmem:[%s11272_s3 + $0x10] ss:$8 sps:$4 sm:$0xff]  }
  0x87   : > { %1880 = vmatprep.subr.bf16.mxu1 %v7158_v3  ;;  %v7214_v2 = vld [vmem:[%s11272_s3 + $0x150] ss:$8 sps:$4 sm:$0xff]   ;;  %v7614_v3 = vld [vmem:[%s7793_s20 + $0x60] ss:$8 sps:$4 sm:$0xff]  }
  0x88   : > { %1586 = vmatmul.mubr.bf16.gmra.mxu0 %v7915_v6  ;;  %1699 = vmatmul.mubr.bf16.gmra.mxu1 %v7915_v6  ;;  %v7170_v6 = vld [vmem:[%s11270_s1 + $0x8c] ss:$48 sps:$4 sm:$0xff]  }
  0x89   : > { %6420 = vmatprep.mubr.msk.bf16.mxu0 %vm1245_vm0, %v7921_v8  ;;  %6429 = vmatprep.mubr.msk.bf16.mxu1 %vm1245_vm0, %v7921_v8  ;;  %v7168_v8 = vld [vmem:[%s11270_s1 + $0x88] ss:$48 sps:$4 sm:$0xff]  }
  0x8a   : > { %1768 = vmatpush1.bf16.msra.mxu0 %v7153_v61  ;;  %1881 = vmatpush1.bf16.msra.mxu1 %v7156_v4  ;;  %v7615_v61 = vld [vmem:[%s7793_s20 + $0x74] ss:$8 sps:$4 sm:$0xff]   ;;  %v7231_v4 = vld [vmem:[%s11272_s3 + $0x4] ss:$8 sps:$4 sm:$0xff]  }
  0x8b   : > { %1769 = vmatprep.subr.bf16.mxu0 %v7161_v5  ;;  %1882 = vmatprep.subr.bf16.mxu1 %v7164_v0  ;;  %v7222_v5 = vld [vmem:[%s11272_s3 + $0x144] ss:$8 sps:$4 sm:$0xff]   ;;  %v7229_v0 = vld [vmem:[%s11272_s3] ss:$8 sps:$4 sm:$0xff]  }
  0x8e   : > { %1770 = vmatpush1.bf16.msra.mxu0 %v7159_v7  ;;  %1883 = vmatpush1.bf16.msra.mxu1 %v7162_v9  ;;  %v483_v7 = vlaneseq  ;;  %v7220_v9 = vld [vmem:[%s11272_s3 + $0x140] ss:$8 sps:$4 sm:$0xff]  }
  0x8f   : > { %1771 = vmatprep.subr.bf16.mxu0 %v7167_v10  ;;  %1884 = vmatprep.subr.bf16.mxu1 %v7170_v6  ;;  %v7237_v10 = vld [vmem:[%s11272_s3 + $0xf4] ss:$8 sps:$4 sm:$0xff]  }
  0x90   : > { %1596 = vmatmul.mubr.bf16.gmra.mxu0 %v7942_v13  ;;  %1709 = vmatmul.mubr.bf16.gmra.mxu1 %v7942_v13  ;;  %v6394_v13 = vcombine.low %v477_v15, %v477_v15  ;;  %v7228_v6 = vld [vmem:[%s11272_s3 + $0x134] ss:$8 sps:$4 sm:$0xff]   ;;  %v7243_v15 = vld [vmem:[%s11272_s3 + $0xe4] ss:$8 sps:$4 sm:$0xff]  }
  0x91   : > { %6421 = vmatprep.mubr.msk.bf16.mxu0 %vm1245_vm0, %v7957_v18  ;;  %6430 = vmatprep.mubr.msk.bf16.mxu1 %vm1245_vm0, %v7957_v18 }
  0x92   : > { %1772 = vmatpush1.bf16.msra.mxu0 %v7165_v11  ;;  %1885 = vmatpush1.bf16.msra.mxu1 %v7168_v8  ;;  %v1296_v18 = vsel %vm1270_vm1, %v6394_v13, 0  ;;  %v7235_v11 = vld [vmem:[%s11272_s3 + $0xf0] ss:$8 sps:$4 sm:$0xff]   ;;  %v8348_v8 = vshrl.u32 %v483_v7, 7  ;;  %v7232_v13 = vld [vmem:[%s11272_s3 + $0x120] ss:$8 sps:$4 sm:$0xff]  }
  0x93   : > { %1773 = vmatprep.subr.bf16.mxu0 %v7173_v12  ;;  %1886 = vmatprep.subr.bf16.mxu1 %v7176_v14  ;;  %v7226_v12 = vld [vmem:[%s11272_s3 + $0x130] ss:$8 sps:$4 sm:$0xff]  }
  0x94   : > { %v7616_v14 = vld [vmem:[%s7793_s20 + $0x70] ss:$8 sps:$4 sm:$0xff]  }
  0x96   : > { %1774 = vmatpush1.bf16.msra.mxu0 %v7171_v17  ;;  %1887 = vmatpush1.bf16.msra.mxu1 %v7174_v19  ;;  %v7241_v17 = vld [vmem:[%s11272_s3 + $0xe0] ss:$8 sps:$4 sm:$0xff]   ;;  %v8364_v19 = vsub.s32 0, %v8348_v8 }
  0x97   : > { %6434 = vmatprep.subr.msk.bf16.mxu0 %vm1270_vm1, %v6395_v20  ;;  %6443 = vmatprep.subr.msk.bf16.mxu1 %vm1270_vm1, %v6397_v21  ;;  %v11279_v20 = vsub.s32 3, %v8348_v8  ;;  %v8373_v21 = vld [vmem:[%s11271_s2] sm:$0xff]  ;;  %vm5635_vm1 = vcmask 1044484  }
  0x98   : > { %1606 = vmatmul.mubr.bf16.gmra.mxu0 %v7990_v31  ;;  %1719 = vmatmul.mubr.bf16.gmra.mxu1 %v7990_v31  ;;  %v7190_v31 = vld [vmem:[%s11270_s1 + $0x328] ss:$48 sps:$4 sm:$0xff]   ;;  %11359 = vst [vmem:[#allocation4_spill] sm:$0xff] %v8364_v19 }
  0x99   : > { %6422 = vmatprep.mubr.msk.bf16.mxu0 %vm1245_vm0, %v7993_v32  ;;  %6431 = vmatprep.mubr.msk.bf16.mxu1 %vm1245_vm0, %v7993_v32  ;;  %v7601_v32 = vld [vmem:[%s7793_s20 + $0x4] ss:$8 sps:$4 sm:$0xff]  }
  0x9a   : > { %1786 = vmatpush2.bf16.msra.mxu0 %v1296_v18  ;;  %1899 = vmatpush2.bf16.msra.mxu1 %v1302_v25  ;;  %v8388_v18 = vrot.slane %v8373_v21, %v11279_v20  ;;  %v7238_v25 = vld [vmem:[%s11272_s3 + $0x110] ss:$8 sps:$4 sm:$0xff]  }
  0x9b   : > { %1787 = vmatprep.subr.bf16.mxu0 %v7183_v23  ;;  %1900 = vmatprep.subr.bf16.mxu1 %v7186_v24  ;;  %v7249_v23 = vld [vmem:[%s11272_s3 + $0xd4] ss:$8 sps:$4 sm:$0xff]   ;;  %v8383_v24 = vrot.slane %v8373_v21, %v8364_v19 }
  0x9e   : > { %1788 = vmatpush2.bf16.msra.mxu0 %v7181_v26  ;;  %1901 = vmatpush2.bf16.msra.mxu1 %v7184_v27  ;;  %v7247_v26 = vld [vmem:[%s11272_s3 + $0xd0] ss:$8 sps:$4 sm:$0xff]  }
  0x9f   : > { %1789 = vmatprep.subr.bf16.mxu0 %v7189_v28  ;;  %1902 = vmatprep.subr.bf16.mxu1 %v7192_v29 }
  0xa0   : > { %1616 = vmatmul.mubr.bf16.gmra.mxu0 %v8024_v42  ;;  %1729 = vmatmul.mubr.bf16.gmra.mxu1 %v8024_v42  ;;  %v7608_v42 = vld [vmem:[%s7793_s20 + $0x30] ss:$8 sps:$4 sm:$0xff]  }
  0xa1   : > { %6423 = vmatprep.mubr.msk.bf16.mxu0 %vm1245_vm0, %v8027_v43  ;;  %6432 = vmatprep.mubr.msk.bf16.mxu1 %vm1245_vm0, %v8027_v43  ;;  %v7609_v43 = vld [vmem:[%s7793_s20 + $0x44] ss:$8 sps:$4 sm:$0xff]  }
  0xa2   : > { %1790 = vmatpush2.bf16.msra.mxu0 %v7187_v30  ;;  %1903 = vmatpush2.bf16.msra.mxu1 %v7190_v31  ;;  %v7255_v31 = vld [vmem:[%s11272_s3 + $0xc4] ss:$8 sps:$4 sm:$0xff]  }
  0xa3   : > { %4889 = vmatprep.subr.bf16.mxu0 %v7195_v40  ;;  %4962 = vmatprep.subr.bf16.mxu1 %v7204_v54  ;;  %v8619_v40 = vsub.s32 1, %v8348_v8 }
  0xa5   : > { %11374 = vst [vmem:[#allocation19_spill] sm:$0xff] %v8619_v40 }
  0xa8   : > { %1626 = vmatmul.mubr.bf16.gmra.mxu0 %v8048_v48  ;;  %1739 = vmatmul.mubr.bf16.gmra.mxu1 %v8048_v48  ;;  %v7610_v48 = vld [vmem:[%s7793_s20 + $0x40] ss:$8 sps:$4 sm:$0xff]  }
  0xa9   : > { %6424 = vmatprep.mubr.msk.bf16.mxu0 %vm1245_vm0, %v8051_v49  ;;  %6433 = vmatprep.mubr.msk.bf16.mxu1 %vm1245_vm0, %v8051_v49  ;;  %v7611_v49 = vld [vmem:[%s7793_s20 + $0x54] ss:$8 sps:$4 sm:$0xff]  }
  0xb0   : > { %1636 = vmatmul.mubr.bf16.gmra.mxu0 %v8060_v50  ;;  %1749 = vmatmul.mubr.bf16.gmra.mxu1 %v8060_v50  ;;  %v7207_v50 = vld [vmem:[%s11272_s3 + $0x44] ss:$8 sps:$4 sm:$0xff]  }
  0xb1   : > { %6435 = vmatprep.mubr.msk.bf16.mxu0 %vm1245_vm0, %v7601_v32  ;;  %6444 = vmatprep.mubr.msk.bf16.mxu1 %vm1245_vm0, %v7601_v32 }
  0xb8   : > { %1792 = vmatmul.mubr.bf16.vlgmr.msra.gmra.mxu0 %v7602_v33  ;;  %1905 = vmatmul.mubr.bf16.vlgmr.msra.gmra.mxu1 %v7602_v33 }
  0xb9   : > { %6436 = vmatprep.mubr.msk.bf16.mxu0 %vm1245_vm0, %v7603_v34  ;;  %6445 = vmatprep.mubr.msk.bf16.mxu1 %vm1245_vm0, %v7603_v34  ;;  %v7246_v34 = vld [vmem:[%s11272_s3 + $0x104] ss:$8 sps:$4 sm:$0xff]  }
  0xba   : > { %4890 = vmatpush1.bf16.msra.mxu0 %v7193_v41  ;;  %4963 = vmatpush1.bf16.msra.mxu1 %v7202_v35  ;;  %v7265_v35 = vld [vmem:[%s11272_s3 + $0xa0] ss:$8 sps:$4 sm:$0xff]  }
  0xbb   : > { %4891 = vmatprep.subr.bf16.mxu0 %v7198_v44  ;;  %4964 = vmatprep.subr.bf16.mxu1 %v7210_v51  ;;  %v7252_v44 = vld [vmem:[%s11272_s3 + $0x1f4] ss:$8 sps:$4 sm:$0xff]  }
  0xbe   : > { %4892 = vmatpush1.bf16.msra.mxu0 %v7196_v45  ;;  %4965 = vmatpush1.bf16.msra.mxu1 %v7208_v62  ;;  %v7259_v45 = vld [vmem:[%s11272_s3 + $0xb0] ss:$8 sps:$4 sm:$0xff]  }
  0xbf   : > { %4893 = vmatprep.subr.bf16.mxu0 %v7201_v46  ;;  %4966 = vmatprep.subr.bf16.mxu1 %v7216_v55  ;;  %v7264_v55 = vld [vmem:[%s11272_s3 + $0x1d4] ss:$8 sps:$4 sm:$0xff]  }
  0xc0   : > { %1802 = vmatmul.mubr.bf16.gmra.mxu0 %v7604_v36  ;;  %1915 = vmatmul.mubr.bf16.gmra.mxu1 %v7604_v36  ;;  %v7253_v36 = vld [vmem:[%s11272_s3 + $0xc0] ss:$8 sps:$4 sm:$0xff]  }
  0xc1   : > { %6437 = vmatprep.mubr.msk.bf16.mxu0 %vm1245_vm0, %v7605_v37  ;;  %6446 = vmatprep.mubr.msk.bf16.mxu1 %vm1245_vm0, %v7605_v37 }
  0xc2   : > { %4894 = vmatpush1.bf16.msra.mxu0 %v7199_v47  ;;  %4967 = vmatpush1.bf16.msra.mxu1 %v7214_v2 }
  0xc3   : > { %4895 = vmatprep.subr.bf16.mxu0 %v7207_v50  ;;  %4968 = vmatprep.subr.bf16.mxu1 %v7222_v5 }
  0xc6   : > { %4896 = vmatpush1.bf16.msra.mxu0 %v7205_v52  ;;  %4969 = vmatpush1.bf16.msra.mxu1 %v7220_v9  ;;  %v7267_v52 = vld [vmem:[%s11272_s3 + $0xa4] ss:$8 sps:$4 sm:$0xff]  }
  0xc7   : > { %4897 = vmatprep.subr.bf16.mxu0 %v7213_v53  ;;  %4970 = vmatprep.subr.bf16.mxu1 %v7228_v6  ;;  %v7277_v6 = vld [vmem:[%s11272_s3 + $0x80] ss:$8 sps:$4 sm:$0xff]  }
  0xc8   : > { %1812 = vmatmul.mubr.bf16.gmra.mxu0 %v7606_v38  ;;  %1925 = vmatmul.mubr.bf16.gmra.mxu1 %v7606_v38 }
  0xc9   : > { %6438 = vmatprep.mubr.msk.bf16.mxu0 %vm1245_vm0, %v7607_v39  ;;  %6447 = vmatprep.mubr.msk.bf16.mxu1 %vm1245_vm0, %v7607_v39  ;;  %v7244_v39 = vld [vmem:[%s11272_s3 + $0x100] ss:$8 sps:$4 sm:$0xff]  }
  0xca   : > { %4898 = vmatpush1.bf16.msra.mxu0 %v7211_v56  ;;  %4971 = vmatpush1.bf16.msra.mxu1 %v7226_v12  ;;  %v7258_v56 = vld [vmem:[%s11272_s3 + $0x1e4] ss:$8 sps:$4 sm:$0xff]  }
  0xcb   : > { %4899 = vmatprep.subr.bf16.mxu0 %v7219_v59  ;;  %4972 = vmatprep.subr.bf16.mxu1 %v7234_v16  ;;  %v7256_v59 = vld [vmem:[%s11272_s3 + $0x1e0] ss:$8 sps:$4 sm:$0xff]  }
  0xce   : > { %4900 = vmatpush1.bf16.msra.mxu0 %v7217_v60  ;;  %4973 = vmatpush1.bf16.msra.mxu1 %v7232_v13  ;;  %v7276_v13 = vld [vmem:[%s11272_s3 + $0x1b4] ss:$8 sps:$4 sm:$0xff]  }
  0xcf   : > { %4901 = vmatprep.subr.bf16.mxu0 %v7225_v63  ;;  %4974 = vmatprep.subr.bf16.mxu1 %v7240_v22  ;;  %v7273_v63 = vld [vmem:[%s11272_s3 + $0x94] ss:$8 sps:$4 sm:$0xff]  }
  0xd0   : > { %1822 = vmatmul.mubr.bf16.gmra.mxu0 %v7608_v42  ;;  %1935 = vmatmul.mubr.bf16.gmra.mxu1 %v7608_v42 }
  0xd1   : > { %6439 = vmatprep.mubr.msk.bf16.mxu0 %vm1245_vm0, %v7609_v43  ;;  %6448 = vmatprep.mubr.msk.bf16.mxu1 %vm1245_vm0, %v7609_v43  ;;  %v7261_v43 = vld [vmem:[%s11272_s3 + $0xb4] ss:$8 sps:$4 sm:$0xff]  }
  0xd2   : > { %4902 = vmatpush1.bf16.msra.mxu0 %v7223_v1  ;;  %4975 = vmatpush1.bf16.msra.mxu1 %v7238_v25  ;;  %v7271_v1 = vld [vmem:[%s11272_s3 + $0x90] ss:$8 sps:$4 sm:$0xff]  }
  0xd3   : > { %4903 = vmatprep.subr.bf16.mxu0 %v7231_v4  ;;  %4976 = vmatprep.subr.bf16.mxu1 %v7246_v34  ;;  %v7274_v25 = vld [vmem:[%s11272_s3 + $0x1b0] ss:$8 sps:$4 sm:$0xff]  }
  0xd6   : > { %4904 = vmatpush1.bf16.msra.mxu0 %v7229_v0  ;;  %4977 = vmatpush1.bf16.msra.mxu1 %v7244_v39  ;;  %v7279_v0 = vld [vmem:[%s11272_s3 + $0x84] ss:$8 sps:$4 sm:$0xff]  }
  0xd7   : > { %4905 = vmatprep.subr.bf16.mxu0 %v7237_v10  ;;  %4978 = vmatprep.subr.bf16.mxu1 %v7252_v44  ;;  %v7270_v10 = vld [vmem:[%s11272_s3 + $0x1c4] ss:$8 sps:$4 sm:$0xff]   ;;  %v7280_v44 = vld [vmem:[%s11272_s3 + $0x1a0] ss:$8 sps:$4 sm:$0xff]  }
  0xd8   : > { %1832 = vmatmul.mubr.bf16.gmra.mxu0 %v7610_v48  ;;  %1945 = vmatmul.mubr.bf16.gmra.mxu1 %v7610_v48  ;;  %v7250_v48 = vld [vmem:[%s11272_s3 + $0x1f0] ss:$8 sps:$4 sm:$0xff]  }
  0xd9   : > { %6440 = vmatprep.mubr.msk.bf16.mxu0 %vm1245_vm0, %v7611_v49  ;;  %6449 = vmatprep.mubr.msk.bf16.mxu1 %vm1245_vm0, %v7611_v49 }
  0xda   : > { %4906 = vmatpush2.bf16.msra.mxu0 %v7235_v11  ;;  %4979 = vmatpush2.bf16.msra.mxu1 %v7250_v48 }
  0xdb   : > { %4907 = vmatprep.subr.bf16.mxu0 %v7243_v15  ;;  %4980 = vmatprep.subr.bf16.mxu1 %v7258_v56 }
  0xde   : > { %4908 = vmatpush2.bf16.msra.mxu0 %v7241_v17  ;;  %4981 = vmatpush2.bf16.msra.mxu1 %v7256_v59 }
  0xdf   : > { %4909 = vmatprep.subr.bf16.mxu0 %v7249_v23  ;;  %4982 = vmatprep.subr.bf16.mxu1 %v7264_v55  ;;  %v7288_v55 = vld [vmem:[%s11272_s3 + $0x194] ss:$8 sps:$4 sm:$0xff]  }
  0xe0   : > { %1842 = vmatmul.mubr.bf16.gmra.mxu0 %v7612_v57  ;;  %1955 = vmatmul.mubr.bf16.gmra.mxu1 %v7612_v57 }
  0xe1   : > { %6441 = vmatprep.mubr.msk.bf16.mxu0 %vm1245_vm0, %v7613_v58  ;;  %6450 = vmatprep.mubr.msk.bf16.mxu1 %vm1245_vm0, %v7613_v58 }
  0xe2   : > { %4910 = vmatpush2.bf16.msra.mxu0 %v7247_v26 }
  0xe3   : > { %4911 = vmatprep.subr.bf16.mxu0 %v7255_v31 }
  0xe6   : > { %4912 = vmatpush2.bf16.msra.mxu0 %v7253_v36  ;;  %v7282_v36 = vld [vmem:[%s11272_s3 + $0x1a4] ss:$8 sps:$4 sm:$0xff]  }
  0xe7   : > { %4913 = vmatprep.subr.bf16.mxu0 %v7261_v43 }
  0xe8   : > { %1852 = vmatmul.mubr.bf16.gmra.mxu0 %v7614_v3  ;;  %1965 = vmatmul.mubr.bf16.gmra.mxu1 %v7614_v3 }
  0xe9   : > { %6442 = vmatprep.mubr.msk.bf16.mxu0 %vm1245_vm0, %v7615_v61  ;;  %6451 = vmatprep.mubr.msk.bf16.mxu1 %vm1245_vm0, %v7615_v61  ;;  %v7262_v61 = vld [vmem:[%s11272_s3 + $0x1d0] ss:$8 sps:$4 sm:$0xff]   ;;  %vm5632_vm0 = vcmask 1043459  }
  0xea   : > { %4914 = vmatpush2.bf16.msra.mxu0 %v7259_v45  ;;  %4983 = vmatpush2.bf16.msra.mxu1 %v7262_v61  ;;  %v7286_v61 = vld [vmem:[%s11272_s3 + $0x190] ss:$8 sps:$4 sm:$0xff]  }
  0xeb   : > { %4915 = vmatprep.subr.bf16.mxu0 %v7267_v52  ;;  %4984 = vmatprep.subr.bf16.mxu1 %v7270_v10 }
  0xee   : > { %4916 = vmatpush2.bf16.msra.mxu0 %v7265_v35 }
  0xef   : > { %4917 = vmatprep.subr.bf16.mxu0 %v7273_v63 }
  0xf0   : > { %1862 = vmatmul.mubr.bf16.gmra.mxu0 %v7616_v14  ;;  %1975 = vmatmul.mubr.bf16.gmra.mxu1 %v7616_v14  ;;  %v7268_v14 = vld [vmem:[%s11272_s3 + $0x1c0] ss:$8 sps:$4 sm:$0xff]  }
  0xf1   : > { %4985 = vmatpush2.bf16.msra.mxu1 %v7268_v14 }
  0xf2   : > { %4918 = vmatpush2.bf16.msra.mxu0 %v7271_v1  ;;  %4986 = vmatprep.subr.bf16.mxu1 %v7276_v13  ;;  %v7294_v13 = vld [vmem:[%s11272_s3 + $0x184] ss:$8 sps:$4 sm:$0xff]  }
  0xf3   : > { %4919 = vmatprep.subr.bf16.mxu0 %v7279_v0 }
  0xf5   : > { %4987 = vmatpush2.bf16.msra.mxu1 %v7274_v25 }
  0xf6   : > { %4920 = vmatpush2.bf16.msra.mxu0 %v7277_v6  ;;  %4988 = vmatprep.subr.bf16.mxu1 %v7282_v36 }
  0xf8   : > { %v1341_v27 = vpop.f32.mrf.mxu0  ;;  %v8396_v28 = vpop.f32.mrf.mxu1 }
  0xf9   : > { %v8404_v32 = vadd.f32 %v1341_v27, %v8383_v24  ;;  %4989 = vmatpush2.bf16.msra.mxu1 %v7280_v44 }
  0xfa   : > { %v8398_v29 = vpop.f32.mrf.mxu0  ;;  %v1456_v30 = vpop.f32.mrf.mxu1  ;;  %4990 = vmatprep.subr.bf16.mxu1 %v7288_v55 }
  0xfb   : > { %11360 = vst [vmem:[#allocation5_spill] sm:$0xff] %v8404_v32  ;;  %v8407_v33 = vadd.f32 %v1456_v30, %v8388_v18  ;;  %v7285_v30 = vld [vmem:[%s11272_s3 + $0x274] ss:$8 sps:$4 sm:$0xff]  }
  0xfc   : > { %v8415_v37 = vpop.f32.mrf.mxu0  ;;  %v8417_v38 = vpop.f32.mrf.mxu1  ;;  %5035 = vmatprep.subr.bf16.mxu0 %v7285_v30 }
  0xfd   : > { %11361 = vst [vmem:[#allocation6_spill] sm:$0xff] %v8407_v33  ;;  %4991 = vmatpush2.bf16.msra.mxu1 %v7286_v61 }
  0xfe   : > { %v8424_v41 = vpop.f32.mrf.mxu0  ;;  %v8426_v42 = vpop.f32.mrf.mxu1  ;;  %4992 = vmatprep.subr.bf16.mxu1 %v7294_v13 }
 0x100   : > { %v1351_v46 = vpop.f32.mrf.mxu0  ;;  %v8437_v47 = vpop.f32.mrf.mxu1 }
 0x101   : > { %v8448_v53 = vadd.f32 %v1351_v46, %v8383_v24 }
 0x102   : > { %v8442_v49 = vpop.f32.mrf.mxu0  ;;  %v1466_v50 = vpop.f32.mrf.mxu1 }
 0x103   : > { %11362 = vst [vmem:[#allocation7_spill] sm:$0xff] %v8448_v53  ;;  %v8451_v54 = vadd.f32 %v1466_v50, %v8388_v18 }
 0x104   : > { %v8459_v57 = vpop.f32.mrf.mxu0  ;;  %v8461_v58 = vpop.f32.mrf.mxu1 }
 0x105   : > { %11363 = vst [vmem:[#allocation8_spill] sm:$0xff] %v8451_v54  ;;  %v505_v54 = vsub.s32 5, %v8348_v8 }
 0x106   : > { %v8468_v60 = vpop.f32.mrf.mxu0  ;;  %v8470_v62 = vpop.f32.mrf.mxu1 }
 0x108   : > { %v1361_v2 = vpop.f32.mrf.mxu0  ;;  %v8481_v3 = vpop.f32.mrf.mxu1 }
 0x109   : > { %v8492_v7 = vadd.f32 %v1361_v2, %v8383_v24 }
 0x10a   : > { %v8486_v4 = vpop.f32.mrf.mxu0  ;;  %v1476_v5 = vpop.f32.mrf.mxu1 }
 0x10b   : > { %11364 = vst [vmem:[#allocation9_spill] sm:$0xff] %v8492_v7  ;;  %v8495_v9 = vadd.f32 %v1476_v5, %v8388_v18 }
 0x10c   : > { %v8503_v11 = vpop.f32.mrf.mxu0  ;;  %v8505_v12 = vpop.f32.mrf.mxu1 }
 0x10d   : > { %11365 = vst [vmem:[#allocation10_spill] sm:$0xff] %v8495_v9 }
 0x10e   : > { %v8512_v16 = vpop.f32.mrf.mxu0  ;;  %v8514_v17 = vpop.f32.mrf.mxu1 }
 0x110   : > { %v1371_v22 = vpop.f32.mrf.mxu0  ;;  %v8519_v23 = vpop.f32.mrf.mxu1 }
 0x111   : > { %v8530_v31 = vadd.f32 %v1371_v22, %v8383_v24  ;;  %v7292_v22 = vld [vmem:[%s11272_s3 + $0x180] ss:$8 sps:$4 sm:$0xff]  }
 0x112   : > { %v8524_v26 = vpop.f32.mrf.mxu0  ;;  %v1486_v27 = vpop.f32.mrf.mxu1  ;;  %4993 = vmatpush2.bf16.msra.mxu1 %v7292_v22 }
 0x113   : > { %11366 = vst [vmem:[#allocation11_spill] sm:$0xff] %v8530_v31  ;;  %v8533_v34 = vadd.f32 %v1486_v27, %v8388_v18 }
 0x114   : > { %v8538_v39 = vpop.f32.mrf.mxu0  ;;  %v8540_v43 = vpop.f32.mrf.mxu1 }
 0x115   : > { %11367 = vst [vmem:[#allocation12_spill] sm:$0xff] %v8533_v34  ;;  %v8637_v34 = vrot.slane %v8373_v21, %v8619_v40 }
 0x116   : > { %v8547_v46 = vpop.f32.mrf.mxu0  ;;  %v8549_v48 = vpop.f32.mrf.mxu1 }
 0x118   : > { %v1381_v50 = vpop.f32.mrf.mxu0  ;;  %v8551_v52 = vpop.f32.mrf.mxu1 }
 0x119   : > { %v8556_v59 = vadd.f32 %v1381_v50, %v8383_v24 }
 0x11a   : > { %v8553_v56 = vpop.f32.mrf.mxu0  ;;  %v1496_v35 = vpop.f32.mrf.mxu1 }
 0x11b   : > { %11368 = vst [vmem:[#allocation13_spill] sm:$0xff] %v8556_v59  ;;  %v8559_v63 = vadd.f32 %v1496_v35, %v8388_v18  ;;  %v7300_v59 = vld [vmem:[%s11272_s3 + $0x374] ss:$8 sps:$4 sm:$0xff]  }
 0x11c   : > { %v8564_v1 = vpop.f32.mrf.mxu0  ;;  %v8566_v2 = vpop.f32.mrf.mxu1  ;;  %5108 = vmatprep.subr.bf16.mxu1 %v7300_v59 }
 0x11d   : > { %11369 = vst [vmem:[#allocation14_spill] sm:$0xff] %v8559_v63 }
 0x11e   : > { %v8573_v0 = vpop.f32.mrf.mxu0  ;;  %v8575_v10 = vpop.f32.mrf.mxu1 }
 0x120   : > { %v1391_v6 = vpop.f32.mrf.mxu0  ;;  %v8577_v14 = vpop.f32.mrf.mxu1 }
 0x121   : > { %v8588_v30 = vadd.f32 %v1391_v6, %v8383_v24 }
 0x122   : > { %v8585_v25 = vpop.f32.mrf.mxu0  ;;  %v1506_v27 = vpop.f32.mrf.mxu1 }
 0x123   : > { %11370 = vst [vmem:[#allocation15_spill] sm:$0xff] %v8588_v30  ;;  %v8591_v36 = vadd.f32 %v1506_v27, %v8388_v18  ;;  %v11287_v27 = vsub.s32 2, %v8348_v8 }
 0x124   : > { %v8593_v44 = vpop.f32.mrf.mxu0  ;;  %v8595_v50 = vpop.f32.mrf.mxu1 }
 0x125   : > { %11371 = vst [vmem:[#allocation16_spill] sm:$0xff] %v8591_v36 }
 0x126   : > { %v8599_v55 = vpop.f32.mrf.mxu0  ;;  %v8601_v61 = vpop.f32.mrf.mxu1 }
 0x128   : > { %v1401_v5 = vpop.f32.mrf.mxu0  ;;  %v8603_v13 = vpop.f32.mrf.mxu1 }
 0x129   : > { %v8609_v22 = vadd.f32 %v1401_v5, %v8383_v24  ;;  %v8630_v5 = vrot.slane %v8373_v21, %v11287_v27 }
 0x12a   : > { %v8605_v6 = vpop.f32.mrf.mxu0  ;;  %v1516_v45 = vpop.f32.mrf.mxu1 }
 0x12b   : > { %11372 = vst [vmem:[#allocation17_spill] sm:$0xff] %v8609_v22  ;;  %v8612_v15 = vadd.f32 %v1516_v45, %v8388_v18  ;;  %v501_v22 = vsub.s32 4, %v8348_v8 }
 0x12c   : > { %v8614_v51 = vpop.f32.mrf.mxu0  ;;  %v8616_v35 = vpop.f32.mrf.mxu1 }
 0x12d   : > { %11373 = vst [vmem:[#allocation18_spill] sm:$0xff] %v8612_v15  ;;  %v8662_v59 = vrot.slane %v8373_v21, %v501_v22 }
 0x12e   : > { %v8623_v36 = vpop.f32.mrf.mxu0  ;;  %v8625_v30 = vpop.f32.mrf.mxu1 }
 0x12f   : > { %11375 = vst [vmem:[#allocation20_spill] sm:$0xff] %v8623_v36 }
 0x130   : > { %v1411_v45 = vpop.f32.mrf.mxu0  ;;  %v1524_v63 = vpop.f32.mrf.mxu1 }
 0x131   : > { %v8640_v20 = vadd.f32 %v1411_v45, %v8383_v24  ;;  %v8643_v15 = vadd.f32 %v1524_v63, %v8630_v5 }
 0x132   : > { %v1413_v27 = vpop.f32.mrf.mxu0  ;;  %v1526_v31 = vpop.f32.mrf.mxu1 }
 0x133   : > { %11376 = vst [vmem:[#allocation21_spill] sm:$0xff] %v8640_v20  ;;  %11377 = vst [vmem:[#allocation22_spill] sm:$0xff] %v8643_v15  ;;  %v8647_v9 = vadd.f32 %v1413_v27, %v8637_v34  ;;  %v8650_v7 = vadd.f32 %v1526_v31, %v8388_v18 }
 0x134   : > { %v1415_v53 = vpop.f32.mrf.mxu0  ;;  %v1528_v33 = vpop.f32.mrf.mxu1 }
 0x135   : > { %11378 = vst [vmem:[#allocation23_spill] sm:$0xff] %v8647_v9  ;;  %11379 = vst [vmem:[#allocation24_spill] sm:$0xff] %v8650_v7  ;;  %v8656_v63 = vadd.f32 %v1415_v53, %v8383_v24  ;;  %v8659_v32 = vadd.f32 %v1528_v33, %v8630_v5  ;;  %v8670_v9 = vrot.slane %v8373_v21, %v505_v54 }
 0x136   : > { %v8664_v27 = vpop.f32.mrf.mxu0  ;;  %v1530_v31 = vpop.f32.mrf.mxu1  ;;  %v8676_v53 = vadd.f32 %v8398_v29, %v8637_v34  ;;  %v8687_v54 = vadd.f32 %v8396_v28, %v8630_v5 }
 0x137   : > { %11380 = vst [vmem:[#allocation25_spill] sm:$0xff] %v8656_v63  ;;  %11381 = vst [vmem:[#allocation26_spill] sm:$0xff] %v8659_v32  ;;  %v8667_v15 = vadd.f32 %v1530_v31, %v8388_v18  ;;  %v8708_v31 = vadd.f32 %v8442_v49, %v8637_v34 }
 0x138   : > { %v1567_v36 = vpop.f32.mrf.mxu0  ;;  %v8672_v45 = vpop.f32.mrf.mxu1  ;;  %11384 = vst [vmem:[#allocation29_spill] sm:$0xff] %v8676_v53  ;;  %11386 = vst [vmem:[#allocation31_spill] sm:$0xff] %v8687_v54 }
 0x139   : > { %11382 = vst [vmem:[#allocation27_spill] sm:$0xff] %v8667_v15  ;;  %11383 = vst [vmem:[#allocation28_spill] sm:$0xff] %v8672_v45  ;;  %v8681_v22 = vadd.f32 %v1567_v36, %v8662_v59  ;;  %v8717_v36 = vadd.f32 %v8437_v47, %v8630_v5 }
 0x13a   : > { %v1569_v7 = vpop.f32.mrf.mxu0  ;;  %v8683_v20 = vpop.f32.mrf.mxu1  ;;  %11391 = vst [vmem:[#allocation36_spill] sm:$0xff] %v8708_v31 }
 0x13b   : > { %11385 = vst [vmem:[#allocation30_spill] sm:$0xff] %v8681_v22  ;;  %v8692_v32 = vadd.f32 %v1569_v7, %v8670_v9  ;;  %11394 = vst [vmem:[#allocation39_spill] sm:$0xff] %v8717_v36 }
 0x13c   : > { %v8694_v29 = vpop.f32.mrf.mxu0  ;;  %v8696_v45 = vpop.f32.mrf.mxu1 }
 0x13d   : > { %11387 = vst [vmem:[#allocation32_spill] sm:$0xff] %v8692_v32  ;;  %11388 = vst [vmem:[#allocation33_spill] sm:$0xff] %v8696_v45  ;;  %v8738_v32 = vadd.f32 %v8486_v4, %v8637_v34 }
 0x13e   : > { %v8700_v33 = vpop.f32.mrf.mxu0  ;;  %v8702_v15 = vpop.f32.mrf.mxu1 }
 0x13f   : > { %11389 = vst [vmem:[#allocation34_spill] sm:$0xff] %v8702_v15  ;;  %11399 = vst [vmem:[#allocation44_spill] sm:$0xff] %v8738_v32 }
 0x140   : > { %v1577_v63 = vpop.f32.mrf.mxu0  ;;  %v8704_v28 = vpop.f32.mrf.mxu1 }
 0x141   : > { %11390 = vst [vmem:[#allocation35_spill] sm:$0xff] %v8704_v28  ;;  %v8711_v7 = vadd.f32 %v1577_v63, %v8662_v59  ;;  %v8747_v63 = vadd.f32 %v8481_v3, %v8630_v5 }
 0x142   : > { %v1579_v22 = vpop.f32.mrf.mxu0  ;;  %v8713_v53 = vpop.f32.mrf.mxu1 }
 0x143   : > { %11392 = vst [vmem:[#allocation37_spill] sm:$0xff] %v8711_v7  ;;  %11393 = vst [vmem:[#allocation38_spill] sm:$0xff] %v8713_v53  ;;  %v8722_v54 = vadd.f32 %v1579_v22, %v8670_v9 }
 0x144   : > { %v8724_v28 = vpop.f32.mrf.mxu0  ;;  %v8726_v49 = vpop.f32.mrf.mxu1  ;;  %11402 = vst [vmem:[#allocation47_spill] sm:$0xff] %v8747_v63 }
 0x145   : > { %11395 = vst [vmem:[#allocation40_spill] sm:$0xff] %v8722_v54  ;;  %11396 = vst [vmem:[#allocation41_spill] sm:$0xff] %v8726_v49  ;;  %v8768_v54 = vadd.f32 %v8524_v26, %v8637_v34 }
 0x146   : > { %v8730_v15 = vpop.f32.mrf.mxu0  ;;  %v8732_v53 = vpop.f32.mrf.mxu1 }
 0x147   : > { %11397 = vst [vmem:[#allocation42_spill] sm:$0xff] %v8732_v53  ;;  %11407 = vst [vmem:[#allocation52_spill] sm:$0xff] %v8768_v54 }
 0x148   : > { %v1587_v45 = vpop.f32.mrf.mxu0  ;;  %v8734_v47 = vpop.f32.mrf.mxu1 }
 0x149   : > { %11398 = vst [vmem:[#allocation43_spill] sm:$0xff] %v8734_v47  ;;  %v8741_v22 = vadd.f32 %v1587_v45, %v8662_v59  ;;  %v8777_v45 = vadd.f32 %v8519_v23, %v8630_v5 }
 0x14a   : > { %v1589_v7 = vpop.f32.mrf.mxu0  ;;  %v8743_v31 = vpop.f32.mrf.mxu1 }
 0x14b   : > { %11400 = vst [vmem:[#allocation45_spill] sm:$0xff] %v8741_v22  ;;  %11401 = vst [vmem:[#allocation46_spill] sm:$0xff] %v8743_v31  ;;  %v8752_v36 = vadd.f32 %v1589_v7, %v8670_v9 }
 0x14c   : > { %v8754_v47 = vpop.f32.mrf.mxu0  ;;  %v8756_v4 = vpop.f32.mrf.mxu1  ;;  %11410 = vst [vmem:[#allocation55_spill] sm:$0xff] %v8777_v45 }
 0x14d   : > { %11403 = vst [vmem:[#allocation48_spill] sm:$0xff] %v8752_v36  ;;  %11404 = vst [vmem:[#allocation49_spill] sm:$0xff] %v8756_v4  ;;  %v8798_v36 = vadd.f32 %v8553_v56, %v8637_v34 }
 0x14e   : > { %v8760_v53 = vpop.f32.mrf.mxu0  ;;  %v8762_v31 = vpop.f32.mrf.mxu1 }
 0x14f   : > { %11405 = vst [vmem:[#allocation50_spill] sm:$0xff] %v8762_v31  ;;  %11416 = vst [vmem:[#allocation61_spill] sm:$0xff] %v8798_v36 }
 0x150   : > { %v1597_v49 = vpop.f32.mrf.mxu0  ;;  %v8764_v3 = vpop.f32.mrf.mxu1 }
 0x151   : > { %11406 = vst [vmem:[#allocation51_spill] sm:$0xff] %v8764_v3  ;;  %v8771_v7 = vadd.f32 %v1597_v49, %v8662_v59  ;;  %v8808_v49 = vadd.f32 %v8551_v52, %v8630_v5 }
 0x152   : > { %v1599_v22 = vpop.f32.mrf.mxu0  ;;  %v8773_v32 = vpop.f32.mrf.mxu1 }
 0x153   : > { %11408 = vst [vmem:[#allocation53_spill] sm:$0xff] %v8771_v7  ;;  %11409 = vst [vmem:[#allocation54_spill] sm:$0xff] %v8773_v32  ;;  %v8782_v63 = vadd.f32 %v1599_v22, %v8670_v9  ;;  %v509_v7 = vsub.s32 6, %v8348_v8 }
 0x154   : > { %v8784_v3 = vpop.f32.mrf.mxu0  ;;  %v8786_v26 = vpop.f32.mrf.mxu1  ;;  %11419 = vst [vmem:[#allocation64_spill] sm:$0xff] %v8808_v49 }
 0x155   : > { %11411 = vst [vmem:[#allocation56_spill] sm:$0xff] %v8782_v63  ;;  %11412 = vst [vmem:[#allocation57_spill] sm:$0xff] %v8786_v26  ;;  %v513_v63 = vsub.s32 7, %v8348_v8 }
 0x156   : > { %v8790_v31 = vpop.f32.mrf.mxu0  ;;  %v8792_v32 = vpop.f32.mrf.mxu1 }
 0x157   : > { %11413 = vst [vmem:[#allocation58_spill] sm:$0xff] %v8790_v31  ;;  %11414 = vst [vmem:[#allocation59_spill] sm:$0xff] %v8792_v32  ;;  %v8827_v32 = vadd.f32 %v8426_v42, %v8388_v18  ;;  %v8848_v42 = vadd.f32 %v8415_v37, %v8383_v24  ;;  %v8869_v37 = vadd.f32 %v8424_v41, %v8637_v34 }
 0x158   : > { %v1607_v4 = vpop.f32.mrf.mxu0  ;;  %v8794_v23 = vpop.f32.mrf.mxu1  ;;  %v8890_v41 = vadd.f32 %v8514_v17, %v8388_v18  ;;  %v8909_v17 = vadd.f32 %v8468_v60, %v8637_v34  ;;  %v8931_v60 = vadd.f32 %v8538_v39, %v8383_v24  ;;  %v8951_v39 = vadd.f32 %v8601_v61, %v8388_v18 }
 0x159   : > { %11415 = vst [vmem:[#allocation60_spill] sm:$0xff] %v8794_v23  ;;  %v8801_v22 = vadd.f32 %v1607_v4, %v8662_v59  ;;  %11422 = vst [vmem:[#allocation67_spill] sm:$0xff] %v8827_v32  ;;  %v8970_v61 = vadd.f32 %v8566_v2, %v8630_v5  ;;  %v8990_v2 = vadd.f32 %v8605_v6, %v8637_v34 }
 0x15a   : > { %v1609_v54 = vpop.f32.mrf.mxu0  ;;  %v8804_v26 = vpop.f32.mrf.mxu1  ;;  %11428 = vst [vmem:[#allocation71_spill] sm:$0xff] %v8890_v41  ;;  %11434 = vst [vmem:[#allocation77_spill] sm:$0xff] %v8931_v60  ;;  %v9009_v6 = vadd.f32 %v8694_v29, %v8662_v59  ;;  %v11448_v29 = vld [vmem:[#allocation20_spill] sm:$0xff]  ;;  %v11463_v41 = vld [vmem:[#allocation46_spill] sm:$0xff] }
 0x15b   : > { %11417 = vst [vmem:[#allocation62_spill] sm:$0xff] %v8801_v22  ;;  %11418 = vst [vmem:[#allocation63_spill] sm:$0xff] %v8804_v26  ;;  %v8814_v56 = vadd.f32 %v1609_v54, %v8670_v9  ;;  %v480_v26 = vld [vmem:[%s11271_s2 + $0x8] sm:$0xf]  ;;  %v8834_v54 = vrot.slane %v8373_v21, %v509_v7  ;;  %v8837_v22 = vrot.slane %v8373_v21, %v513_v63  ;;  %v11425_v63 = vsub.s32 3, %v8348_v8 }
 0x15c   : > { %v8816_v23 = vpop.f32.mrf.mxu0  ;;  %v8818_v4 = vpop.f32.mrf.mxu1  ;;  %v8840_v36 = vrot.slane %v480_v26, %v8364_v19  ;;  %v8857_v21 = vrot.slane %v480_v26, %v8619_v40  ;;  %11436 = vst [vmem:[#allocation79_spill] sm:$0xff] %v8951_v39  ;;  %v8959_v40 = vadd.f32 %v8564_v1, %v8383_v24  ;;  %v8982_v1 = vadd.f32 %v8625_v30, %v8388_v18 }
 0x15d   : > { %11420 = vst [vmem:[#allocation65_spill] sm:$0xff] %v8814_v56  ;;  %11421 = vst [vmem:[#allocation66_spill] sm:$0xff] %v8818_v4  ;;  %v11423_v4 = vsub.s32 2, %v8348_v8  ;;  %v8852_v56 = vadd.f32 %v8470_v62, %v8388_v18  ;;  %v8861_v19 = vrot.slane %v480_v26, %v11425_v63  ;;  %v8873_v62 = vadd.f32 %v8585_v25, %v8637_v34 }
 0x15e   : > { %v8829_v31 = vpop.f32.mrf.mxu0  ;;  %v8831_v45 = vpop.f32.mrf.mxu1  ;;  %v8900_v8 = vadd.f32 %v8577_v14, %v8630_v5  ;;  %v8919_v14 = vadd.f32 %v8505_v12, %v8630_v5  ;;  %11437 = vst [vmem:[#allocation80_spill] sm:$0xff] %v8959_v40  ;;  %v8978_v12 = vadd.f32 %v8593_v44, %v8383_v24  ;;  %11441 = vst [vmem:[#allocation84_spill] sm:$0xff] %v8982_v1  ;;  %v11451_v1 = vld [vmem:[#allocation33_spill] sm:$0xff] }
 0x15f   : > { %v8844_v52 = vrot.slane %v480_v26, %v11423_v4  ;;  %v8865_v4 = vadd.f32 %v8417_v38, %v8630_v5  ;;  %11426 = vst [vmem:[#allocation69_spill] sm:$0xff] %v8873_v62  ;;  %v8882_v26 = vadd.f32 %v8459_v57, %v8383_v24  ;;  %v8886_v38 = vadd.f32 %v8461_v58, %v8630_v5 }
 0x160   : > { %v1617_v7 = vpop.f32.mrf.mxu0  ;;  %v8854_v49 = vpop.f32.mrf.mxu1  ;;  %11430 = vst [vmem:[#allocation73_spill] sm:$0xff] %v8900_v8  ;;  %11433 = vst [vmem:[#allocation76_spill] sm:$0xff] %v8919_v14 }
 0x161   : > { %11424 = vst [vmem:[#allocation68_spill] sm:$0xff] %v8854_v49  ;;  %v8876_v49 = vadd.f32 %v1617_v7, %v8662_v59  ;;  %v8896_v7 = vadd.f32 %v8549_v48, %v8388_v18  ;;  %v8915_v48 = vadd.f32 %v8503_v11, %v8383_v24  ;;  %v8935_v11 = vadd.f32 %v8575_v10, %v8388_v18 }
 0x162   : > { %v1619_v25 = vpop.f32.mrf.mxu0  ;;  %v8892_v63 = vpop.f32.mrf.mxu1  ;;  %11440 = vst [vmem:[#allocation83_spill] sm:$0xff] %v8978_v12  ;;  %11442 = vst [vmem:[#allocation85_spill] sm:$0xff] %v8990_v2  ;;  %v8999_v18 = vadd.f32 %v8599_v55, %v8637_v34  ;;  %v9019_v55 = vadd.f32 %v8700_v33, %v8670_v9  ;;  %v9038_v33 = vadd.f32 %v8724_v28, %v8662_v59  ;;  %v11456_v2 = vld [vmem:[#allocation41_spill] sm:$0xff] }
 0x163   : > { %11427 = vst [vmem:[#allocation70_spill] sm:$0xff] %v8876_v49  ;;  %11429 = vst [vmem:[#allocation72_spill] sm:$0xff] %v8896_v7  ;;  %v8905_v58 = vadd.f32 %v1619_v25, %v8670_v9  ;;  %v8927_v25 = vadd.f32 %v8512_v16, %v8637_v34  ;;  %v8943_v49 = vadd.f32 %v8540_v43, %v8630_v5 }
 0x164   : > { %11432 = vst [vmem:[#allocation75_spill] sm:$0xff] %v8915_v48  ;;  %v8921_v32 = vpop.f32.mrf.mxu0  ;;  %v8923_v57 = vpop.f32.mrf.mxu1  ;;  %11435 = vst [vmem:[#allocation78_spill] sm:$0xff] %v8935_v11  ;;  %v8947_v16 = vadd.f32 %v8547_v46, %v8637_v34  ;;  %v8963_v43 = vadd.f32 %v8595_v50, %v8630_v5  ;;  %v9091_v39 = vadd.f32 %v11456_v2, %v8834_v54  ;;  %v11465_v48 = vld [vmem:[#allocation49_spill] sm:$0xff] }
 0x165   : > { %11431 = vst [vmem:[#allocation74_spill] sm:$0xff] %v8905_v58  ;;  %v8974_v58 = vadd.f32 %v8573_v0, %v8637_v34  ;;  %v9095_v28 = vadd.f32 %v8754_v47, %v8662_v59 }
 0x166   : > { %v1623_v10 = vpop.f32.mrf.mxu0  ;;  %v8953_v62 = vpop.f32.mrf.mxu1  ;;  %11438 = vst [vmem:[#allocation81_spill] sm:$0xff] %v8963_v43 }
 0x167   : > { %v8966_v46 = vadd.f32 %v1623_v10, %v8670_v9  ;;  %v9005_v10 = vadd.f32 %v8614_v51, %v8383_v24  ;;  %v9028_v51 = vadd.f32 %v8616_v35, %v8630_v5  ;;  %v11450_v35 = vld [vmem:[#allocation28_spill] sm:$0xff] }
 0x168   : > { %v1627_v50 = vpop.f32.mrf.mxu0  ;;  %v8984_v8 = vpop.f32.mrf.mxu1 }
 0x169   : > { %11439 = vst [vmem:[#allocation82_spill] sm:$0xff] %v8966_v46  ;;  %v8995_v44 = vadd.f32 %v1627_v50, %v8662_v59  ;;  %11444 = vst [vmem:[#allocation87_spill] sm:$0xff] %v9005_v10  ;;  %v9015_v50 = vadd.f32 %v8603_v13, %v8630_v5  ;;  %v9032_v46 = vadd.f32 %v11448_v29, %v8637_v34  ;;  %v11453_v13 = vld [vmem:[#allocation35_spill] sm:$0xff] }
 0x16a   : > { %v1629_v11 = vpop.f32.mrf.mxu0  ;;  %v9011_v0 = vpop.f32.mrf.mxu1  ;;  %11447 = vst [vmem:[#allocation90_spill] sm:$0xff] %v9028_v51  ;;  %v9050_v5 = vadd.f32 %v11450_v35, %v8834_v54  ;;  %v9054_v29 = vadd.f32 %v8683_v20, %v8837_v22  ;;  %v9062_v10 = vadd.f32 %v11451_v1, %v8834_v54  ;;  %v9070_v35 = vadd.f32 %v8730_v15, %v8670_v9  ;;  %v11454_v1 = vld [vmem:[#allocation38_spill] sm:$0xff] }
 0x16b   : > { %11443 = vst [vmem:[#allocation86_spill] sm:$0xff] %v8995_v44  ;;  %11445 = vst [vmem:[#allocation88_spill] sm:$0xff] %v9015_v50  ;;  %v9024_v24 = vadd.f32 %v1629_v11, %v8670_v9  ;;  %v9046_v11 = vadd.f32 %v8664_v27, %v8637_v34  ;;  %v11452_v34 = vld [vmem:[#allocation34_spill] sm:$0xff]  ;;  %v9082_v50 = vadd.f32 %v11454_v1, %v8837_v22 }
 0x16c   : > { %v9040_v43 = vpop.f32.mrf.mxu0  ;;  %v9042_v30 = vpop.f32.mrf.mxu1  ;;  %v9066_v27 = vadd.f32 %v11452_v34, %v8837_v22  ;;  %v9125_v15 = vadd.f32 %v11465_v48, %v8834_v54 }
 0x16d   : > { %11446 = vst [vmem:[#allocation89_spill] sm:$0xff] %v9024_v24  ;;  %11449 = vst [vmem:[#allocation20_spill] sm:$0xff] %v9046_v11  ;;  %v9078_v24 = vadd.f32 %v11453_v13, %v8834_v54  ;;  %v9099_v13 = vadd.f32 %v8760_v53, %v8670_v9  ;;  %v11461_v53 = vld [vmem:[#allocation43_spill] sm:$0xff] }
 0x16e   : > { %v1633_v20 = vpop.f32.mrf.mxu0  ;;  %v9072_v44 = vpop.f32.mrf.mxu1  ;;  %v9117_v60 = vadd.f32 %v11461_v53, %v8834_v54 }
 0x16f   : > { %v9085_v34 = vadd.f32 %v1633_v20, %v8670_v9  ;;  %11457 = vst [vmem:[#allocation33_spill] sm:$0xff] %v9099_v13  ;;  %v11458_v20 = vld [vmem:[#allocation42_spill] sm:$0xff] }
 0x170   : > { %v1637_v1 = vpop.f32.mrf.mxu0  ;;  %v1750_v12 = vpop.f32.mrf.mxu1  ;;  %v9103_v40 = vadd.f32 %v11458_v20, %v8837_v22  ;;  %11462 = vst [vmem:[#allocation38_spill] sm:$0xff] %v9117_v60  ;;  %v9121_v20 = vadd.f32 %v11463_v41, %v8837_v22  ;;  %11466 = vst [vmem:[#allocation42_spill] sm:$0xff] %v9125_v15  ;;  %v11470_v15 = vld [vmem:[#allocation50_spill] sm:$0xff]  ;;  %v9177_v41 = vadd.f32 %v8829_v31, %v8670_v9  ;;  %v11482_v31 = vld [vmem:[#allocation59_spill] sm:$0xff] }
 0x171   : > { %11455 = vst [vmem:[#allocation28_spill] sm:$0xff] %v9085_v34  ;;  %v9108_v2 = vadd.f32 %v1637_v1, %v8662_v59  ;;  %v9111_v7 = vadd.f32 %v1750_v12, %v8834_v54  ;;  %v9129_v12 = vadd.f32 %v8784_v3, %v8662_v59  ;;  %v9145_v60 = vadd.f32 %v11470_v15, %v8837_v22  ;;  %v11471_v3 = vld [vmem:[#allocation58_spill] sm:$0xff] }
 0x172   : > { %11464 = vst [vmem:[#allocation41_spill] sm:$0xff] %v9121_v20  ;;  %v1639_v1 = vpop.f32.mrf.mxu0  ;;  %v1752_v34 = vpop.f32.mrf.mxu1  ;;  %v9149_v20 = vadd.f32 %v11471_v3, %v8670_v9  ;;  %v11477_v15 = vld [vmem:[#allocation54_spill] sm:$0xff]  ;;  %v11478_v3 = vld [vmem:[#allocation57_spill] sm:$0xff] }
 0x173   : > { %11459 = vst [vmem:[#allocation34_spill] sm:$0xff] %v9108_v2  ;;  %11460 = vst [vmem:[#allocation35_spill] sm:$0xff] %v9111_v7  ;;  %v9134_v53 = vadd.f32 %v1639_v1, %v8670_v9  ;;  %v9137_v51 = vadd.f32 %v1752_v34, %v8837_v22  ;;  %v11472_v2 = vld [vmem:[#allocation51_spill] sm:$0xff]  ;;  %v9165_v13 = vadd.f32 %v11477_v15, %v8837_v22 }
 0x174   : > { %v1641_v7 = vpop.f32.mrf.mxu0  ;;  %v1754_v1 = vpop.f32.mrf.mxu1  ;;  %v9153_v34 = vadd.f32 %v11472_v2, %v8834_v54  ;;  %v9169_v14 = vadd.f32 %v11478_v3, %v8834_v54  ;;  %v9173_v2 = vadd.f32 %v8816_v23, %v8662_v59  ;;  %v9201_v15 = vadd.f32 %v8921_v32, %v8662_v59  ;;  %v11487_v23 = vld [vmem:[#allocation66_spill] sm:$0xff]  ;;  %v11491_v32 = vld [vmem:[#allocation68_spill] sm:$0xff] }
 0x175   : > { %11468 = vst [vmem:[#allocation43_spill] sm:$0xff] %v9134_v53  ;;  %11469 = vst [vmem:[#allocation46_spill] sm:$0xff] %v9137_v51  ;;  %v9158_v51 = vadd.f32 %v1641_v7, %v8662_v59  ;;  %v9161_v48 = vadd.f32 %v1754_v1, %v8834_v54 }
 0x176   : > { %11473 = vst [vmem:[#allocation49_spill] sm:$0xff] %v9153_v34  ;;  %11479 = vst [vmem:[#allocation51_spill] sm:$0xff] %v9169_v14  ;;  %v1643_v7 = vpop.f32.mrf.mxu0  ;;  %v1756_v53 = vpop.f32.mrf.mxu1  ;;  %v11483_v14 = vld [vmem:[#allocation60_spill] sm:$0xff] }
 0x177   : > { %11475 = vst [vmem:[#allocation50_spill] sm:$0xff] %v9158_v51  ;;  %11476 = vst [vmem:[#allocation58_spill] sm:$0xff] %v9161_v48  ;;  %v9184_v47 = vadd.f32 %v1643_v7, %v8670_v9  ;;  %v9187_v3 = vadd.f32 %v1756_v53, %v8837_v22  ;;  %v9193_v48 = vadd.f32 %v11482_v31, %v8837_v22  ;;  %v11486_v53 = vld [vmem:[#allocation63_spill] sm:$0xff] }
 0x178   : > { %v9197_v34 = vadd.f32 %v11483_v14, %v8834_v54  ;;  %11485 = vst [vmem:[#allocation60_spill] sm:$0xff] %v9201_v15  ;;  %v1793_v9 = vpop.f32.mrf.mxu0  ;;  %v1906_v7 = vpop.f32.mrf.mxu1  ;;  %v9205_v1 = vadd.f32 %v11486_v53, %v8837_v22  ;;  %v9209_v51 = vadd.f32 %v11487_v23, %v8834_v54  ;;  %v9224_v53 = vadd.f32 %v9040_v43, %v8662_v59 }
 0x179   : > { %11480 = vst [vmem:[#allocation54_spill] sm:$0xff] %v9184_v47  ;;  %11481 = vst [vmem:[#allocation57_spill] sm:$0xff] %v9187_v3  ;;  %v1907_v14 = vadd.f32 %v1906_v7, %v8844_v52  ;;  %v1794_v11 = vadd.f32 %v1793_v9, %v8840_v36  ;;  %v9232_v31 = vadd.f32 %v11491_v32, %v8834_v54  ;;  %v11495_v32 = vld [vmem:[#allocation30_spill] sm:$0xff] }
 0x17a   : > { %11484 = vst [vmem:[#allocation59_spill] sm:$0xff] %v9197_v34  ;;  %11488 = vst [vmem:[#allocation63_spill] sm:$0xff] %v9209_v51  ;;  %v9220_v34 = vadd.f32 %v8831_v45, %v8837_v22  ;;  %v1795_v23 = vpop.f32.mrf.mxu0  ;;  %v1908_v51 = vpop.f32.mrf.mxu1  ;;  %v9236_v45 = vadd.f32 %v8892_v63, %v8837_v22  ;;  %v9242_v43 = vadd.f32 %v8923_v57, %v8834_v54 }
 0x17b   : > { %11490 = vst [vmem:[#allocation66_spill] sm:$0xff] %v9224_v53  ;;  %v2034_v7 = vmax.f32 %v9054_v29, %v1907_v14  ;;  %v1796_v47 = vadd.f32 %v1795_v23, %v8857_v21  ;;  %v1909_v3 = vadd.f32 %v1908_v51, %v8861_v19  ;;  %11492 = vst [vmem:[#allocation68_spill] sm:$0xff] %v9232_v31  ;;  %v11494_v14 = vld [vmem:[#allocation29_spill] sm:$0xff] }
 0x17c   : > { %11493 = vst [vmem:[#allocation91_spill] sm:$0xff] %v9236_v45  ;;  %v1797_v29 = vpop.f32.mrf.mxu0  ;;  %v1910_v9 = vpop.f32.mrf.mxu1  ;;  %v9246_v51 = vadd.f32 %v8953_v62, %v8837_v22  ;;  %v11496_v23 = vmax.f32 %v11494_v14, %v11495_v32  ;;  %v9256_v59 = vadd.f32 %v8984_v8, %v8834_v54  ;;  %v9260_v57 = vadd.f32 %v9011_v0, %v8837_v22  ;;  %v11502_v32 = vld [vmem:[#allocation31_spill] sm:$0xff] }
 0x17d   : > { %v2033_v63 = vmax.f32 %v9050_v5, %v1796_v47  ;;  %v2035_v45 = vmax.f32 %v1794_v11, %v1909_v3  ;;  %v9264_v62 = vadd.f32 %v9042_v30, %v8834_v54  ;;  %v1911_v15 = vadd.f32 %v1910_v9, %v8844_v52  ;;  %v11499_v11 = vld [vmem:[#allocation5_spill] sm:$0xff]  ;;  %v11500_v47 = vld [vmem:[#allocation6_spill] sm:$0xff] }
 0x17e   : > { %v9251_v31 = vmax.f32 %v11496_v23, %v2034_v7  ;;  %11497 = vst [vmem:[#allocation29_spill] sm:$0xff] %v9256_v59  ;;  %11498 = vst [vmem:[#allocation30_spill] sm:$0xff] %v9260_v57  ;;  %v1799_v14 = vpop.f32.mrf.mxu0  ;;  %v1912_v7 = vpop.f32.mrf.mxu1  ;;  %v11501_v3 = vmax.f32 %v11499_v11, %v11500_v47  ;;  %v11503_v23 = vld [vmem:[#allocation32_spill] sm:$0xff]  ;;  %v9280_v54 = vadd.f32 %v9072_v44, %v8837_v22 }
 0x17f   : > { %v11504_v0 = vmax.f32 %v11502_v32, %v11503_v23  ;;  %v1800_v57 = vadd.f32 %v1799_v14, %v8857_v21  ;;  %v1798_v30 = vadd.f32 %v1797_v29, %v8840_v36  ;;  %v2037_v9 = vmax.f32 %v9066_v27, %v1911_v15 }
 0x180   : > { %v9272_v8 = vmax.f32 %v11501_v3, %v2033_v63  ;;  %v1913_v5 = vadd.f32 %v1912_v7, %v8861_v19  ;;  %v1803_v53 = vpop.f32.mrf.mxu0  ;;  %v1916_v11 = vpop.f32.mrf.mxu1  ;;  %v11356_v63 = vmax.f32 %v9251_v31, 0.0  ;;  %v11505_v14 = vmax.f32 %v8869_v37, %v9009_v6 }
 0x181   : > { %v2083_v59 = vmax.f32 %v11504_v0, %v2035_v45  ;;  %v2036_v45 = vmax.f32 %v9062_v10, %v1800_v57  ;;  %v1804_v29 = vadd.f32 %v1803_v53, %v8840_v36  ;;  %v1917_v27 = vadd.f32 %v1916_v11, %v8844_v52  ;;  %v11506_v10 = vld [vmem:[#allocation67_spill] sm:$0xff] }
 0x182   : > { %v2129_v47 = vmax.f32 %v9272_v8, 0.0  ;;  %v2085_v22 = vmax.f32 %v11505_v14, %v2037_v9  ;;  %v2038_v44 = vmax.f32 %v1798_v30, %v1913_v5  ;;  %v1805_v15 = vpop.f32.mrf.mxu0  ;;  %v1918_v7 = vpop.f32.mrf.mxu1  ;;  %v11507_v57 = vmax.f32 %v8848_v42, %v11506_v10 }
 0x183   : > { %v2131_v3 = vmax.f32 %v2083_v59, 0.0  ;;  %v1806_v37 = vadd.f32 %v1805_v15, %v8857_v21  ;;  %v11508_v53 = vmax.f32 %v8865_v4, %v9019_v55  ;;  %v2040_v0 = vmax.f32 %v9082_v50, %v1917_v27  ;;  %v11509_v15 = vld [vmem:[#allocation36_spill] sm:$0xff]  ;;  %v11510_v4 = vld [vmem:[#allocation37_spill] sm:$0xff] }
 0x184   : > { %v9297_v32 = vpack.c.bf16 %v11356_v63, %v2129_v47  ;;  %v2084_v23 = vmax.f32 %v11507_v57, %v2036_v45  ;;  %v2133_v6 = vmax.f32 %v2085_v22, 0.0  ;;  %v1919_v30 = vadd.f32 %v1918_v7, %v8861_v19  ;;  %v1807_v9 = vpop.f32.mrf.mxu0  ;;  %v1920_v11 = vpop.f32.mrf.mxu1 }
 0x185   : > { %v6862_v59 = vpack.c.bf16 %v2131_v3, %v2131_v3  ;;  %v2086_v5 = vmax.f32 %v11508_v53, %v2038_v44  ;;  %v2039_v42 = vmax.f32 %v9078_v24, %v1806_v37  ;;  %v1808_v45 = vadd.f32 %v1807_v9, %v8840_v36 }
 0x186   : > { %2337 = vst [vmem:[#allocation2] sm:$0xff] %v9297_v32  ;;  %v2132_v3 = vmax.f32 %v2084_v23, 0.0  ;;  %v1921_v14 = vadd.f32 %v1920_v11, %v8844_v52  ;;  %v11511_v55 = vmax.f32 %v11509_v15, %v11510_v4  ;;  %v2041_v50 = vmax.f32 %v1804_v29, %v1919_v30  ;;  %v1809_v27 = vpop.f32.mrf.mxu0  ;;  %v1922_v7 = vpop.f32.mrf.mxu1  ;;  %v11513_v23 = vld [vmem:[#allocation8_spill] sm:$0xff]  ;;  %v11515_v15 = vld [vmem:[#allocation39_spill] sm:$0xff] }
 0x187   : > { %2338 = vst [vmem:[#allocation2 + $0x8] sm:$0xf] %v6862_v59  ;;  %v2134_v22 = vmax.f32 %v2086_v5, 0.0  ;;  %v2421_v10 = vshrl.u32 %v9297_v32, 16  ;;  %v11512_v59 = vld [vmem:[#allocation7_spill] sm:$0xff]  ;;  %v1810_v9 = vadd.f32 %v1809_v27, %v8857_v21  ;;  %v1923_v30 = vadd.f32 %v1922_v7, %v8861_v19 }
 0x188   : > { %v9315_v44 = vmax.f32 %v11511_v55, %v2040_v0  ;;  %v6863_v57 = vpack.c.bf16 %v2133_v6, %v2132_v3  ;;  %v11514_v53 = vmax.f32 %v11512_v59, %v11513_v23  ;;  %v2043_v37 = vmax.f32 %v9103_v40, %v1921_v14  ;;  %v11516_v0 = vld [vmem:[#allocation40_spill] sm:$0xff]  ;;  %v1813_v55 = vpop.f32.mrf.mxu0  ;;  %v1926_v63 = vpop.f32.mrf.mxu1 }
 0x189   : > { %v6864_v5 = vpack.c.bf16 %v2134_v22, %v2134_v22  ;;  %v11517_v4 = vmax.f32 %v11515_v15, %v11516_v0  ;;  %v11518_v3 = vmax.f32 %v8909_v17, %v9038_v33  ;;  %v2042_v40 = vmax.f32 %v9091_v39, %v1810_v9  ;;  %v11522_v0 = vld [vmem:[#allocation38_spill] sm:$0xff] }
 0x18a   : > { %v2087_v24 = vmax.f32 %v11514_v53, %v2039_v42  ;;  %v2136_v11 = vmax.f32 %v9315_v44, 0.0  ;;  %2339 = vst [vmem:[#allocation2 + $0xc] sm:$0xff] %v6863_v57  ;;  %v1814_v14 = vadd.f32 %v1813_v55, %v8840_v36  ;;  %v2044_v44 = vmax.f32 %v1808_v45, %v1923_v30  ;;  %v1928_v59 = vpop.f32.mrf.mxu1  ;;  %v11523_v30 = vld [vmem:[#allocation44_spill] sm:$0xff] }
 0x18b   : > { %v2089_v29 = vmax.f32 %v11517_v4, %v2041_v50  ;;  %v2091_v42 = vmax.f32 %v11518_v3, %v2043_v37  ;;  %2340 = vst [vmem:[#allocation2 + $0x14] sm:$0xf] %v6864_v5  ;;  %v1927_v27 = vadd.f32 %v1926_v63, %v8844_v52  ;;  %v1815_v50 = vpop.f32.mrf.mxu0  ;;  %v9334_v7 = vrot.slane %v2421_v10, 4  ;;  %v11521_v37 = vld [vmem:[#allocation41_spill] sm:$0xff] }
 0x18c   : > { %v2135_v6 = vmax.f32 %v2087_v24, 0.0  ;;  %v11519_v17 = vmax.f32 %v8882_v26, %v8852_v56  ;;  %v1816_v39 = vadd.f32 %v1815_v50, %v8857_v21  ;;  %v11520_v24 = vmax.f32 %v8886_v38, %v9070_v35  ;;  %v1930_v5 = vpop.f32.mrf.mxu1  ;;  %v11524_v38 = vld [vmem:[#allocation45_spill] sm:$0xff]  ;;  %v11527_v50 = vld [vmem:[#allocation10_spill] sm:$0xff] }
 0x18d   : > { %v2137_v22 = vmax.f32 %v2089_v29, 0.0  ;;  %v2139_v57 = vmax.f32 %v2091_v42, 0.0  ;;  %v2046_v63 = vmax.f32 %v11521_v37, %v1927_v27  ;;  %v1929_v9 = vadd.f32 %v1928_v59, %v8861_v19  ;;  %v1817_v10 = vpop.f32.mrf.mxu0  ;;  %v11526_v27 = vld [vmem:[#allocation9_spill] sm:$0xff] }
 0x18e   : > { %v9336_v23 = vpack.c.bf16 %v2136_v11, %v2135_v6  ;;  %v2090_v33 = vmax.f32 %v11519_v17, %v2042_v40  ;;  %v2092_v45 = vmax.f32 %v11520_v24, %v2044_v44  ;;  %v2045_v4 = vmax.f32 %v11522_v0, %v1816_v39  ;;  %v1932_v40 = vpop.f32.mrf.mxu1 }
 0x18f   : > { %v6866_v53 = vpack.c.bf16 %v2137_v22, %v2137_v22  ;;  %v1818_v56 = vadd.f32 %v1817_v10, %v8840_v36  ;;  %v1931_v26 = vadd.f32 %v1930_v5, %v8844_v52  ;;  %v11525_v35 = vmax.f32 %v11523_v30, %v11524_v38  ;;  %v1819_v42 = vpop.f32.mrf.mxu0  ;;  %v11533_v10 = vld [vmem:[#allocation42_spill] sm:$0xff] }
 0x190   : > { %2341 = vst [vmem:[#allocation2 + $0x18] sm:$0xff] %v9336_v23  ;;  %v2138_v15 = vmax.f32 %v2090_v33, 0.0  ;;  %v2140_v29 = vmax.f32 %v2092_v45, 0.0  ;;  %v2047_v3 = vmax.f32 %v1814_v14, %v1929_v9  ;;  %v7617_v22 = vpack.c.bf16 %v2135_v6, %v2129_v47  ;;  %v11529_v45 = vld [vmem:[#allocation47_spill] sm:$0xff]  ;;  %v11530_v14 = vld [vmem:[#allocation48_spill] sm:$0xff]  ;;  %v1936_v6 = vpop.f32.mrf.mxu1 }
 0x191   : > { %2342 = vst [vmem:[#allocation2 + $0x20] sm:$0xf] %v6866_v53  ;;  %v9354_v55 = vmax.f32 %v11525_v35, %v2046_v63  ;;  %v11528_v59 = vmax.f32 %v11526_v27, %v11527_v50  ;;  %v2049_v33 = vmax.f32 %v9145_v60, %v1931_v26  ;;  %v1820_v39 = vadd.f32 %v1819_v42, %v8857_v21  ;;  %v1823_v47 = vpop.f32.mrf.mxu0  ;;  %v11535_v42 = vld [vmem:[#allocation75_spill] sm:$0xff]  ;;  %v11538_v50 = vld [vmem:[#allocation76_spill] sm:$0xff] }
 0x192   : > { %v6867_v44 = vpack.c.bf16 %v2139_v57, %v2138_v15  ;;  %v6868_v53 = vpack.c.bf16 %v2140_v29, %v2140_v29  ;;  %v11531_v37 = vmax.f32 %v11529_v45, %v11530_v14  ;;  %v1933_v8 = vadd.f32 %v1932_v40, %v8861_v19  ;;  %v1938_v30 = vpop.f32.mrf.mxu1 }
 0x193   : > { %v9361_v17 = vmax.f32 %v11528_v59, %v2045_v4  ;;  %v2142_v24 = vmax.f32 %v9354_v55, 0.0  ;;  %v11532_v9 = vmax.f32 %v8927_v25, %v9095_v28  ;;  %v2048_v5 = vmax.f32 %v11533_v10, %v1820_v39  ;;  %v1825_v29 = vpop.f32.mrf.mxu0  ;;  %v11539_v59 = vld [vmem:[#allocation33_spill] sm:$0xff]  ;;  %v11542_v10 = vld [vmem:[#allocation52_spill] sm:$0xff] }
 0x194   : > { %v2095_v63 = vmax.f32 %v11531_v37, %v2047_v3  ;;  %2343 = vst [vmem:[#allocation2 + $0x24] sm:$0xff] %v6867_v44  ;;  %v1824_v15 = vadd.f32 %v1823_v47, %v8840_v36  ;;  %2344 = vst [vmem:[#allocation2 + $0x2c] sm:$0xf] %v6868_v53  ;;  %v2050_v4 = vmax.f32 %v1818_v56, %v1933_v8  ;;  %v11534_v38 = vmax.f32 %v9251_v31, 0.0  ;;  %v7283_v3 = vld [vmem:[%s11272_s3 + $0x270] ss:$8 sps:$4 sm:$0xff]   ;;  %v1940_v37 = vpop.f32.mrf.mxu1 }
 0x195   : > { %v2141_v57 = vmax.f32 %v9361_v17, 0.0  ;;  %v2097_v60 = vmax.f32 %v11532_v9, %v2049_v33  ;;  %v1937_v26 = vadd.f32 %v1936_v6, %v8844_v52  ;;  %v11536_v56 = vld [vmem:[#allocation71_spill] sm:$0xff]  ;;  %v1826_v27 = vadd.f32 %v1825_v29, %v8857_v21  ;;  %v7291_v31 = vld [vmem:[%s11272_s3 + $0x264] ss:$8 sps:$4 sm:$0xff]   ;;  %v1827_v14 = vpop.f32.mrf.mxu0 }
 0x196   : > { %v2143_v0 = vmax.f32 %v2095_v63, 0.0  ;;  %v7618_v35 = vpack.c.bf16 %v2136_v11, %v11534_v38  ;;  %v11537_v40 = vmax.f32 %v11535_v42, %v11536_v56  ;;  %v11540_v33 = vmax.f32 %v11538_v50, %v11539_v59  ;;  %v11541_v8 = vld [vmem:[#allocation49_spill] sm:$0xff]  ;;  %v1942_v29 = vpop.f32.mrf.mxu1  ;;  %v11545_v42 = vld [vmem:[#allocation11_spill] sm:$0xff] }
 0x197   : > { %v9386_v25 = vpack.c.bf16 %v2142_v24, %v2141_v57  ;;  %v2145_v28 = vmax.f32 %v2097_v60, 0.0  ;;  %v2052_v53 = vmax.f32 %v9165_v13, %v1937_v26  ;;  %v1939_v45 = vadd.f32 %v1938_v30, %v8861_v19  ;;  %v1829_v26 = vpop.f32.mrf.mxu0  ;;  %v7289_v30 = vld [vmem:[%s11272_s3 + $0x260] ss:$8 sps:$4 sm:$0xff]   ;;  %v11548_v50 = vld [vmem:[#allocation55_spill] sm:$0xff]  ;;  %v7329_v55 = vld [vmem:[%s11272_s3 + $0x204] ss:$8 sps:$4 sm:$0xff]  }
 0x198   : > { %v2096_v44 = vmax.f32 %v11537_v40, %v2048_v5  ;;  %v6870_v11 = vpack.c.bf16 %v2143_v0, %v2143_v0  ;;  %v2098_v39 = vmax.f32 %v11540_v33, %v2050_v4  ;;  %4921 = vmatprep.mubr.bf16.mxu0 %v7618_v35  ;;  %v2051_v47 = vmax.f32 %v11541_v8, %v1826_v27  ;;  %v11543_v5 = vld [vmem:[#allocation53_spill] sm:$0xff] }
 0x199   : > { %2345 = vst [vmem:[#allocation2 + $0x30] sm:$0xff] %v9386_v25  ;;  %v1828_v6 = vadd.f32 %v1827_v14, %v8840_v36  ;;  %v1941_v9 = vadd.f32 %v1940_v37, %v8844_v52  ;;  %4922 = vmatmul.mubr.bf16.vlgmr.msra.gmra.mxu0 %v7617_v22  ;;  %v11544_v13 = vmax.f32 %v11542_v10, %v11543_v5  ;;  %v2424_v38 = vshll.u32 %v9297_v32, 16  ;;  %v11546_v22 = vld [vmem:[#allocation12_spill] sm:$0xff]  ;;  %v11552_v14 = vld [vmem:[#allocation51_spill] sm:$0xff] }
 0x19a   : > { %v2144_v63 = vmax.f32 %v2096_v44, 0.0  ;;  %2346 = vst [vmem:[#allocation2 + $0x38] sm:$0xf] %v6870_v11  ;;  %v2146_v60 = vmax.f32 %v2098_v39, 0.0  ;;  %v2053_v4 = vmax.f32 %v1824_v15, %v1939_v45  ;;  %5036 = vmatpush1.bf16.msra.mxu0 %v7283_v3  ;;  %v11547_v56 = vmax.f32 %v11545_v42, %v11546_v22  ;;  %v7297_v15 = vld [vmem:[%s11272_s3 + $0x254] ss:$8 sps:$4 sm:$0xff]   ;;  %v1833_v39 = vpop.f32.mrf.mxu0 }
 0x19b   : > { %v9407_v0 = vmax.f32 %v11544_v13, %v2052_v53  ;;  %v2055_v44 = vmax.f32 %v9193_v48, %v1941_v9  ;;  %v1830_v27 = vadd.f32 %v1829_v26, %v8857_v21  ;;  %5037 = vmatprep.subr.bf16.mxu0 %v7291_v31  ;;  %v11549_v32 = vld [vmem:[#allocation56_spill] sm:$0xff]  ;;  %v1943_v33 = vadd.f32 %v1942_v29, %v8861_v19  ;;  %v1946_v53 = vpop.f32.mrf.mxu1  ;;  %v7295_v5 = vld [vmem:[%s11272_s3 + $0x250] ss:$8 sps:$4 sm:$0xff]  }
 0x19c   : > { %v6871_v35 = vpack.c.bf16 %v2145_v28, %v2144_v63  ;;  %v9416_v40 = vmax.f32 %v11547_v56, %v2051_v47  ;;  %v6872_v3 = vpack.c.bf16 %v2146_v60, %v2146_v60  ;;  %v11550_v28 = vmax.f32 %v11548_v50, %v11549_v32  ;;  %v1835_v60 = vpop.f32.mrf.mxu0  ;;  %v11554_v26 = vld [vmem:[#allocation72_spill] sm:$0xff]  ;;  %v11557_v32 = vld [vmem:[#allocation59_spill] sm:$0xff] }
 0x19d   : > { %v2148_v11 = vmax.f32 %v9407_v0, 0.0  ;;  %v11551_v31 = vmax.f32 %v8947_v16, %v9129_v12  ;;  %v2054_v37 = vmax.f32 %v11552_v14, %v1830_v27  ;;  %v1834_v63 = vadd.f32 %v1833_v39, %v8840_v36  ;;  %v1948_v10 = vpop.f32.mrf.mxu1  ;;  %v11558_v39 = vld [vmem:[#allocation61_spill] sm:$0xff] }
 0x19e   : > { %v2101_v59 = vmax.f32 %v11550_v28, %v2053_v4  ;;  %2347 = vst [vmem:[#allocation2 + $0x3c] sm:$0xff] %v6871_v35  ;;  %v2147_v48 = vmax.f32 %v9416_v40, 0.0  ;;  %2348 = vst [vmem:[#allocation2 + $0x44] sm:$0xf] %v6872_v3  ;;  %v2056_v47 = vmax.f32 %v1828_v6, %v1943_v33  ;;  %v1947_v9 = vadd.f32 %v1946_v53, %v8844_v52  ;;  %v11553_v4 = vld [vmem:[#allocation77_spill] sm:$0xff]  ;;  %v1837_v27 = vpop.f32.mrf.mxu0 }
 0x19f   : > { %v2103_v45 = vmax.f32 %v11551_v31, %v2055_v44  ;;  %5038 = vmatpush1.bf16.msra.mxu0 %v7289_v30  ;;  %v2426_v16 = vrot.slane %v2424_v38, 5  ;;  %v11555_v6 = vmax.f32 %v11553_v4, %v11554_v26  ;;  %v1836_v35 = vadd.f32 %v1835_v60, %v8857_v21  ;;  %v7304_v30 = vld [vmem:[%s11272_s3 + $0x244] ss:$8 sps:$4 sm:$0xff]   ;;  %v1950_v3 = vpop.f32.mrf.mxu1 }
 0x1a0   : > { %v2149_v8 = vmax.f32 %v2101_v59, 0.0  ;;  %v9442_v12 = vpack.c.bf16 %v2148_v11, %v2147_v48  ;;  %5039 = vmatprep.subr.bf16.mxu0 %v7297_v15  ;;  %v11556_v38 = vmax.f32 %v8943_v49, %v9149_v20  ;;  %v2058_v56 = vmax.f32 %v9205_v1, %v1947_v9  ;;  %v11559_v49 = vld [vmem:[#allocation62_spill] sm:$0xff]  ;;  %v1839_v31 = vpop.f32.mrf.mxu0  ;;  %v11583_v0 = vld [vmem:[#allocation73_spill] sm:$0xff] }
 0x1a1   : > { %v2151_v13 = vmax.f32 %v2103_v45, 0.0  ;;  %v2102_v29 = vmax.f32 %v11555_v6, %v2054_v37  ;;  %v1949_v44 = vadd.f32 %v1948_v10, %v8861_v19  ;;  %v2057_v15 = vmax.f32 %v11557_v32, %v1836_v35  ;;  %v1952_v45 = vpop.f32.mrf.mxu1  ;;  %v7302_v37 = vld [vmem:[%s11272_s3 + $0x240] ss:$8 sps:$4 sm:$0xff]   ;;  %v11562_v9 = vld [vmem:[#allocation14_spill] sm:$0xff] }
 0x1a2   : > { %v6874_v42 = vpack.c.bf16 %v2149_v8, %v2149_v8  ;;  %v2104_v22 = vmax.f32 %v11556_v38, %v2056_v47  ;;  %2349 = vst [vmem:[#allocation2 + $0x48] sm:$0xff] %v9442_v12  ;;  %v1838_v28 = vadd.f32 %v1837_v27, %v8840_v36  ;;  %v1951_v59 = vadd.f32 %v1950_v3, %v8844_v52  ;;  %v11561_v47 = vld [vmem:[#allocation13_spill] sm:$0xff] }
 0x1a3   : > { %v2150_v50 = vmax.f32 %v2102_v29, 0.0  ;;  %v11560_v20 = vmax.f32 %v11558_v39, %v11559_v49  ;;  %v2059_v1 = vmax.f32 %v1834_v63, %v1949_v44  ;;  %v2427_v14 = vor.u32 %v2426_v16, %v9334_v7  ;;  %5040 = vmatpush1.bf16.msra.mxu0 %v7295_v5  ;;  %v7310_v7 = vld [vmem:[%s11272_s3 + $0x234] ss:$8 sps:$4 sm:$0xff]   ;;  %v11564_v16 = vld [vmem:[#allocation64_spill] sm:$0xff]  ;;  %v11565_v6 = vld [vmem:[#allocation65_spill] sm:$0xff]  ;;  %v1956_v38 = vpop.f32.mrf.mxu1 }
 0x1a4   : > { %2350 = vst [vmem:[#allocation2 + $0x50] sm:$0xf] %v6874_v42  ;;  %v2152_v33 = vmax.f32 %v2104_v22, 0.0  ;;  %v11563_v60 = vmax.f32 %v11561_v47, %v11562_v9  ;;  %v2061_v4 = vmax.f32 %v9220_v34, %v1951_v59  ;;  %v1840_v26 = vadd.f32 %v1839_v31, %v8857_v21  ;;  %5041 = vmatprep.subr.bf16.mxu0 %v7304_v30  ;;  %v1843_v42 = vpop.f32.mrf.mxu0  ;;  %v9484_v22 = vld [vmem:[#allocation2 + $0xc] sm:$0x11]  ;;  %v11568_v44 = vld [vmem:[#allocation63_spill] sm:$0xff] }
 0x1a5   : > { %v9463_v53 = vmax.f32 %v11560_v20, %v2058_v56  ;;  %v6875_v8 = vpack.c.bf16 %v2151_v13, %v2150_v50  ;;  %v11566_v13 = vmax.f32 %v11564_v16, %v11565_v6  ;;  %v1953_v35 = vadd.f32 %v1952_v45, %v8861_v19  ;;  %v9495_v59 = vld [vmem:[#allocation2 + $0x24] sm:$0x11]  ;;  %v1958_v49 = vpop.f32.mrf.mxu1 }
 0x1a6   : > { %v9472_v10 = vmax.f32 %v11563_v60, %v2057_v15  ;;  %v6876_v63 = vpack.c.bf16 %v2152_v33, %v2152_v33  ;;  %v11567_v30 = vmax.f32 %v8974_v58, %v9173_v2  ;;  %v2060_v27 = vmax.f32 %v11568_v44, %v1840_v26  ;;  %v1845_v39 = vpop.f32.mrf.mxu0  ;;  %v7308_v58 = vld [vmem:[%s11272_s3 + $0x230] ss:$8 sps:$4 sm:$0xff]  }
 0x1a7   : > { %v2154_v5 = vmax.f32 %v9463_v53, 0.0  ;;  %v2107_v29 = vmax.f32 %v11566_v13, %v2059_v1  ;;  %2351 = vst [vmem:[#allocation2 + $0x54] sm:$0xff] %v6875_v8  ;;  %v9492_v3 = vadd.f32 %v1843_v42, %v8840_v36  ;;  %v2062_v32 = vmax.f32 %v1838_v28, %v1953_v35  ;;  %5042 = vmatpush1.bf16.msra.mxu0 %v7302_v37  ;;  %v11569_v28 = vld [vmem:[#allocation80_spill] sm:$0xff]  ;;  %v11570_v1 = vld [vmem:[#allocation78_spill] sm:$0xff]  ;;  %v11573_v60 = vld [vmem:[#allocation91_spill] sm:$0xff]  ;;  %v1960_v16 = vpop.f32.mrf.mxu1 }
 0x1a8   : > { %v2153_v34 = vmax.f32 %v9472_v10, 0.0  ;;  %v2109_v56 = vmax.f32 %v11567_v30, %v2061_v4  ;;  %2352 = vst [vmem:[#allocation2 + $0x5c] sm:$0xf] %v6876_v63  ;;  %v1957_v15 = vadd.f32 %v1956_v38, %v8844_v52  ;;  %v2428_v33 = vrot.slane %v2427_v14, 4  ;;  %5043 = vmatprep.subr.bf16.mxu0 %v7310_v7  ;;  %v7316_v37 = vld [vmem:[%s11272_s3 + $0x224] ss:$8 sps:$4 sm:$0xff]   ;;  %v1847_v7 = vpop.f32.mrf.mxu0 }
 0x1a9   : > { %v2155_v50 = vmax.f32 %v2107_v29, 0.0  ;;  %v11571_v31 = vmax.f32 %v11569_v28, %v11570_v1  ;;  %v2430_v14 = vshll.u32 %v9484_v22, 16  ;;  %v11572_v47 = vmax.f32 %v8970_v61, %v9177_v41  ;;  %v11576_v35 = vld [vmem:[#allocation69_spill] sm:$0xff]  ;;  %v11577_v42 = vld [vmem:[#allocation70_spill] sm:$0xff] }
 0x1aa   : > { %v9504_v2 = vpack.c.bf16 %v2154_v5, %v2153_v34  ;;  %v2157_v20 = vmax.f32 %v2109_v56, 0.0  ;;  %v2064_v4 = vmax.f32 %v11573_v60, %v1957_v15  ;;  %v2449_v63 = vshrl.u32 %v9336_v23, 16  ;;  %v7352_v53 = vld [vmem:[%s11272_s3 + $0x2c0] ss:$8 sps:$4 sm:$0xff]   ;;  %v11627_v10 = vld [vmem:[#allocation50_spill] sm:$0xff] }
 0x1ab   : > { %v2108_v45 = vmax.f32 %v11571_v31, %v2060_v27  ;;  %v6878_v8 = vpack.c.bf16 %v2155_v50, %v2155_v50  ;;  %v2110_v9 = vmax.f32 %v11572_v47, %v2062_v32  ;;  %v2432_v13 = vrot.slane %v2430_v14, 5  ;;  %v1849_v27 = vpop.f32.mrf.mxu0  ;;  %v1962_v50 = vpop.f32.mrf.mxu1  ;;  %5044 = vmatpush1.bf16.msra.mxu0 %v7308_v58  ;;  %v7314_v32 = vld [vmem:[%s11272_s3 + $0x220] ss:$8 sps:$4 sm:$0xff]   ;;  %v7322_v31 = vld [vmem:[%s11272_s3 + $0x214] ss:$8 sps:$4 sm:$0xff]  }
 0x1ac   : > { %2353 = vst [vmem:[#allocation2 + $0x60] sm:$0xff] %v9504_v2  ;;  %v2452_v29 = vshll.u32 %v9336_v23, 16  ;;  %v2458_v61 = vshll.u32 %v9495_v59, 16  ;;  %v11578_v38 = vmax.f32 %v11576_v35, %v11577_v42  ;;  %v2451_v56 = vrot.slane %v2449_v63, 4  ;;  %5045 = vmatprep.subr.bf16.mxu0 %v7316_v37  ;;  %v11579_v58 = vld [vmem:[#allocation68_spill] sm:$0xff] }
 0x1ad   : > { %v2156_v6 = vmax.f32 %v2108_v45, 0.0  ;;  %2354 = vst [vmem:[#allocation2 + $0x68] sm:$0xf] %v6878_v8  ;;  %v2158_v41 = vmax.f32 %v2110_v9, 0.0  ;;  %v1846_v44 = vadd.f32 %v1845_v39, %v8857_v21  ;;  %v9538_v15 = vsel %vm9519_vm4, %v2428_v33, %v2432_v13  ;;  %v1853_v47 = vpop.f32.mrf.mxu0  ;;  %v11581_v63 = vld [vmem:[#allocation16_spill] sm:$0xff] }
 0x1ae   : > { %v9530_v30 = vmax.f32 %v11578_v38, %v2064_v4  ;;  %v2454_v28 = vrot.slane %v2452_v29, 5  ;;  %v2460_v1 = vrot.slane %v2458_v61, 5  ;;  %v1959_v8 = vadd.f32 %v1958_v49, %v8861_v19  ;;  %v11580_v4 = vld [vmem:[#allocation15_spill] sm:$0xff] }
 0x1af   : > { %v6879_v23 = vpack.c.bf16 %v2157_v20, %v2156_v6  ;;  %v6880_v39 = vpack.c.bf16 %v2158_v41, %v2158_v41  ;;  %v2063_v14 = vmax.f32 %v11579_v58, %v1846_v44  ;;  %v1966_v20 = vpop.f32.mrf.mxu1  ;;  %v1848_v33 = vadd.f32 %v1847_v7, %v8840_v36  ;;  %v1855_v7 = vpop.f32.mrf.mxu0  ;;  %5046 = vmatpush1.bf16.msra.mxu0 %v7314_v32  ;;  %v11589_v58 = vld [vmem:[#allocation79_spill] sm:$0xff] }
 0x1b0   : > { %v2160_v45 = vmax.f32 %v9530_v30, 0.0  ;;  %v2455_v9 = vor.u32 %v2454_v28, %v2451_v56  ;;  %v1961_v60 = vadd.f32 %v1960_v16, %v8844_v52  ;;  %v1850_v37 = vadd.f32 %v1849_v27, %v8857_v21  ;;  %v7320_v16 = vld [vmem:[%s11272_s3 + $0x210] ss:$8 sps:$4 sm:$0xff]   ;;  %5047 = vmatprep.subr.bf16.mxu0 %v7322_v31 }
 0x1b1   : > { %2355 = vst [vmem:[#allocation2 + $0x6c] sm:$0xff] %v6879_v23  ;;  %2356 = vst [vmem:[#allocation2 + $0x74] sm:$0xf] %v6880_v39  ;;  %v11582_v6 = vmax.f32 %v11580_v4, %v11581_v63  ;;  %v2065_v29 = vmax.f32 %v9492_v3, %v1959_v8  ;;  %v1963_v49 = vadd.f32 %v1962_v50, %v8861_v19  ;;  %v1968_v41 = vpop.f32.mrf.mxu1  ;;  %v1857_v50 = vpop.f32.mrf.mxu0  ;;  %v11586_v23 = vld [vmem:[#allocation60_spill] sm:$0xff]  ;;  %v11588_v39 = vld [vmem:[#allocation83_spill] sm:$0xff] }
 0x1b2   : > { %v7619_v61 = vpack.c.bf16 %v2148_v11, %v2142_v24  ;;  %v2456_v35 = vrot.slane %v2455_v9, 4  ;;  %v2067_v42 = vmax.f32 %v9246_v51, %v1961_v60  ;;  %v2066_v38 = vmax.f32 %v9242_v43, %v1850_v37  ;;  %v11584_v11 = vld [vmem:[#allocation74_spill] sm:$0xff]  ;;  %v11591_v4 = vld [vmem:[#allocation81_spill] sm:$0xff] }
 0x1b3   : > { %v9552_v13 = vmax.f32 %v11582_v6, %v2063_v14  ;;  %v9566_v3 = vadd.f32 %v1853_v47, %v8840_v36  ;;  %v11585_v56 = vmax.f32 %v11583_v0, %v11584_v11  ;;  %v2068_v27 = vmax.f32 %v1848_v33, %v1963_v49  ;;  %v1970_v43 = vpop.f32.mrf.mxu1  ;;  %v1859_v40 = vpop.f32.mrf.mxu0  ;;  %5048 = vmatpush1.bf16.msra.mxu0 %v7320_v16  ;;  %v7301_v33 = vld [vmem:[#allocation2 + $0x8] ss:$24 sps:$4 sm:$0xff]   ;;  %v11592_v63 = vld [vmem:[#allocation82_spill] sm:$0xff] }
 0x1b4   : > { %4931 = vmatprep.mubr.bf16.mxu0 %v7619_v61  ;;  %v1967_v51 = vadd.f32 %v1966_v20, %v8844_v52  ;;  %v9578_v32 = vsel %vm9519_vm4, %v2456_v35, %v2460_v1  ;;  %v11587_v28 = vmax.f32 %v8999_v18, %v11586_v23  ;;  %v11590_v14 = vmax.f32 %v11588_v39, %v11589_v58  ;;  %v7298_v18 = vld [vmem:[%s11272_s3 + $0x370] ss:$8 sps:$4 sm:$0xff]   ;;  %v7327_v35 = vld [vmem:[%s11272_s3 + $0x200] ss:$8 sps:$4 sm:$0xff]  }
 0x1b5   : > { %v2159_v24 = vmax.f32 %v9552_v13, 0.0  ;;  %v2113_v44 = vmax.f32 %v11585_v56, %v2065_v29  ;;  %v7620_v47 = vpack.c.bf16 %v2147_v48, %v2141_v57  ;;  %v6528_v20 = vcombine.low %v9538_v15, %v9578_v32  ;;  %v7307_v57 = vld [vmem:[%s11272_s3 + $0x364] ss:$8 sps:$4 sm:$0xff]   ;;  %v1972_v48 = vpop.f32.mrf.mxu1  ;;  %v11594_v49 = vld [vmem:[#allocation30_spill] sm:$0xff]  ;;  %5049 = vmatprep.subr.bf16.mxu0 %v7329_v55  ;;  %v1863_v11 = vpop.f32.mrf.mxu0 }
 0x1b6   : > { %v2115_v31 = vmax.f32 %v11587_v28, %v2067_v42  ;;  %v2114_v8 = vmax.f32 %v11590_v14, %v2066_v38  ;;  %v6529_v1 = vcombine.high %v9538_v15, %v9578_v32  ;;  %v11593_v6 = vmax.f32 %v11591_v4, %v11592_v63  ;;  %v11595_v55 = vld [vmem:[#allocation85_spill] sm:$0xff]  ;;  %v11596_v23 = vld [vmem:[#allocation86_spill] sm:$0xff]  ;;  %v11602_v4 = vld [vmem:[#allocation88_spill] sm:$0xff] }
 0x1b7   : > { %v9601_v9 = vpack.c.bf16 %v2160_v45, %v2159_v24  ;;  %v2161_v17 = vmax.f32 %v2113_v44, 0.0  ;;  %v2070_v61 = vmax.f32 %v11594_v49, %v1967_v51  ;;  %4932 = vmatmul.mubr.bf16.gmra.mxu0 %v7620_v47  ;;  %4994 = vmatprep.mubr.bf16.mxu1 %v6528_v20  ;;  %v1856_v16 = vadd.f32 %v1855_v7, %v8857_v21  ;;  %v1976_v56 = vpop.f32.mrf.mxu1  ;;  %v7335_v44 = vld [vmem:[%s11272_s3 + $0x2f4] ss:$8 sps:$4 sm:$0xff]   ;;  %v9633_v47 = vpop.f32.mrf.mxu0  ;;  %v11603_v63 = vld [vmem:[#allocation89_spill] sm:$0xff] }
 0x1b8   : > { %v2163_v60 = vmax.f32 %v2115_v31, 0.0  ;;  %v2162_v37 = vmax.f32 %v2114_v8, 0.0  ;;  %v2116_v29 = vmax.f32 %v11593_v6, %v2068_v27  ;;  %v1969_v38 = vadd.f32 %v1968_v41, %v8861_v19  ;;  %4995 = vmatmul.mubr.bf16.vlgmr.msra.gmra.mxu1 %v7301_v33  ;;  %v7305_v41 = vld [vmem:[%s11272_s3 + $0x360] ss:$8 sps:$4 sm:$0xff]   ;;  %5050 = vmatpush1.bf16.msra.mxu0 %v7327_v35  ;;  %v7311_v35 = vld [vmem:[%s11272_s3 + $0x350] ss:$8 sps:$4 sm:$0xff]  }
 0x1b9   : > { %2357 = vst [vmem:[#allocation2 + $0x78] sm:$0xff] %v9601_v9  ;;  %v6882_v42 = vpack.c.bf16 %v2161_v17, %v2161_v17  ;;  %v1858_v0 = vadd.f32 %v1857_v50, %v8840_v36  ;;  %v11597_v28 = vmax.f32 %v11595_v55, %v11596_v23  ;;  %v1971_v7 = vadd.f32 %v1970_v43, %v8844_v52  ;;  %v11598_v50 = vld [vmem:[#allocation29_spill] sm:$0xff]  ;;  %v11607_v55 = vld [vmem:[#allocation87_spill] sm:$0xff]  ;;  %v11608_v23 = vld [vmem:[#allocation84_spill] sm:$0xff] }
 0x1ba   : > { %v6883_v27 = vpack.c.bf16 %v2163_v60, %v2162_v37  ;;  %v2164_v51 = vmax.f32 %v2116_v29, 0.0  ;;  %5109 = vmatpush1.bf16.msra.mxu1 %v7298_v18  ;;  %v2069_v39 = vmax.f32 %v11598_v50, %v1856_v16  ;;  %v2071_v58 = vmax.f32 %v9566_v3, %v1969_v38  ;;  %v7313_v18 = vld [vmem:[%s11272_s3 + $0x354] ss:$8 sps:$4 sm:$0xff]   ;;  %v9643_v3 = vpop.f32.mrf.mxu1  ;;  %5051 = vmatprep.subr.bf16.mxu0 %v7335_v44  ;;  %v11611_v50 = vld [vmem:[#allocation28_spill] sm:$0xff]  ;;  %v11629_v13 = vld [vmem:[#allocation25_spill] sm:$0xff] }
 0x1bb   : > { %v9623_v31 = vmax.f32 %v11597_v28, %v2070_v61  ;;  %2358 = vst [vmem:[#allocation2 + $0x80] sm:$0xf] %v6882_v42  ;;  %v1860_v14 = vadd.f32 %v1859_v40, %v8857_v21  ;;  %v1973_v8 = vadd.f32 %v1972_v48, %v8861_v19  ;;  %5110 = vmatprep.subr.bf16.mxu1 %v7307_v57  ;;  %v7333_v57 = vld [vmem:[%s11272_s3 + $0x2f0] ss:$8 sps:$4 sm:$0xff]   ;;  %v11599_v40 = vld [vmem:[#allocation17_spill] sm:$0xff]  ;;  %v2480_v44 = vshll.u32 %v9386_v25, 16 }
 0x1bc   : > { %2359 = vst [vmem:[#allocation2 + $0x84] sm:$0xff] %v6883_v27  ;;  %v6884_v20 = vpack.c.bf16 %v2164_v51, %v2164_v51  ;;  %v2073_v17 = vmax.f32 %v9280_v54, %v1971_v7  ;;  %v9641_v33 = vadd.f32 %v1863_v11, %v8840_v36  ;;  %v11600_v48 = vld [vmem:[#allocation18_spill] sm:$0xff]  ;;  %v11604_v6 = vmax.f32 %v11602_v4, %v11603_v63  ;;  %v7341_v61 = vld [vmem:[%s11272_s3 + $0x2e4] ss:$8 sps:$4 sm:$0xff]   ;;  %v7367_v15 = vld [vmem:[%s11272_s3 + $0x3c0] ss:$8 sps:$4 sm:$0xff]  }
 0x1bd   : > { %v2166_v43 = vmax.f32 %v9623_v31, 0.0  ;;  %v11601_v60 = vmax.f32 %v11599_v40, %v11600_v48  ;;  %v2072_v54 = vmax.f32 %v9264_v62, %v1860_v14  ;;  %v2074_v49 = vmax.f32 %v1858_v0, %v1973_v8  ;;  %v11605_v42 = vld [vmem:[#allocation66_spill] sm:$0xff]  ;;  %v7319_v11 = vld [vmem:[%s11272_s3 + $0x344] ss:$8 sps:$4 sm:$0xff]   ;;  %v9679_v14 = vld [vmem:[#allocation2 + $0x3c] sm:$0x11]  ;;  %v1867_v8 = vpop.f32.mrf.mxu0  ;;  %5052 = vmatpush2.bf16.msra.mxu0 %v7333_v57 }
 0x1be   : > { %v2119_v29 = vmax.f32 %v11604_v6, %v2071_v58  ;;  %2360 = vst [vmem:[#allocation2 + $0x8c] sm:$0xf] %v6884_v20  ;;  %v11606_v16 = vmax.f32 %v9032_v46, %v11605_v42  ;;  %v1977_v62 = vadd.f32 %v1976_v56, %v8844_v52  ;;  %v2477_v0 = vshrl.u32 %v9386_v25, 16  ;;  %5111 = vmatpush1.bf16.msra.mxu1 %v7305_v41  ;;  %v11610_v46 = vld [vmem:[#allocation90_spill] sm:$0xff]  ;;  %v7339_v56 = vld [vmem:[%s11272_s3 + $0x2e0] ss:$8 sps:$4 sm:$0xff]  }
 0x1bf   : > { %v9651_v37 = vmax.f32 %v11601_v60, %v2069_v39  ;;  %v11609_v28 = vmax.f32 %v11607_v55, %v11608_v23  ;;  %v11612_v39 = vmax.f32 %v11610_v46, %v11611_v50  ;;  %5112 = vmatprep.subr.bf16.mxu1 %v7313_v18  ;;  %v11613_v41 = vld [vmem:[#allocation46_spill] sm:$0xff]  ;;  %v2482_v48 = vrot.slane %v2480_v44, 5  ;;  %v1980_v60 = vpop.f32.mrf.mxu1  ;;  %5053 = vmatprep.subr.bf16.mxu0 %v7341_v61  ;;  %v7317_v61 = vld [vmem:[%s11272_s3 + $0x340] ss:$8 sps:$4 sm:$0xff]   ;;  %v1869_v23 = vpop.f32.mrf.mxu0  ;;  %v7344_v31 = vld [vmem:[%s11272_s3 + $0x304] ss:$8 sps:$4 sm:$0xff]  }
 0x1c0   : > { %v2121_v38 = vmax.f32 %v11606_v16, %v2073_v17  ;;  %v2167_v51 = vmax.f32 %v2119_v29, 0.0  ;;  %v2076_v20 = vmax.f32 %v11613_v41, %v1977_v62  ;;  %v9685_v17 = vld [vmem:[#allocation2 + $0x54] sm:$0x11]  ;;  %v2479_v40 = vrot.slane %v2477_v0, 4 }
 0x1c1   : > { %v2165_v27 = vmax.f32 %v9651_v37, 0.0  ;;  %v2120_v7 = vmax.f32 %v11609_v28, %v2072_v54  ;;  %v2122_v58 = vmax.f32 %v11612_v39, %v2074_v49  ;;  %v7347_v18 = vld [vmem:[%s11272_s3 + $0x2d4] ss:$8 sps:$4 sm:$0xff]   ;;  %v2505_v62 = vshrl.u32 %v9442_v12, 16  ;;  %v1982_v39 = vpop.f32.mrf.mxu1  ;;  %5054 = vmatpush2.bf16.msra.mxu0 %v7339_v56  ;;  %v7345_v41 = vld [vmem:[%s11272_s3 + $0x2d0] ss:$8 sps:$4 sm:$0xff]  }
 0x1c2   : > { %v2169_v25 = vmax.f32 %v2121_v38, 0.0  ;;  %v6886_v63 = vpack.c.bf16 %v2167_v51, %v2167_v51  ;;  %v11614_v54 = vld [vmem:[#allocation23_spill] sm:$0xff]  ;;  %v11615_v49 = vld [vmem:[#allocation34_spill] sm:$0xff]  ;;  %v2483_v57 = vor.u32 %v2482_v48, %v2479_v40  ;;  %v2486_v38 = vshll.u32 %v9679_v14, 16  ;;  %5113 = vmatpush1.bf16.msra.mxu1 %v7311_v35  ;;  %5055 = vmatprep.subr.bf16.mxu0 %v7347_v18 }
 0x1c3   : > { %v9691_v4 = vpack.c.bf16 %v2166_v43, %v2165_v27  ;;  %v2168_v6 = vmax.f32 %v2120_v7, 0.0  ;;  %v2170_v29 = vmax.f32 %v2122_v58, 0.0  ;;  %v11616_v42 = vmax.f32 %v11614_v54, %v11615_v49  ;;  %5114 = vmatprep.subr.bf16.mxu1 %v7319_v11  ;;  %v7325_v50 = vld [vmem:[%s11272_s3 + $0x334] ss:$8 sps:$4 sm:$0xff]  }
 0x1c4   : > { %2362 = vst [vmem:[#allocation2 + $0x98] sm:$0xf] %v6886_v63  ;;  %v2508_v51 = vshll.u32 %v9442_v12, 16  ;;  %v2514_v55 = vshll.u32 %v9685_v17, 16  ;;  %v2484_v7 = vrot.slane %v2483_v57, 4  ;;  %v2488_v46 = vrot.slane %v2486_v38, 5 }
 0x1c5   : > { %v9699_v16 = vmax.f32 %v11616_v42, %v2076_v20  ;;  %2361 = vst [vmem:[#allocation2 + $0x90] sm:$0xff] %v9691_v4  ;;  %v6887_v0 = vpack.c.bf16 %v2169_v25, %v2168_v6  ;;  %v6888_v44 = vpack.c.bf16 %v2170_v29, %v2170_v29  ;;  %v2507_v35 = vrot.slane %v2505_v62, 4  ;;  %v7323_v63 = vld [vmem:[%s11272_s3 + $0x330] ss:$8 sps:$4 sm:$0xff]   ;;  %v11620_v42 = vld [vmem:[#allocation21_spill] sm:$0xff]  ;;  %v11621_v57 = vld [vmem:[#allocation24_spill] sm:$0xff]  ;;  %5056 = vmatpush2.bf16.msra.mxu0 %v7345_v41 }
 0x1c6   : > { %v2510_v58 = vrot.slane %v2508_v51, 5  ;;  %v2516_v25 = vrot.slane %v2514_v55, 5  ;;  %v1866_v12 = vadd.f32 %v9633_v47, %v8857_v21  ;;  %v1979_v11 = vadd.f32 %v9643_v3, %v8861_v19  ;;  %v7354_v47 = vld [vmem:[%s11272_s3 + $0x2c4] ss:$8 sps:$4 sm:$0xff]   ;;  %5115 = vmatpush1.bf16.msra.mxu1 %v7317_v61  ;;  %v11617_v6 = vld [vmem:[#allocation35_spill] sm:$0xff]  ;;  %v11623_v61 = vld [vmem:[#allocation22_spill] sm:$0xff] }
 0x1c7   : > { %v2172_v28 = vmax.f32 %v9699_v16, 0.0  ;;  %2363 = vst [vmem:[#allocation2 + $0x9c] sm:$0xff] %v6887_v0  ;;  %2364 = vst [vmem:[#allocation2 + $0xa4] sm:$0xf] %v6888_v44  ;;  %v9722_v20 = vsel %vm9519_vm4, %v2484_v7, %v2488_v46  ;;  %v1868_v56 = vadd.f32 %v1867_v8, %v8840_v36  ;;  %v1981_v40 = vadd.f32 %v1980_v60, %v8844_v52  ;;  %v11618_v52 = vld [vmem:[#allocation57_spill] sm:$0xff]  ;;  %v11619_v60 = vld [vmem:[#allocation58_spill] sm:$0xff] }
 0x1c8   : > { %v1870_v48 = vadd.f32 %v1869_v23, %v8857_v21  ;;  %v2511_v3 = vor.u32 %v2510_v58, %v2507_v35  ;;  %v2075_v29 = vmax.f32 %v11617_v6, %v1866_v12  ;;  %v2077_v18 = vmax.f32 %v9641_v33, %v1979_v11  ;;  %5116 = vmatprep.subr.bf16.mxu1 %v7325_v50  ;;  %v7332_v21 = vld [vmem:[%s11272_s3 + $0x324] ss:$8 sps:$4 sm:$0xff]   ;;  %v11624_v0 = vld [vmem:[#allocation43_spill] sm:$0xff]  ;;  %v11632_v11 = vld [vmem:[#allocation26_spill] sm:$0xff] }
 0x1c9   : > { %v1983_v36 = vadd.f32 %v1982_v39, %v8861_v19  ;;  %v2079_v8 = vmax.f32 %v11618_v52, %v1981_v40  ;;  %v7621_v49 = vpack.c.bf16 %v2160_v45, %v2154_v5  ;;  %v7622_v33 = vpack.c.bf16 %v2159_v24, %v2153_v34  ;;  %v11626_v5 = vld [vmem:[#allocation20_spill] sm:$0xff]  ;;  %v11630_v24 = vld [vmem:[#allocation27_spill] sm:$0xff]  ;;  %5057 = vmatprep.subr.bf16.mxu0 %v7354_v47  ;;  %v11633_v41 = vld [vmem:[#allocation54_spill] sm:$0xff] }
 0x1ca   : > { %v2078_v54 = vmax.f32 %v11619_v60, %v1870_v48  ;;  %v2512_v19 = vrot.slane %v2511_v3, 4  ;;  %v11622_v38 = vmax.f32 %v11620_v42, %v11621_v57  ;;  %v11625_v44 = vmax.f32 %v11623_v61, %v11624_v0  ;;  %v7330_v34 = vld [vmem:[%s11272_s3 + $0x320] ss:$8 sps:$4 sm:$0xff]   ;;  %v7360_v50 = vld [vmem:[%s11272_s3 + $0x2b4] ss:$8 sps:$4 sm:$0xff]   ;;  %5117 = vmatpush1.bf16.msra.mxu1 %v7323_v63  ;;  %5058 = vmatpush2.bf16.msra.mxu0 %v7352_v53 }
 0x1cb   : > { %v2080_v55 = vmax.f32 %v1868_v56, %v1983_v36  ;;  %v11628_v30 = vmax.f32 %v11626_v5, %v11627_v10  ;;  %v11631_v23 = vmax.f32 %v11629_v13, %v11630_v24  ;;  %4941 = vmatprep.mubr.bf16.mxu0 %v7621_v49  ;;  %v2533_v46 = vshrl.u32 %v9504_v2, 16  ;;  %v9782_v48 = vld [vmem:[#allocation2 + $0x6c] sm:$0x11]  ;;  %5118 = vmatprep.subr.bf16.mxu1 %v7332_v21  ;;  %v9788_v6 = vld [vmem:[#allocation2 + $0x84] sm:$0x11] }
 0x1cc   : > { %v2123_v62 = vmax.f32 %v11622_v38, %v2075_v29  ;;  %v2125_v51 = vmax.f32 %v11625_v44, %v2077_v18  ;;  %v2536_v35 = vshll.u32 %v9504_v2, 16  ;;  %v9774_v39 = vsel %vm9519_vm4, %v2512_v19, %v2516_v25  ;;  %4942 = vmatmul.mubr.bf16.gmra.mxu0 %v7622_v33  ;;  %v7338_v2 = vld [vmem:[%s11272_s3 + $0x314] ss:$8 sps:$4 sm:$0xff]   ;;  %v7358_v29 = vld [vmem:[%s11272_s3 + $0x2b0] ss:$8 sps:$4 sm:$0xff]   ;;  %5059 = vmatprep.subr.bf16.mxu0 %v7360_v50 }
 0x1cd   : > { %v2127_v45 = vmax.f32 %v11628_v30, %v2079_v8  ;;  %v2126_v7 = vmax.f32 %v11631_v23, %v2078_v54  ;;  %v11634_v56 = vmax.f32 %v11632_v11, %v11633_v41  ;;  %v6531_v47 = vcombine.low %v9722_v20, %v9774_v39  ;;  %v7326_v18 = vld [vmem:[#allocation2 + $0x38] ss:$24 sps:$4 sm:$0xff]   ;;  %v7366_v21 = vld [vmem:[%s11272_s3 + $0x2a4] ss:$8 sps:$4 sm:$0xff]   ;;  %v2386_v42 = vld [vmem:[#allocation2 + $0x8] sm:$0xf] }
 0x1ce   : > { %v2171_v58 = vmax.f32 %v2123_v62, 0.0  ;;  %v2173_v12 = vmax.f32 %v2125_v51, 0.0  ;;  %v6532_v25 = vcombine.high %v9722_v20, %v9774_v39  ;;  %v2535_v60 = vrot.slane %v2533_v46, 4  ;;  %v9809_v0 = vld [vmem:[#allocation2 + $0x14] sm:$0x1]  ;;  %5119 = vmatpush1.bf16.msra.mxu1 %v7330_v34  ;;  %5060 = vmatpush2.bf16.msra.mxu0 %v7358_v29 }
 0x1cf   : > { %v2128_v40 = vmax.f32 %v11634_v56, %v2080_v55  ;;  %v2175_v3 = vmax.f32 %v2127_v45, 0.0  ;;  %v2174_v63 = vmax.f32 %v2126_v7, 0.0  ;;  %5004 = vmatprep.mubr.bf16.mxu1 %v6531_v47  ;;  %v2538_v49 = vrot.slane %v2536_v35, 5  ;;  %v2390_v44 = vld [vmem:[#allocation2 + $0x20] sm:$0xf]  ;;  %5120 = vmatprep.subr.bf16.mxu1 %v7338_v2 }
 0x1d0   : > { %v9795_v36 = vpack.c.bf16 %v2172_v28, %v2171_v58  ;;  %v6890_v52 = vpack.c.bf16 %v2173_v12, %v2173_v12  ;;  %v2542_v33 = vshll.u32 %v9782_v48, 16  ;;  %v2561_v19 = vshrl.u32 %v9601_v9, 16  ;;  %5005 = vmatmul.mubr.bf16.gmra.mxu1 %v7326_v18  ;;  %v7336_v51 = vld [vmem:[%s11272_s3 + $0x310] ss:$8 sps:$4 sm:$0xff]   ;;  %v9816_v10 = vld [vmem:[#allocation2 + $0x2c] sm:$0x1]  ;;  %5061 = vmatprep.subr.bf16.mxu0 %v7366_v21 }
 0x1d1   : > { %v2176_v8 = vmax.f32 %v2128_v40, 0.0  ;;  %v6891_v54 = vpack.c.bf16 %v2175_v3, %v2174_v63  ;;  %v2564_v38 = vshll.u32 %v9601_v9, 16  ;;  %v2570_v62 = vshll.u32 %v9788_v6, 16  ;;  %v7342_v45 = vld [vmem:[%s11272_s3 + $0x300] ss:$8 sps:$4 sm:$0xff]  }
 0x1d2   : > { %2365 = vst [vmem:[#allocation2 + $0xa8] sm:$0xff] %v9795_v36  ;;  %2366 = vst [vmem:[#allocation2 + $0xb0] sm:$0xf] %v6890_v52  ;;  %v7623_v61 = vpack.c.bf16 %v2172_v28, %v2166_v43  ;;  %v2539_v55 = vor.u32 %v2538_v49, %v2535_v60  ;;  %v2544_v53 = vrot.slane %v2542_v33, 5  ;;  %v2563_v5 = vrot.slane %v2561_v19, 4  ;;  %5121 = vmatpush1.bf16.msra.mxu1 %v7336_v51 }
 0x1d3   : > { %v6892_v57 = vpack.c.bf16 %v2176_v8, %v2176_v8  ;;  %2367 = vst [vmem:[#allocation2 + $0xb4] sm:$0xff] %v6891_v54  ;;  %v7624_v9 = vpack.c.bf16 %v2171_v58, %v2165_v27  ;;  %v2566_v43 = vrot.slane %v2564_v38, 5  ;;  %v2572_v16 = vrot.slane %v2570_v62, 5  ;;  %v7364_v24 = vld [vmem:[%s11272_s3 + $0x2a0] ss:$8 sps:$4 sm:$0xff]   ;;  %5122 = vmatprep.subr.bf16.mxu1 %v7344_v31 }
 0x1d4   : > { %4951 = vmatprep.mubr.bf16.mxu0 %v7623_v61  ;;  %v2435_v28 = vshrl.u32 %v2386_v42, 16  ;;  %v2438_v30 = vshll.u32 %v2386_v42, 16  ;;  %v2540_v37 = vrot.slane %v2539_v55, 4  ;;  %v2444_v27 = vshll.u32 %v9809_v0, 16  ;;  %v7372_v50 = vld [vmem:[%s11272_s3 + $0x294] ss:$8 sps:$4 sm:$0xff]   ;;  %5062 = vmatpush2.bf16.msra.mxu0 %v7364_v24 }
 0x1d5   : > { %2368 = vst [vmem:[#allocation2 + $0xbc] sm:$0xf] %v6892_v57  ;;  %v2463_v34 = vshrl.u32 %v2390_v44, 16  ;;  %v2466_v13 = vshll.u32 %v2390_v44, 16  ;;  %v2567_v23 = vor.u32 %v2566_v43, %v2563_v5  ;;  %4952 = vmatmul.mubr.bf16.gmra.mxu0 %v7624_v9  ;;  %v2472_v35 = vshll.u32 %v9816_v10, 16  ;;  %5063 = vmatprep.subr.bf16.mxu0 %v7372_v50 }
 0x1d6   : > { %v2437_v7 = vrot.slane %v2435_v28, 4  ;;  %v2440_v46 = vrot.slane %v2438_v30, 5  ;;  %v7350_v58 = vld [vmem:[%s11272_s3 + $0x3f4] ss:$8 sps:$4 sm:$0xff]   ;;  %v9839_v56 = vsel %vm9519_vm4, %v2540_v37, %v2544_v53  ;;  %v2446_v47 = vrot.slane %v2444_v27, 5  ;;  %5123 = vmatpush1.bf16.msra.mxu1 %v7342_v45 }
 0x1d7   : > { %v2465_v12 = vrot.slane %v2463_v34, 4  ;;  %v2468_v11 = vrot.slane %v2466_v13, 5  ;;  %v9835_v41 = vld [vmem:[#allocation2 + $0x9c] sm:$0x11]  ;;  %v2568_v40 = vrot.slane %v2567_v23, 4  ;;  %v2474_v52 = vrot.slane %v2472_v35, 5  ;;  %5124 = vmatprep.subr.bf16.mxu1 %v7350_v58 }
 0x1d8   : > { %v2441_v2 = vor.u32 %v2440_v46, %v2437_v7  ;;  %v7370_v3 = vld [vmem:[%s11272_s3 + $0x290] ss:$8 sps:$4 sm:$0xff]   ;;  %v7379_v63 = vld [vmem:[%s11272_s3 + $0x284] ss:$8 sps:$4 sm:$0xff]   ;;  %v2589_v8 = vshrl.u32 %v9691_v4, 16  ;;  %v2592_v60 = vshll.u32 %v9691_v4, 16 }
 0x1d9   : > { %v7348_v29 = vld [vmem:[%s11272_s3 + $0x3f0] ss:$8 sps:$4 sm:$0xff]   ;;  %v2469_v18 = vor.u32 %v2468_v11, %v2465_v12  ;;  %v9854_v21 = vsel %vm9519_vm4, %v2568_v40, %v2572_v16  ;;  %v7357_v54 = vld [vmem:[%s11272_s3 + $0x3e4] ss:$8 sps:$4 sm:$0xff]   ;;  %v2598_v19 = vshll.u32 %v9835_v41, 16  ;;  %v2617_v42 = vshrl.u32 %v9795_v36, 16  ;;  %5064 = vmatpush2.bf16.msra.mxu0 %v7370_v3 }
 0x1da   : > { %v2442_v49 = vrot.slane %v2441_v2, 4  ;;  %v9859_v33 = vld [vmem:[#allocation2 + $0xb4] sm:$0x11]  ;;  %v6534_v4 = vcombine.low %v9839_v56, %v9854_v21  ;;  %v6535_v57 = vcombine.high %v9839_v56, %v9854_v21  ;;  %v2591_v62 = vrot.slane %v2589_v8, 4  ;;  %v9867_v61 = vld [vmem:[#allocation2] sm:$0xee]  ;;  %5065 = vmatprep.subr.bf16.mxu0 %v7379_v63  ;;  %5125 = vmatpush2.bf16.msra.mxu1 %v7348_v29 }
 0x1db   : > { %v2470_v38 = vrot.slane %v2469_v18, 4  ;;  %v9869_v44 = vld [vmem:[#allocation2 + $0x18] sm:$0xee]  ;;  %v7377_v51 = vld [vmem:[%s11272_s3 + $0x280] ss:$8 sps:$4 sm:$0xff]   ;;  %v2594_v5 = vrot.slane %v2592_v60, 5  ;;  %5126 = vmatprep.subr.bf16.mxu1 %v7357_v54 }
 0x1dc   : > { %v7351_v55 = vld [vmem:[#allocation2 + $0x68] ss:$24 sps:$4 sm:$0xff]   ;;  %v2447_v53 = vsel %vm9519_vm4, %v2442_v49, %v2446_v47  ;;  %v2394_v9 = vld [vmem:[#allocation2 + $0x38] sm:$0xf]  ;;  %5014 = vmatprep.mubr.bf16.mxu1 %v6534_v4  ;;  %v2619_v16 = vrot.slane %v2617_v42, 4  ;;  %v2620_v28 = vshll.u32 %v9795_v36, 16 }
 0x1dd   : > { %v7355_v31 = vld [vmem:[%s11272_s3 + $0x3e0] ss:$8 sps:$4 sm:$0xff]   ;;  %v2475_v43 = vsel %vm9519_vm4, %v2470_v38, %v2474_v52  ;;  %v2626_v30 = vshll.u32 %v9859_v33, 16  ;;  %v9883_v45 = vld [vmem:[#allocation2 + $0x44] sm:$0x1]  ;;  %5015 = vmatmul.mubr.bf16.gmra.mxu1 %v7351_v55  ;;  %v2595_v27 = vor.u32 %v2594_v5, %v2591_v62  ;;  %v2697_v34 = vrot.slane %v9484_v22, 5  ;;  %5066 = vmatpush2.bf16.msra.mxu0 %v7377_v51 }
 0x1de   : > { %v6530_v37 = vcombine.low %v2447_v53, %v2475_v43  ;;  %v7385_v13 = vld [vmem:[%s11272_s3 + $0x474] ss:$8 sps:$4 sm:$0xff]   ;;  %v2398_v24 = vld [vmem:[#allocation2 + $0x50] sm:$0xf]  ;;  %v2600_v23 = vrot.slane %v2598_v19, 5  ;;  %v2622_v7 = vrot.slane %v2620_v28, 5  ;;  %5127 = vmatpush2.bf16.msra.mxu1 %v7355_v31 }
 0x1df   : > { %v7363_v36 = vld [vmem:[%s11272_s3 + $0x3d4] ss:$8 sps:$4 sm:$0xff]   ;;  %v2705_v22 = vrot.slane %v9495_v59, 5  ;;  %v2491_v35 = vshrl.u32 %v2394_v9, 16  ;;  %v6484_v50 = vrot.slane %v9867_v61, 9  ;;  %v6486_v58 = vrot.slane %v9869_v44, 9  ;;  %5181 = vmatprep.subr.bf16.mxu0 %v7385_v13 }
 0x1e0   : > { %5067 = vmatprep.mubr.bf16.mxu0 %v6530_v37  ;;  %v7383_v12 = vld [vmem:[%s11272_s3 + $0x470] ss:$8 sps:$4 sm:$0xff]   ;;  %v2494_v11 = vshll.u32 %v2394_v9, 16  ;;  %v2500_v40 = vshll.u32 %v9883_v45, 16  ;;  %v2623_v47 = vor.u32 %v2622_v7, %v2619_v16  ;;  %v2628_v59 = vrot.slane %v2626_v30, 5  ;;  %5128 = vmatprep.subr.bf16.mxu1 %v7363_v36 }
 0x1e1   : > { %v7361_v2 = vld [vmem:[%s11272_s3 + $0x3d0] ss:$8 sps:$4 sm:$0xff]   ;;  %v9908_v3 = vld [vmem:[#allocation2 + $0x5c] sm:$0x1]  ;;  %v2493_v63 = vrot.slane %v2491_v35, 4  ;;  %v2519_v29 = vshrl.u32 %v2398_v24, 16  ;;  %v9915_v8 = vsel %vm9894_vm7, %v6484_v50, %v2697_v34  ;;  %v9922_v42 = vsel %vm9894_vm7, %v6486_v58, %v2705_v22  ;;  %5068 = vmatmul.mubr.bf16.vlgmr.msra.gmra.mxu0 %v6529_v1 }
 0x1e2   : > { %v7369_v18 = vld [vmem:[%s11272_s3 + $0x3c4] ss:$8 sps:$4 sm:$0xff]   ;;  %v2596_v52 = vrot.slane %v2595_v27, 4  ;;  %v2496_v60 = vrot.slane %v2494_v11, 5  ;;  %v2402_v49 = vld [vmem:[#allocation2 + $0x68] sm:$0xf]  ;;  %5182 = vmatpush1.bf16.msra.mxu0 %v7383_v12  ;;  %5129 = vmatpush2.bf16.msra.mxu1 %v7361_v2  ;;  %v6541_v50 = vcombine.high %v9915_v8, %v9922_v42 }
 0x1e3   : > { %v7391_v54 = vld [vmem:[%s11272_s3 + $0x464] ss:$8 sps:$4 sm:$0xff]   ;;  %v2624_v19 = vrot.slane %v2623_v47, 4  ;;  %v2521_v4 = vrot.slane %v2519_v29, 4  ;;  %v2522_v38 = vshll.u32 %v2398_v24, 16  ;;  %v2502_v53 = vrot.slane %v2500_v40, 5  ;;  %5130 = vmatprep.subr.bf16.mxu1 %v7369_v18 }
 0x1e4   : > { %v7389_v62 = vld [vmem:[%s11272_s3 + $0x460] ss:$8 sps:$4 sm:$0xff]   ;;  %v9929_v51 = vsel %vm9519_vm4, %v2596_v52, %v2600_v23  ;;  %v2497_v55 = vor.u32 %v2496_v60, %v2493_v63  ;;  %v2528_v5 = vshll.u32 %v9908_v3, 16  ;;  %v9935_v9 = vld [vmem:[#allocation2 + $0x74] sm:$0x1]  ;;  %v2547_v30 = vshrl.u32 %v2402_v49, 16  ;;  %5183 = vmatprep.subr.bf16.mxu0 %v7391_v54 }
 0x1e5   : > { %v2406_v31 = vld [vmem:[#allocation2 + $0x80] sm:$0xf]  ;;  %v9939_v43 = vsel %vm9519_vm4, %v2624_v19, %v2628_v59  ;;  %v2524_v16 = vrot.slane %v2522_v38, 5  ;;  %v9941_v28 = vld [vmem:[#allocation2 + $0x8c] sm:$0x1]  ;;  %v2550_v37 = vshll.u32 %v2402_v49, 16 }
 0x1e6   : > { %v6537_v32 = vcombine.low %v9929_v51, %v9939_v43  ;;  %v6538_v1 = vcombine.high %v9929_v51, %v9939_v43  ;;  %v2498_v27 = vrot.slane %v2497_v55, 4  ;;  %v2530_v34 = vrot.slane %v2528_v5, 5  ;;  %v7397_v13 = vld [vmem:[%s11272_s3 + $0x454] ss:$8 sps:$4 sm:$0xff]   ;;  %v7376_v24 = vld [vmem:[#allocation2 + $0x98] ss:$24 sps:$4 sm:$0xff]   ;;  %5184 = vmatpush1.bf16.msra.mxu0 %v7389_v62  ;;  %5131 = vmatpush2.bf16.msra.mxu1 %v7367_v15 }
 0x1e7   : > { %v2525_v36 = vor.u32 %v2524_v16, %v2521_v4  ;;  %v2549_v23 = vrot.slane %v2547_v30, 4  ;;  %v2552_v7 = vrot.slane %v2550_v37, 5  ;;  %v2556_v22 = vshll.u32 %v9935_v9, 16  ;;  %v7375_v35 = vld [vmem:[%s11272_s3 + $0x3b4] ss:$8 sps:$4 sm:$0xff]   ;;  %5185 = vmatprep.subr.bf16.mxu0 %v7397_v13 }
 0x1e8   : > { %5024 = vmatprep.mubr.bf16.mxu1 %v6537_v32  ;;  %v2575_v58 = vshrl.u32 %v2406_v31, 16  ;;  %v2578_v12 = vshll.u32 %v2406_v31, 16  ;;  %v2584_v11 = vshll.u32 %v9941_v28, 16  ;;  %v7373_v40 = vld [vmem:[%s11272_s3 + $0x3b0] ss:$8 sps:$4 sm:$0xff]   ;;  %v2503_v60 = vsel %vm9519_vm4, %v2498_v27, %v2502_v53  ;;  %5132 = vmatprep.subr.bf16.mxu1 %v7375_v35 }
 0x1e9   : > { %5025 = vmatmul.mubr.bf16.gmra.mxu1 %v7376_v24  ;;  %v2526_v2 = vrot.slane %v2525_v36, 4  ;;  %v7395_v47 = vld [vmem:[%s11272_s3 + $0x450] ss:$8 sps:$4 sm:$0xff]   ;;  %v2553_v59 = vor.u32 %v2552_v7, %v2549_v23  ;;  %v7403_v18 = vld [vmem:[%s11272_s3 + $0x444] ss:$8 sps:$4 sm:$0xff]   ;;  %v2558_v49 = vrot.slane %v2556_v22, 5 }
 0x1ea   : > { %5140 = vmatprep.mubr.bf16.mxu1 %v6541_v50  ;;  %v2577_v63 = vrot.slane %v2575_v58, 4  ;;  %v2580_v29 = vrot.slane %v2578_v12, 5  ;;  %v2410_v52 = vld [vmem:[#allocation2 + $0x98] sm:$0xf]  ;;  %v9973_v19 = vld [vmem:[#allocation2 + $0xa4] sm:$0x1]  ;;  %5186 = vmatpush1.bf16.msra.mxu0 %v7395_v47 }
 0x1eb   : > { %v2531_v54 = vsel %vm9519_vm4, %v2526_v2, %v2530_v34  ;;  %v2414_v4 = vld [vmem:[#allocation2 + $0xb0] sm:$0xf]  ;;  %v7382_v38 = vld [vmem:[%s11272_s3 + $0x3a4] ss:$8 sps:$4 sm:$0xff]   ;;  %v2554_v55 = vrot.slane %v2553_v59, 4  ;;  %v2586_v31 = vrot.slane %v2584_v11, 5  ;;  %5187 = vmatprep.subr.bf16.mxu0 %v7403_v18  ;;  %5133 = vmatpush2.bf16.msra.mxu1 %v7373_v40 }
 0x1ec   : > { %v6533_v62 = vcombine.low %v2503_v60, %v2531_v54  ;;  %v2581_v5 = vor.u32 %v2580_v29, %v2577_v63  ;;  %v7401_v53 = vld [vmem:[%s11272_s3 + $0x440] ss:$8 sps:$4 sm:$0xff]   ;;  %v7409_v16 = vld [vmem:[%s11272_s3 + $0x434] ss:$8 sps:$4 sm:$0xff]   ;;  %v2603_v30 = vshrl.u32 %v2410_v52, 16  ;;  %v2606_v37 = vshll.u32 %v2410_v52, 16  ;;  %5134 = vmatprep.subr.bf16.mxu1 %v7382_v38 }
 0x1ed   : > { %v9984_v32 = vld [vmem:[#allocation2 + $0xbc] sm:$0x1]  ;;  %v2612_v27 = vshll.u32 %v9973_v19, 16  ;;  %v2631_v34 = vshrl.u32 %v2414_v4, 16  ;;  %v7380_v13 = vld [vmem:[%s11272_s3 + $0x3a0] ss:$8 sps:$4 sm:$0xff]   ;;  %v2559_v7 = vsel %vm9519_vm4, %v2554_v55, %v2558_v49 }
 0x1ee   : > { %5077 = vmatprep.mubr.bf16.mxu0 %v6533_v62  ;;  %v2582_v15 = vrot.slane %v2581_v5, 4  ;;  %v2605_v24 = vrot.slane %v2603_v30, 4  ;;  %v2608_v36 = vrot.slane %v2606_v37, 5  ;;  %v7388_v23 = vld [vmem:[%s11272_s3 + $0x394] ss:$8 sps:$4 sm:$0xff]   ;;  %v2634_v50 = vshll.u32 %v2414_v4, 16  ;;  %5188 = vmatpush1.bf16.msra.mxu0 %v7401_v53 }
 0x1ef   : > { %5078 = vmatmul.mubr.bf16.gmra.mxu0 %v6532_v25  ;;  %v2633_v35 = vrot.slane %v2631_v34, 4  ;;  %v7386_v20 = vld [vmem:[%s11272_s3 + $0x390] ss:$8 sps:$4 sm:$0xff]   ;;  %v2640_v12 = vshll.u32 %v9984_v32, 16  ;;  %v7394_v11 = vld [vmem:[%s11272_s3 + $0x384] ss:$8 sps:$4 sm:$0xff]   ;;  %5189 = vmatprep.subr.bf16.mxu0 %v7409_v16 }
 0x1f0   : > { %v2587_v22 = vsel %vm9519_vm4, %v2582_v15, %v2586_v31  ;;  %v7407_v25 = vld [vmem:[%s11272_s3 + $0x430] ss:$8 sps:$4 sm:$0xff]   ;;  %v2609_v58 = vor.u32 %v2608_v36, %v2605_v24  ;;  %v2614_v40 = vrot.slane %v2612_v27, 5  ;;  %v2636_v2 = vrot.slane %v2634_v50, 5  ;;  %v7415_v47 = vld [vmem:[%s11272_s3 + $0x424] ss:$8 sps:$4 sm:$0xff]   ;;  %5135 = vmatpush2.bf16.msra.mxu1 %v7380_v13 }
 0x1f1   : > { %v6536_v39 = vcombine.low %v2559_v7, %v2587_v22  ;;  %v10013_v59 = vld [vmem:[#allocation2 + $0xc] sm:$0x33]  ;;  %v7413_v18 = vld [vmem:[%s11272_s3 + $0x420] ss:$8 sps:$4 sm:$0xff]   ;;  %5136 = vmatprep.subr.bf16.mxu1 %v7388_v23  ;;  %v2642_v60 = vrot.slane %v2640_v12, 5  ;;  %v2779_v49 = vshrl.u32 %v9867_v61, 16 }
 0x1f2   : > { %v10015_v63 = vld [vmem:[#allocation2 + $0x48] sm:$0xee]  ;;  %v2610_v29 = vrot.slane %v2609_v58, 4  ;;  %v2637_v52 = vor.u32 %v2636_v2, %v2633_v35  ;;  %v7421_v54 = vld [vmem:[%s11272_s3 + $0x414] ss:$8 sps:$4 sm:$0xff]   ;;  %v2782_v4 = vshll.u32 %v9867_v61, 16  ;;  %5190 = vmatpush1.bf16.msra.mxu0 %v7407_v25  ;;  %v6540_v25 = vcombine.low %v9915_v8, %v9922_v42 }
 0x1f3   : > { %5087 = vmatprep.mubr.bf16.mxu0 %v6536_v39  ;;  %v2713_v38 = vrot.slane %v9679_v14, 5  ;;  %v2721_v62 = vrot.slane %v9685_v17, 5  ;;  %v10027_v55 = vld [vmem:[#allocation2 + $0x24] sm:$0x33]  ;;  %v2788_v5 = vshrl.u32 %v10013_v59, 16  ;;  %v2791_v31 = vshll.u32 %v10013_v59, 16  ;;  %5191 = vmatprep.subr.bf16.mxu0 %v7415_v47 }
 0x1f4   : > { %v10031_v53 = vld [vmem:[#allocation2 + $0x30] sm:$0xee]  ;;  %v6490_v16 = vrot.slane %v10015_v63, 9  ;;  %v2615_v30 = vsel %vm9519_vm4, %v2610_v29, %v2614_v40  ;;  %v2638_v37 = vrot.slane %v2637_v52, 4  ;;  %v2781_v61 = vrot.slane %v2779_v49, 5  ;;  %5137 = vmatpush2.bf16.msra.mxu1 %v7386_v20 }
 0x1f5   : > { %v7392_v14 = vld [vmem:[%s11272_s3 + $0x380] ss:$8 sps:$4 sm:$0xff]   ;;  %v2784_v17 = vrot.slane %v2782_v4, 6  ;;  %v2790_v15 = vrot.slane %v2788_v5, 5  ;;  %v2793_v27 = vrot.slane %v2791_v31, 6  ;;  %v2815_v34 = vshrl.u32 %v9869_v44, 16  ;;  %5138 = vmatprep.subr.bf16.mxu1 %v7394_v11 }
 0x1f6   : > { %v7400_v13 = vld [vmem:[%s11272_s3 + $0x574] ss:$8 sps:$4 sm:$0xff]   ;;  %v2643_v24 = vsel %vm9519_vm4, %v2638_v37, %v2642_v60  ;;  %v2818_v36 = vshll.u32 %v9869_v44, 16  ;;  %v2824_v23 = vshrl.u32 %v10027_v55, 16  ;;  %v2827_v56 = vshll.u32 %v10027_v55, 16  ;;  %5192 = vmatpush1.bf16.msra.mxu0 %v7413_v18 }
 0x1f7   : > { %5088 = vmatmul.mubr.bf16.gmra.mxu0 %v6535_v57  ;;  %v6488_v21 = vrot.slane %v10031_v53, 9  ;;  %v10054_v57 = vsel %vm9894_vm7, %v6490_v16, %v2721_v62  ;;  %v6539_v7 = vcombine.low %v2615_v30, %v2643_v24  ;;  %v7419_v22 = vld [vmem:[%s11272_s3 + $0x410] ss:$8 sps:$4 sm:$0xff]   ;;  %v2817_v26 = vrot.slane %v2815_v34, 5  ;;  %5193 = vmatprep.subr.bf16.mxu0 %v7421_v54  ;;  %v7427_v39 = vld [vmem:[%s11272_s3 + $0x404] ss:$8 sps:$4 sm:$0xff]  }
 0x1f8   : > { %v2785_v35 = vor.u32 %v2784_v17, %v2781_v61  ;;  %v2820_v44 = vrot.slane %v2818_v36, 6  ;;  %v2826_v50 = vrot.slane %v2824_v23, 5  ;;  %v2829_v20 = vrot.slane %v2827_v56, 6  ;;  %5139 = vmatpush2.bf16.msra.mxu1 %v7392_v14  ;;  %v7398_v58 = vld [vmem:[%s11272_s3 + $0x570] ss:$8 sps:$4 sm:$0xff]  }
 0x1f9   : > { %5097 = vmatprep.mubr.bf16.mxu0 %v6539_v7  ;;  %5254 = vmatprep.subr.bf16.mxu1 %v7400_v13  ;;  %v2714_v12 = vsel %vm9894_vm7, %v6488_v21, %v2713_v38  ;;  %v7406_v11 = vld [vmem:[%s11272_s3 + $0x564] ss:$8 sps:$4 sm:$0xff]   ;;  %v2794_v8 = vor.u32 %v2793_v27, %v2790_v15  ;;  %v7404_v29 = vld [vmem:[%s11272_s3 + $0x560] ss:$8 sps:$4 sm:$0xff]   ;;  %v10082_v18 = vld [vmem:[#allocation2 + $0x78] sm:$0xee] }
 0x1fa   : > { %v2821_v42 = vor.u32 %v2820_v44, %v2817_v26  ;;  %v2830_v2 = vor.u32 %v2829_v20, %v2826_v50  ;;  %v6544_v47 = vcombine.high %v2714_v12, %v10054_v57  ;;  %5194 = vmatpush1.bf16.msra.mxu0 %v7419_v22  ;;  %v7425_v52 = vld [vmem:[%s11272_s3 + $0x400] ss:$8 sps:$4 sm:$0xff]   ;;  %v7433_v60 = vld [vmem:[%s11272_s3 + $0x4f4] ss:$8 sps:$4 sm:$0xff]   ;;  %v2737_v49 = vrot.slane %v9788_v6, 5 }
 0x1fb   : > { %5141 = vmatmul.mubr.bf16.vlgmr.msra.gmra.mxu1 %v6540_v25  ;;  %v10090_v54 = vld [vmem:[#allocation2 + $0x60] sm:$0xee]  ;;  %v2786_v4 = vrot.slane %v2785_v35, 4  ;;  %5195 = vmatprep.subr.bf16.mxu0 %v7427_v39  ;;  %v2701_v62 = vrot.slane %v9809_v0, 5  ;;  %v2729_v5 = vrot.slane %v9782_v48, 5  ;;  %v2709_v30 = vrot.slane %v9816_v10, 5 }
 0x1fc   : > { %v2822_v38 = vrot.slane %v2821_v42, 4  ;;  %5150 = vmatprep.mubr.bf16.mxu1 %v6544_v47  ;;  %5255 = vmatpush1.bf16.msra.mxu1 %v7398_v58  ;;  %v10095_v31 = vld [vmem:[#allocation2 + $0x8] sm:$0xe]  ;;  %v2647_v16 = vld [vmem:[#allocation2 + $0x20] sm:$0xe]  ;;  %v6494_v6 = vrot.slane %v10082_v18, 9  ;;  %v6543_v15 = vcombine.low %v2714_v12, %v10054_v57 }
 0x1fd   : > { %5256 = vmatprep.subr.bf16.mxu1 %v7406_v11  ;;  %v7412_v37 = vld [vmem:[%s11272_s3 + $0x554] ss:$8 sps:$4 sm:$0xff]   ;;  %v10107_v0 = vsel %vm10074_vm10, %v2786_v4, %v2794_v8  ;;  %v6492_v10 = vrot.slane %v10090_v54, 9  ;;  %v7431_v14 = vld [vmem:[%s11272_s3 + $0x4f0] ss:$8 sps:$4 sm:$0xff]   ;;  %v6485_v43 = vrot.slane %v10095_v31, 9 }
 0x1fe   : > { %v10111_v48 = vsel %vm10074_vm10, %v2822_v38, %v2830_v2  ;;  %5196 = vmatpush1.bf16.msra.mxu0 %v7425_v52  ;;  %v10121_v51 = vsel %vm9894_vm7, %v6494_v6, %v2737_v49  ;;  %v7439_v17 = vld [vmem:[%s11272_s3 + $0x4e4] ss:$8 sps:$4 sm:$0xff]   ;;  %v7410_v27 = vld [vmem:[%s11272_s3 + $0x550] ss:$8 sps:$4 sm:$0xff]   ;;  %v2833_v23 = vshrl.u32 %v2647_v16, 16  ;;  %v2836_v56 = vshll.u32 %v2647_v16, 16 }
 0x1ff   : > { %5098 = vmatmul.mubr.bf16.gmra.mxu0 %v6538_v1  ;;  %v6552_v61 = vcombine.low %v10107_v0, %v10111_v48  ;;  %5197 = vmatprep.subr.bf16.mxu0 %v7433_v60  ;;  %v6487_v1 = vrot.slane %v2647_v16, 9  ;;  %v10133_v34 = vsel %vm9894_vm7, %v6492_v10, %v2729_v5  ;;  %v7418_v13 = vld [vmem:[%s11272_s3 + $0x544] ss:$8 sps:$4 sm:$0xff]   ;;  %v7437_v21 = vld [vmem:[%s11272_s3 + $0x4e0] ss:$8 sps:$4 sm:$0xff]   ;;  %v10147_v57 = vsel %vm9894_vm7, %v6485_v43, %v2701_v62 }
 0x200   : > { %5257 = vmatpush1.bf16.msra.mxu1 %v7404_v29  ;;  %v10138_v24 = vld [vmem:[#allocation2 + $0x2c] sm:$0x3]  ;;  %v6547_v22 = vcombine.high %v10133_v34, %v10121_v51  ;;  %v7416_v26 = vld [vmem:[%s11272_s3 + $0x540] ss:$8 sps:$4 sm:$0xff]   ;;  %v2753_v35 = vrot.slane %v9859_v33, 5  ;;  %v2797_v25 = vshrl.u32 %v10095_v31, 16 }
 0x201   : > { %5213 = vmatprep.mubr.bf16.mxu0 %v6552_v61  ;;  %5258 = vmatprep.subr.bf16.mxu1 %v7412_v37  ;;  %v10140_v36 = vld [vmem:[#allocation2 + $0xa8] sm:$0xee]  ;;  %v10151_v7 = vsel %vm9894_vm7, %v6487_v1, %v2709_v30  ;;  %v10159_v44 = vld [vmem:[#allocation2 + $0x14] sm:$0x3]  ;;  %v2800_v58 = vshll.u32 %v10095_v31, 16  ;;  %v2842_v12 = vshrl.u32 %v10138_v24, 16 }
 0x202   : > { %5198 = vmatpush2.bf16.msra.mxu0 %v7431_v14  ;;  %v7445_v50 = vld [vmem:[%s11272_s3 + $0x4d4] ss:$8 sps:$4 sm:$0xff]   ;;  %v6542_v20 = vcombine.low %v10147_v57, %v10151_v7  ;;  %v2845_v33 = vshll.u32 %v10138_v24, 16  ;;  %v2745_v8 = vrot.slane %v9835_v41, 5  ;;  %v6498_v42 = vrot.slane %v10140_v36, 9 }
 0x203   : > { %5151 = vmatmul.mubr.bf16.gmra.mxu1 %v6543_v15  ;;  %v10166_v39 = vld [vmem:[#allocation2 + $0x90] sm:$0xee]  ;;  %5199 = vmatprep.subr.bf16.mxu0 %v7439_v17  ;;  %v10177_v2 = vld [vmem:[#allocation2 + $0x38] sm:$0xe]  ;;  %v2806_v47 = vshrl.u32 %v10159_v44, 16  ;;  %v2809_v29 = vshll.u32 %v10159_v44, 16 }
 0x204   : > { %5160 = vmatprep.mubr.bf16.mxu1 %v6547_v22  ;;  %5259 = vmatpush1.bf16.msra.mxu1 %v7410_v27  ;;  %v7424_v11 = vld [vmem:[%s11272_s3 + $0x534] ss:$8 sps:$4 sm:$0xff]   ;;  %v2835_v52 = vrot.slane %v2833_v23, 5  ;;  %v2838_v60 = vrot.slane %v2836_v56, 6  ;;  %v10181_v49 = vld [vmem:[#allocation2 + $0x50] sm:$0xe]  ;;  %v10188_v41 = vsel %vm9894_vm7, %v6498_v42, %v2753_v35 }
 0x205   : > { %5260 = vmatprep.subr.bf16.mxu1 %v7418_v13  ;;  %v2717_v4 = vrot.slane %v9883_v45, 5  ;;  %v2725_v38 = vrot.slane %v9908_v3, 5  ;;  %v6496_v62 = vrot.slane %v10166_v39, 9  ;;  %v7443_v5 = vld [vmem:[%s11272_s3 + $0x4d0] ss:$8 sps:$4 sm:$0xff]   ;;  %v2799_v31 = vrot.slane %v2797_v25, 5 }
 0x206   : > { %5200 = vmatpush2.bf16.msra.mxu0 %v7437_v21  ;;  %v2802_v16 = vrot.slane %v2800_v58, 6  ;;  %v2844_v30 = vrot.slane %v2842_v12, 5  ;;  %v2847_v37 = vrot.slane %v2845_v33, 6  ;;  %v7451_v45 = vld [vmem:[%s11272_s3 + $0x4c4] ss:$8 sps:$4 sm:$0xff]   ;;  %v6546_v3 = vcombine.low %v10133_v34, %v10121_v51 }
 0x207   : > { %5201 = vmatprep.subr.bf16.mxu0 %v7445_v50  ;;  %v7422_v6 = vld [vmem:[%s11272_s3 + $0x530] ss:$8 sps:$4 sm:$0xff]   ;;  %v10203_v10 = vsel %vm9894_vm7, %v6496_v62, %v2745_v8  ;;  %v6489_v61 = vrot.slane %v10177_v2, 9  ;;  %v6491_v14 = vrot.slane %v10181_v49, 9  ;;  %v7430_v51 = vld [vmem:[%s11272_s3 + $0x524] ss:$8 sps:$4 sm:$0xff]   ;;  %v2839_v15 = vor.u32 %v2838_v60, %v2835_v52 }
 0x208   : > { %5261 = vmatpush1.bf16.msra.mxu1 %v7416_v26  ;;  %v6550_v43 = vcombine.high %v10203_v10, %v10188_v41  ;;  %v2808_v1 = vrot.slane %v2806_v47, 5  ;;  %v2811_v17 = vrot.slane %v2809_v29, 6  ;;  %v10212_v27 = vld [vmem:[#allocation2 + $0x54] sm:$0x33]  ;;  %v7449_v34 = vld [vmem:[%s11272_s3 + $0x4c0] ss:$8 sps:$4 sm:$0xff]   ;;  %v2803_v22 = vor.u32 %v2802_v16, %v2799_v31 }
 0x209   : > { %5262 = vmatprep.subr.bf16.mxu1 %v7424_v11  ;;  %v2887_v13 = vshrl.u32 %v10015_v63, 16  ;;  %v2890_v23 = vshll.u32 %v10015_v63, 16  ;;  %v10221_v56 = vsel %vm9894_vm7, %v6489_v61, %v2717_v4  ;;  %v10225_v21 = vsel %vm9894_vm7, %v6491_v14, %v2725_v38  ;;  %v7457_v35 = vld [vmem:[%s11272_s3 + $0x4b4] ss:$8 sps:$4 sm:$0xff]   ;;  %v7428_v58 = vld [vmem:[%s11272_s3 + $0x520] ss:$8 sps:$4 sm:$0xff]  }
 0x20a   : > { %5202 = vmatpush2.bf16.msra.mxu0 %v7443_v5  ;;  %v2848_v26 = vor.u32 %v2847_v37, %v2844_v30  ;;  %v10230_v50 = vld [vmem:[#allocation2 + $0x3c] sm:$0x33]  ;;  %v2851_v63 = vshrl.u32 %v10031_v53, 16  ;;  %v2854_v12 = vshll.u32 %v10031_v53, 16  ;;  %v2896_v33 = vshrl.u32 %v10212_v27, 16 }
 0x20b   : > { %5161 = vmatmul.mubr.bf16.gmra.mxu1 %v6546_v3  ;;  %5203 = vmatprep.subr.bf16.mxu0 %v7451_v45  ;;  %v2899_v11 = vshll.u32 %v10212_v27, 16  ;;  %v7436_v8 = vld [vmem:[%s11272_s3 + $0x514] ss:$8 sps:$4 sm:$0xff]   ;;  %v2812_v42 = vor.u32 %v2811_v17, %v2808_v1  ;;  %v2840_v47 = vrot.slane %v2839_v15, 4  ;;  %v7434_v29 = vld [vmem:[%s11272_s3 + $0x510] ss:$8 sps:$4 sm:$0xff]   ;;  %v6549_v14 = vcombine.low %v10203_v10, %v10188_v41 }
 0x20c   : > { %5170 = vmatprep.mubr.bf16.mxu1 %v6550_v43  ;;  %5263 = vmatpush1.bf16.msra.mxu1 %v7422_v6  ;;  %v7455_v53 = vld [vmem:[%s11272_s3 + $0x4b0] ss:$8 sps:$4 sm:$0xff]   ;;  %v2860_v52 = vshrl.u32 %v10230_v50, 16  ;;  %v2863_v60 = vshll.u32 %v10230_v50, 16  ;;  %v2889_v4 = vrot.slane %v2887_v13, 5  ;;  %v2892_v38 = vrot.slane %v2890_v23, 6 }
 0x20d   : > { %5264 = vmatprep.subr.bf16.mxu1 %v7430_v51  ;;  %v2804_v62 = vrot.slane %v2803_v22, 4  ;;  %v2849_v5 = vsel %vm10074_vm10, %v2840_v47, %v2848_v26  ;;  %v7442_v31 = vld [vmem:[%s11272_s3 + $0x504] ss:$8 sps:$4 sm:$0xff]   ;;  %v2853_v30 = vrot.slane %v2851_v63, 5  ;;  %v7461_v37 = vld [vmem:[%s11272_s3 + $0x4a0] ss:$8 sps:$4 sm:$0xff]  }
 0x20e   : > { %5204 = vmatpush2.bf16.msra.mxu0 %v7449_v34  ;;  %v7463_v16 = vld [vmem:[%s11272_s3 + $0x4a4] ss:$8 sps:$4 sm:$0xff]   ;;  %v2856_v45 = vrot.slane %v2854_v12, 6  ;;  %v2898_v3 = vrot.slane %v2896_v33, 5  ;;  %v2901_v6 = vrot.slane %v2899_v11, 6  ;;  %v2923_v61 = vshrl.u32 %v10090_v54, 16 }
 0x20f   : > { %5205 = vmatprep.subr.bf16.mxu0 %v7457_v35  ;;  %v2813_v43 = vsel %vm10074_vm10, %v2804_v62, %v2812_v42  ;;  %v7469_v51 = vld [vmem:[%s11272_s3 + $0x494] ss:$8 sps:$4 sm:$0xff]   ;;  %v10271_v1 = vld [vmem:[#allocation2 + $0x6c] sm:$0x33]  ;;  %v2926_v17 = vshll.u32 %v10090_v54, 16  ;;  %v2862_v34 = vrot.slane %v2860_v52, 5  ;;  %v2893_v23 = vor.u32 %v2892_v38, %v2889_v4 }
 0x210   : > { %5265 = vmatpush1.bf16.msra.mxu1 %v7428_v58  ;;  %v6554_v15 = vcombine.low %v2813_v43, %v2849_v5  ;;  %v2865_v13 = vrot.slane %v2863_v60, 6  ;;  %v10274_v22 = vld [vmem:[#allocation2 + $0x68] sm:$0xe]  ;;  %v10276_v41 = vld [vmem:[#allocation2 + $0x80] sm:$0xe]  ;;  %v2733_v10 = vrot.slane %v9935_v9, 5  ;;  %v2857_v12 = vor.u32 %v2856_v45, %v2853_v30 }
 0x211   : > { %5266 = vmatprep.subr.bf16.mxu1 %v7436_v8  ;;  %v2741_v26 = vrot.slane %v9941_v28, 5  ;;  %v10280_v35 = vld [vmem:[#allocation2 + $0x84] sm:$0x33]  ;;  %v2959_v63 = vshrl.u32 %v10082_v18, 16  ;;  %v2962_v54 = vshll.u32 %v10082_v18, 16  ;;  %v2902_v33 = vor.u32 %v2901_v6, %v2898_v3 }
 0x212   : > { %5206 = vmatpush2.bf16.msra.mxu0 %v7455_v53  ;;  %v7440_v58 = vld [vmem:[%s11272_s3 + $0x500] ss:$8 sps:$4 sm:$0xff]   ;;  %v2925_v11 = vrot.slane %v2923_v61, 5  ;;  %v2932_v9 = vshrl.u32 %v10271_v1, 16  ;;  %v7448_v28 = vld [vmem:[%s11272_s3 + $0x5f4] ss:$8 sps:$4 sm:$0xff]   ;;  %v2866_v53 = vor.u32 %v2865_v13, %v2862_v34 }
 0x213   : > { %5171 = vmatmul.mubr.bf16.gmra.mxu1 %v6549_v14  ;;  %5207 = vmatprep.subr.bf16.mxu0 %v7463_v16  ;;  %v2928_v8 = vrot.slane %v2926_v17, 6  ;;  %v2935_v42 = vshll.u32 %v10271_v1, 16  ;;  %v6493_v18 = vrot.slane %v10274_v22, 9  ;;  %v6495_v47 = vrot.slane %v10276_v41, 9  ;;  %v7475_v38 = vld [vmem:[%s11272_s3 + $0x484] ss:$8 sps:$4 sm:$0xff]  }
 0x214   : > { %5267 = vmatpush1.bf16.msra.mxu1 %v7434_v29  ;;  %5286 = vmatprep.mubr.bf16.mxu1 %v6554_v15  ;;  %v7467_v29 = vld [vmem:[%s11272_s3 + $0x490] ss:$8 sps:$4 sm:$0xff]   ;;  %v2894_v52 = vrot.slane %v2893_v23, 4  ;;  %v2968_v60 = vshrl.u32 %v10280_v35, 16  ;;  %v2971_v4 = vshll.u32 %v10280_v35, 16  ;;  %v2961_v62 = vrot.slane %v2959_v63, 5 }
 0x215   : > { %5268 = vmatprep.subr.bf16.mxu1 %v7442_v31  ;;  %v2964_v5 = vrot.slane %v2962_v54, 6  ;;  %v10304_v31 = vsel %vm9894_vm7, %v6493_v18, %v2733_v10  ;;  %v10308_v16 = vsel %vm9894_vm7, %v6495_v47, %v2741_v26  ;;  %v7446_v30 = vld [vmem:[%s11272_s3 + $0x5f0] ss:$8 sps:$4 sm:$0xff]   ;;  %v10313_v45 = vld [vmem:[#allocation2 + $0x44] sm:$0x3]  ;;  %v2929_v14 = vor.u32 %v2928_v8, %v2925_v11 }
 0x216   : > { %5208 = vmatpush2.bf16.msra.mxu0 %v7461_v37  ;;  %v2858_v37 = vrot.slane %v2857_v12, 4  ;;  %v7454_v6 = vld [vmem:[%s11272_s3 + $0x5e4] ss:$8 sps:$4 sm:$0xff]   ;;  %v10322_v61 = vsel %vm10074_vm10, %v2894_v52, %v2902_v33  ;;  %v10324_v43 = vrot.slane %v2932_v9, 5  ;;  %v7452_v17 = vld [vmem:[%s11272_s3 + $0x5e0] ss:$8 sps:$4 sm:$0xff]  }
 0x217   : > { %5209 = vmatprep.subr.bf16.mxu0 %v7469_v51  ;;  %v10326_v51 = vrot.slane %v2935_v42, 6  ;;  %v7473_v15 = vld [vmem:[%s11272_s3 + $0x480] ss:$8 sps:$4 sm:$0xff]   ;;  %v2970_v34 = vrot.slane %v2968_v60, 5  ;;  %v2973_v13 = vrot.slane %v2971_v4, 6  ;;  %v2869_v23 = vshrl.u32 %v10177_v2, 16 }
 0x218   : > { %5269 = vmatpush1.bf16.msra.mxu1 %v7440_v58  ;;  %v2872_v10 = vshll.u32 %v10177_v2, 16  ;;  %v7460_v26 = vld [vmem:[%s11272_s3 + $0x5d4] ss:$8 sps:$4 sm:$0xff]   ;;  %v10344_v54 = vsel %vm10074_vm10, %v2858_v37, %v2866_v53  ;;  %v2965_v58 = vor.u32 %v2964_v5, %v2961_v62  ;;  %v2878_v12 = vshrl.u32 %v10313_v45, 16  ;;  %v7479_v11 = vld [vmem:[%s11272_s3 + $0x670] ss:$8 sps:$4 sm:$0xff]  }
 0x219   : > { %5270 = vmatprep.subr.bf16.mxu1 %v7448_v28  ;;  %v7481_v63 = vld [vmem:[%s11272_s3 + $0x674] ss:$8 sps:$4 sm:$0xff]   ;;  %v2749_v33 = vrot.slane %v9973_v19, 5  ;;  %v2757_v2 = vrot.slane %v9984_v32, 5  ;;  %v6555_v9 = vcombine.low %v10344_v54, %v10322_v61  ;;  %v7487_v8 = vld [vmem:[%s11272_s3 + $0x664] ss:$8 sps:$4 sm:$0xff]   ;;  %v2974_v52 = vor.u32 %v2973_v13, %v2970_v34 }
 0x21a   : > { %5210 = vmatpush2.bf16.msra.mxu0 %v7467_v29  ;;  %v10354_v28 = vld [vmem:[#allocation2 + $0x5c] sm:$0x3]  ;;  %v10359_v42 = vrot.slane %v2929_v14, 4  ;;  %v2881_v47 = vshll.u32 %v10313_v45, 16  ;;  %v2905_v29 = vshrl.u32 %v10181_v49, 16  ;;  %v10368_v60 = vrot.slane %v2869_v23, 5 }
 0x21b   : > { %5211 = vmatprep.subr.bf16.mxu0 %v7475_v38  ;;  %v7458_v53 = vld [vmem:[%s11272_s3 + $0x5d0] ss:$8 sps:$4 sm:$0xff]   ;;  %v10370_v4 = vrot.slane %v2872_v10, 6  ;;  %v2908_v38 = vshll.u32 %v10181_v49, 16  ;;  %v10377_v37 = vrot.slane %v2878_v12, 5  ;;  %v3031_v14 = vshrl.u32 %v10140_v36, 16 }
 0x21c   : > { %5271 = vmatpush2.bf16.msra.mxu1 %v7446_v30  ;;  %v10373_v62 = vld [vmem:[#allocation2 + $0xb4] sm:$0x33]  ;;  %v2966_v30 = vrot.slane %v2965_v58, 4  ;;  %v2914_v34 = vshrl.u32 %v10354_v28, 16  ;;  %v2917_v13 = vshll.u32 %v10354_v28, 16  ;;  %v2995_v49 = vshrl.u32 %v10166_v39, 16 }
 0x21d   : > { %5272 = vmatprep.subr.bf16.mxu1 %v7454_v6  ;;  %v10375_v5 = vld [vmem:[#allocation2 + $0x98] sm:$0xe]  ;;  %v10379_v6 = vld [vmem:[#allocation2 + $0x9c] sm:$0x33]  ;;  %v2998_v23 = vshll.u32 %v10166_v39, 16  ;;  %v3040_v58 = vshrl.u32 %v10373_v62, 16  ;;  %v2875_v32 = vor.u32 %v10370_v4, %v10368_v60 }
 0x21e   : > { %5212 = vmatpush2.bf16.msra.mxu0 %v7473_v15  ;;  %v3034_v15 = vshll.u32 %v10140_v36, 16  ;;  %v10387_v10 = vld [vmem:[#allocation2 + $0xb0] sm:$0xe]  ;;  %v10395_v36 = vrot.slane %v2881_v47, 6  ;;  %v3043_v12 = vshll.u32 %v10373_v62, 16  ;;  %v2910_v57 = vrot.slane %v2908_v38, 6 }
 0x21f   : > { %5327 = vmatprep.subr.bf16.mxu0 %v7481_v63  ;;  %v7466_v63 = vld [vmem:[%s11272_s3 + $0x5c4] ss:$8 sps:$4 sm:$0xff]   ;;  %v7485_v39 = vld [vmem:[%s11272_s3 + $0x660] ss:$8 sps:$4 sm:$0xff]   ;;  %v3004_v7 = vshrl.u32 %v10379_v6, 16  ;;  %v6499_v3 = vrot.slane %v10387_v10, 9 }
 0x220   : > { %5273 = vmatpush2.bf16.msra.mxu1 %v7452_v17  ;;  %v2907_v17 = vrot.slane %v2905_v29, 5  ;;  %v7493_v47 = vld [vmem:[%s11272_s3 + $0x654] ss:$8 sps:$4 sm:$0xff]   ;;  %v6497_v29 = vrot.slane %v10375_v5, 9  ;;  %v2916_v38 = vrot.slane %v2914_v34, 5  ;;  %v2997_v25 = vrot.slane %v2995_v49, 5 }
 0x221   : > { %5274 = vmatprep.subr.bf16.mxu1 %v7460_v26  ;;  %5214 = vmatmul.mubr.bf16.vlgmr.msra.gmra.mxu0 %v6542_v20  ;;  %v10404_v26 = vsel %vm10074_vm10, %v2966_v30, %v2974_v52  ;;  %v3007_v20 = vshll.u32 %v10379_v6, 16  ;;  %v7464_v52 = vld [vmem:[%s11272_s3 + $0x5c0] ss:$8 sps:$4 sm:$0xff]   ;;  %v2919_v30 = vrot.slane %v2917_v13, 6  ;;  %v3000_v18 = vrot.slane %v2998_v23, 6 }
 0x222   : > { %5223 = vmatprep.mubr.bf16.mxu0 %v6555_v9  ;;  %5328 = vmatpush1.bf16.msra.mxu0 %v7479_v11  ;;  %v3033_v9 = vrot.slane %v3031_v14, 5  ;;  %v3036_v11 = vrot.slane %v3034_v15, 6  ;;  %v3042_v14 = vrot.slane %v3040_v58, 5  ;;  %v3045_v15 = vrot.slane %v3043_v12, 6  ;;  %v7491_v13 = vld [vmem:[%s11272_s3 + $0x650] ss:$8 sps:$4 sm:$0xff]  }
 0x223   : > { %5329 = vmatprep.subr.bf16.mxu0 %v7487_v8  ;;  %v7472_v8 = vld [vmem:[%s11272_s3 + $0x5b4] ss:$8 sps:$4 sm:$0xff]   ;;  %v10429_v34 = vsel %vm9894_vm7, %v6499_v3, %v2757_v2  ;;  %v2911_v49 = vor.u32 %v2910_v57, %v2907_v17  ;;  %v3006_v23 = vrot.slane %v3004_v7, 5  ;;  %v7499_v3 = vld [vmem:[%s11272_s3 + $0x644] ss:$8 sps:$4 sm:$0xff]   ;;  %v3001_v60 = vor.u32 %v3000_v18, %v2997_v25 }
 0x224   : > { %5275 = vmatpush2.bf16.msra.mxu1 %v7458_v53  ;;  %v10423_v53 = vsel %vm9894_vm7, %v6497_v29, %v2749_v33  ;;  %v11639_v33 = vor.u32 %v10326_v51, %v10324_v43  ;;  %v3037_v2 = vor.u32 %v3036_v11, %v3033_v9  ;;  %v7470_v17 = vld [vmem:[%s11272_s3 + $0x5b0] ss:$8 sps:$4 sm:$0xff]   ;;  %v7478_v43 = vld [vmem:[%s11272_s3 + $0x5a4] ss:$8 sps:$4 sm:$0xff]   ;;  %v3067_v4 = vld [vmem:[#allocation2 + $0x8] sm:$0xc]  ;;  %v3046_v57 = vor.u32 %v3045_v15, %v3042_v14 }
 0x225   : > { %5276 = vmatprep.subr.bf16.mxu1 %v7466_v63  ;;  %v3009_v63 = vrot.slane %v3007_v20, 6  ;;  %v6551_v19 = vcombine.low %v10423_v53, %v10429_v34  ;;  %v3123_v58 = vrot.slane %v10159_v44, 6  ;;  %v3131_v12 = vrot.slane %v10138_v24, 6  ;;  %v10462_v7 = vld [vmem:[#allocation2 + $0x8c] sm:$0x3] }
 0x226   : > { %5330 = vmatpush1.bf16.msra.mxu0 %v7485_v39  ;;  %v10442_v46 = vsel %vm10074_vm10, %v10359_v42, %v11639_v33  ;;  %v2920_v42 = vor.u32 %v2919_v30, %v2916_v38  ;;  %v11640_v39 = vcombine.low %v10221_v56, %v10225_v21  ;;  %v3069_v20 = vld [vmem:[#allocation2 + $0x20] sm:$0xc]  ;;  %v2912_v25 = vrot.slane %v2911_v49, 4  ;;  %v10469_v18 = vld [vmem:[#allocation2 + $0x74] sm:$0x3] }
 0x227   : > { %5331 = vmatprep.subr.bf16.mxu0 %v7493_v47  ;;  %v6558_v51 = vcombine.low %v10442_v46, %v10404_v26  ;;  %v2884_v47 = vor.u32 %v10395_v36, %v10377_v37  ;;  %v7497_v44 = vld [vmem:[%s11272_s3 + $0x640] ss:$8 sps:$4 sm:$0xff]   ;;  %v3010_v24 = vor.u32 %v3009_v63, %v3006_v23  ;;  %v2941_v56 = vshrl.u32 %v10274_v22, 16  ;;  %v7505_v9 = vld [vmem:[%s11272_s3 + $0x634] ss:$8 sps:$4 sm:$0xff]  }
 0x228   : > { %5277 = vmatpush2.bf16.msra.mxu1 %v7464_v52  ;;  %v2876_v21 = vrot.slane %v2875_v32, 4  ;;  %v3038_v11 = vrot.slane %v3037_v2, 4  ;;  %v2944_v29 = vshll.u32 %v10274_v22, 16  ;;  %v2977_v37 = vshrl.u32 %v10276_v41, 16  ;;  %v7476_v36 = vld [vmem:[%s11272_s3 + $0x5a0] ss:$8 sps:$4 sm:$0xff]  }
 0x229   : > { %5278 = vmatprep.subr.bf16.mxu1 %v7472_v8  ;;  %5224 = vmatmul.mubr.bf16.gmra.mxu0 %v11640_v39  ;;  %v10482_v52 = vsel %vm10074_vm10, %v2912_v25, %v2920_v42  ;;  %v3002_v38 = vrot.slane %v3001_v60, 4  ;;  %v2980_v30 = vshll.u32 %v10276_v41, 16  ;;  %v2986_v8 = vshrl.u32 %v10462_v7, 16  ;;  %v7484_v14 = vld [vmem:[%s11272_s3 + $0x594] ss:$8 sps:$4 sm:$0xff]  }
 0x22a   : > { %5233 = vmatprep.mubr.bf16.mxu0 %v6558_v51  ;;  %5332 = vmatpush1.bf16.msra.mxu0 %v7491_v13  ;;  %v10497_v15 = vsel %vm10074_vm10, %v3038_v11, %v3046_v57  ;;  %v2989_v13 = vshll.u32 %v10462_v7, 16  ;;  %v6501_v41 = vrot.slane %v3067_v4, 10  ;;  %v6503_v49 = vrot.slane %v3069_v20, 10  ;;  %v7503_v23 = vld [vmem:[%s11272_s3 + $0x630] ss:$8 sps:$4 sm:$0xff]  }
 0x22b   : > { %5333 = vmatprep.subr.bf16.mxu0 %v7499_v3  ;;  %v10505_v63 = vsel %vm10074_vm10, %v3002_v38, %v3010_v24  ;;  %v10507_v33 = vrot.slane %v2941_v56, 5  ;;  %v2950_v32 = vshrl.u32 %v10469_v18, 16  ;;  %v2953_v3 = vshll.u32 %v10469_v18, 16  ;;  %v3066_v2 = vld [vmem:[#allocation2] sm:$0xcc] }
 0x22c   : > { %5279 = vmatpush2.bf16.msra.mxu1 %v7470_v17  ;;  %v10511_v17 = vrot.slane %v2944_v29, 6  ;;  %v7511_v51 = vld [vmem:[%s11272_s3 + $0x624] ss:$8 sps:$4 sm:$0xff]   ;;  %v3068_v42 = vld [vmem:[#allocation2 + $0x18] sm:$0xcc]  ;;  %v10520_v60 = vsel %vm10488_vm13, %v6501_v41, %v3123_v58  ;;  %v10524_v4 = vsel %vm10488_vm13, %v6503_v49, %v3131_v12  ;;  %v6561_v20 = vcombine.low %v10505_v63, %v10497_v15 }
 0x22d   : > { %5280 = vmatprep.subr.bf16.mxu1 %v7478_v43  ;;  %v10513_v43 = vrot.slane %v2977_v37, 5  ;;  %v7482_v39 = vld [vmem:[%s11272_s3 + $0x590] ss:$8 sps:$4 sm:$0xff]   ;;  %v7490_v57 = vld [vmem:[%s11272_s3 + $0x584] ss:$8 sps:$4 sm:$0xff]   ;;  %v10534_v25 = vrot.slane %v2980_v30, 6  ;;  %v6566_v12 = vcombine.low %v10520_v60, %v10524_v4  ;;  %v6553_v29 = vcombine.high %v10107_v0, %v10111_v48 }
 0x22e   : > { %5334 = vmatpush1.bf16.msra.mxu0 %v7497_v44  ;;  %v3127_v58 = vrot.slane %v10027_v55, 6  ;;  %v11643_v44 = vcombine.low %v10304_v31, %v10308_v16  ;;  %v10542_v24 = vrot.slane %v2986_v8, 5  ;;  %v10544_v56 = vrot.slane %v2989_v13, 6  ;;  %v3070_v11 = vld [vmem:[#allocation2 + $0x30] sm:$0xcc] }
 0x22f   : > { %5335 = vmatprep.subr.bf16.mxu0 %v7505_v9  ;;  %v3119_v9 = vrot.slane %v10013_v59, 6  ;;  %v7488_v55 = vld [vmem:[%s11272_s3 + $0x580] ss:$8 sps:$4 sm:$0xff]   ;;  %v10554_v37 = vsel %vm10074_vm10, %v2876_v21, %v2884_v47  ;;  %v7517_v59 = vld [vmem:[%s11272_s3 + $0x614] ss:$8 sps:$4 sm:$0xff]   ;;  %v6502_v16 = vrot.slane %v3068_v42, 10  ;;  %v2947_v30 = vor.u32 %v10511_v17, %v10507_v33 }
 0x230   : > { %5281 = vmatpush2.bf16.msra.mxu1 %v7476_v36  ;;  %v7509_v31 = vld [vmem:[%s11272_s3 + $0x620] ss:$8 sps:$4 sm:$0xff]   ;;  %v6557_v0 = vcombine.low %v10554_v37, %v10482_v52  ;;  %v10564_v48 = vrot.slane %v2950_v32, 5  ;;  %v6500_v36 = vrot.slane %v3066_v2, 10  ;;  %v3135_v21 = vrot.slane %v10230_v50, 6 }
 0x231   : > { %5282 = vmatprep.subr.bf16.mxu1 %v7484_v14  ;;  %5234 = vmatmul.mubr.bf16.gmra.mxu0 %v11643_v44  ;;  %v3072_v47 = vld [vmem:[#allocation2 + $0x48] sm:$0xcc]  ;;  %v7496_v38 = vld [vmem:[%s11272_s3 + $0x774] ss:$8 sps:$4 sm:$0xff]   ;;  %v10572_v8 = vrot.slane %v2953_v3, 6  ;;  %v2983_v52 = vor.u32 %v10534_v25, %v10513_v43  ;;  %v10581_v50 = vsel %vm10488_vm13, %v6502_v16, %v3127_v58  ;;  %v2992_v13 = vor.u32 %v10544_v56, %v10542_v24 }
 0x232   : > { %5243 = vmatprep.mubr.bf16.mxu0 %v6561_v20  ;;  %5336 = vmatpush1.bf16.msra.mxu0 %v7503_v23  ;;  %v7515_v14 = vld [vmem:[%s11272_s3 + $0x610] ss:$8 sps:$4 sm:$0xff]   ;;  %v10587_v41 = vsel %vm10488_vm13, %v6500_v36, %v3119_v9  ;;  %v3013_v49 = vshrl.u32 %v10375_v5, 16  ;;  %v6504_v23 = vrot.slane %v3070_v11, 10  ;;  %v3074_v32 = vld [vmem:[#allocation2 + $0x60] sm:$0xcc] }
 0x233   : > { %5337 = vmatprep.subr.bf16.mxu0 %v7511_v51  ;;  %v3076_v3 = vld [vmem:[#allocation2 + $0x78] sm:$0xcc]  ;;  %v10593_v43 = vld [vmem:[#allocation2 + $0xbc] sm:$0x3]  ;;  %v3016_v51 = vshll.u32 %v10375_v5, 16  ;;  %v3049_v42 = vshrl.u32 %v10387_v10, 16  ;;  %v6565_v20 = vcombine.high %v10587_v41, %v10581_v50 }
 0x234   : > { %5283 = vmatpush2.bf16.msra.mxu1 %v7482_v39  ;;  %v7494_v2 = vld [vmem:[%s11272_s3 + $0x770] ss:$8 sps:$4 sm:$0xff]   ;;  %v6506_v39 = vrot.slane %v3072_v47, 10  ;;  %v3052_v25 = vshll.u32 %v10387_v10, 16  ;;  %v7523_v58 = vld [vmem:[%s11272_s3 + $0x604] ss:$8 sps:$4 sm:$0xff]   ;;  %v10606_v44 = vsel %vm10488_vm13, %v6504_v23, %v3135_v21 }
 0x235   : > { %5284 = vmatprep.subr.bf16.mxu1 %v7490_v57  ;;  %v3143_v57 = vrot.slane %v10212_v27, 6  ;;  %v3151_v9 = vrot.slane %v10271_v1, 6  ;;  %v3078_v11 = vld [vmem:[#allocation2 + $0x90] sm:$0xcc]  ;;  %v6508_v37 = vrot.slane %v3074_v32, 10  ;;  %v3159_v10 = vrot.slane %v10280_v35, 6 }
 0x236   : > { %5338 = vmatpush1.bf16.msra.mxu0 %v7509_v31  ;;  %v6510_v31 = vrot.slane %v3076_v3, 10  ;;  %v7502_v16 = vld [vmem:[%s11272_s3 + $0x764] ss:$8 sps:$4 sm:$0xff]   ;;  %v3061_v36 = vshll.u32 %v10593_v43, 16  ;;  %v7521_v21 = vld [vmem:[%s11272_s3 + $0x600] ss:$8 sps:$4 sm:$0xff]  }
 0x237   : > { %5339 = vmatprep.subr.bf16.mxu0 %v7517_v59  ;;  %v10611_v27 = vsel %vm10488_vm13, %v6506_v39, %v3143_v57  ;;  %v3080_v59 = vld [vmem:[#allocation2 + $0xa8] sm:$0xcc]  ;;  %v10620_v1 = vld [vmem:[#allocation2 + $0xa4] sm:$0x3]  ;;  %v10633_v53 = vsel %vm10488_vm13, %v6508_v37, %v3151_v9  ;;  %v3175_v39 = vrot.slane %v10373_v62, 6  ;;  %v2984_v57 = vrot.slane %v2983_v52, 4 }
 0x238   : > { %5285 = vmatpush2.bf16.msra.mxu1 %v7488_v55  ;;  %v3058_v55 = vshrl.u32 %v10593_v43, 16  ;;  %v6567_v47 = vcombine.low %v10606_v44, %v10611_v27  ;;  %v6568_v35 = vcombine.high %v10606_v44, %v10611_v27  ;;  %v10637_v34 = vsel %vm10488_vm13, %v6510_v31, %v3159_v10  ;;  %v7508_v9 = vld [vmem:[%s11272_s3 + $0x754] ss:$8 sps:$4 sm:$0xff]   ;;  %v7527_v52 = vld [vmem:[%s11272_s3 + $0x6f0] ss:$8 sps:$4 sm:$0xff]  }
 0x239   : > { %5400 = vmatprep.subr.bf16.mxu1 %v7496_v38  ;;  %5244 = vmatmul.mubr.bf16.gmra.mxu0 %v6551_v19  ;;  %v6512_v19 = vrot.slane %v3078_v11, 10  ;;  %v3167_v38 = vrot.slane %v10379_v6, 6  ;;  %v6570_v23 = vcombine.low %v10633_v53, %v10637_v34  ;;  %v6571_v32 = vcombine.high %v10633_v53, %v10637_v34  ;;  %v7500_v6 = vld [vmem:[%s11272_s3 + $0x760] ss:$8 sps:$4 sm:$0xff]   ;;  %v7535_v56 = vld [vmem:[%s11272_s3 + $0x6e4] ss:$8 sps:$4 sm:$0xff]  }
 0x23a   : > { %5340 = vmatpush1.bf16.msra.mxu0 %v7515_v14  ;;  %5359 = vmatprep.mubr.bf16.mxu0 %v6565_v20  ;;  %v7529_v14 = vld [vmem:[%s11272_s3 + $0x6f4] ss:$8 sps:$4 sm:$0xff]   ;;  %v6514_v3 = vrot.slane %v3080_v59, 10  ;;  %v3022_v20 = vshrl.u32 %v10620_v1, 16  ;;  %v3051_v62 = vrot.slane %v3049_v42, 5  ;;  %v3015_v33 = vrot.slane %v3013_v49, 5 }
 0x23b   : > { %5287 = vmatmul.mubr.bf16.vlgmr.msra.gmra.mxu1 %v6553_v29  ;;  %5341 = vmatprep.subr.bf16.mxu0 %v7523_v58  ;;  %v2956_v29 = vor.u32 %v10572_v8, %v10564_v48  ;;  %v3025_v58 = vshll.u32 %v10620_v1, 16  ;;  %v2948_v48 = vrot.slane %v2947_v30, 4  ;;  %v2993_v8 = vsel %vm10074_vm10, %v2984_v57, %v2992_v13  ;;  %v7506_v37 = vld [vmem:[%s11272_s3 + $0x750] ss:$8 sps:$4 sm:$0xff]   ;;  %v7514_v49 = vld [vmem:[%s11272_s3 + $0x744] ss:$8 sps:$4 sm:$0xff]  }
 0x23c   : > { %5296 = vmatprep.mubr.bf16.mxu1 %v6557_v0  ;;  %5401 = vmatpush1.bf16.msra.mxu1 %v7494_v2  ;;  %v3054_v0 = vrot.slane %v3052_v25, 6  ;;  %v10660_v2 = vsel %vm10488_vm13, %v6512_v19, %v3167_v38  ;;  %v10664_v11 = vsel %vm10488_vm13, %v6514_v3, %v3175_v39  ;;  %v3018_v17 = vrot.slane %v3016_v51, 6  ;;  %v7524_v40 = vld [vmem:[%s11272_s3 + $0x720] ss:$8 sps:$4 sm:$0xff]  }
 0x23d   : > { %5402 = vmatprep.subr.bf16.mxu1 %v7502_v16  ;;  %v6573_v42 = vcombine.low %v10660_v2, %v10664_v11  ;;  %v6574_v25 = vcombine.high %v10660_v2, %v10664_v11  ;;  %v3060_v30 = vrot.slane %v3058_v55, 5  ;;  %v3063_v24 = vrot.slane %v3061_v36, 6  ;;  %v7541_v55 = vld [vmem:[%s11272_s3 + $0x6d4] ss:$8 sps:$4 sm:$0xff]   ;;  %v7512_v36 = vld [vmem:[%s11272_s3 + $0x740] ss:$8 sps:$4 sm:$0xff]  }
 0x23e   : > { %5342 = vmatpush1.bf16.msra.mxu0 %v7521_v21  ;;  %v6556_v13 = vcombine.high %v10344_v54, %v10322_v61  ;;  %v2957_v5 = vsel %vm10074_vm10, %v2948_v48, %v2956_v29  ;;  %v3024_v51 = vrot.slane %v3022_v20, 5  ;;  %v3027_v31 = vrot.slane %v3025_v58, 6  ;;  %v7533_v61 = vld [vmem:[%s11272_s3 + $0x6e0] ss:$8 sps:$4 sm:$0xff]   ;;  %v7520_v21 = vld [vmem:[%s11272_s3 + $0x734] ss:$8 sps:$4 sm:$0xff]  }
 0x23f   : > { %5343 = vmatprep.subr.bf16.mxu0 %v7529_v14  ;;  %v3055_v10 = vor.u32 %v3054_v0, %v3051_v62  ;;  %v6560_v59 = vcombine.low %v2957_v5, %v2993_v8  ;;  %v3019_v54 = vor.u32 %v3018_v17, %v3015_v33  ;;  %v3064_v16 = vor.u32 %v3063_v24, %v3060_v30  ;;  %v7539_v14 = vld [vmem:[%s11272_s3 + $0x6d0] ss:$8 sps:$4 sm:$0xff]   ;;  %v7526_v58 = vld [vmem:[%s11272_s3 + $0x724] ss:$8 sps:$4 sm:$0xff]   ;;  %v7542_v62 = vld [vmem:[%s11272_s3 + $0x6c0] ss:$8 sps:$4 sm:$0xff]  }
 0x240   : > { %5403 = vmatpush1.bf16.msra.mxu1 %v7500_v6  ;;  %v3028_v19 = vor.u32 %v3027_v31, %v3024_v51  ;;  %v7544_v6 = vld [vmem:[%s11272_s3 + $0x6c4] ss:$8 sps:$4 sm:$0xff]   ;;  %v7518_v29 = vld [vmem:[%s11272_s3 + $0x730] ss:$8 sps:$4 sm:$0xff]   ;;  %v6559_v57 = vcombine.high %v10442_v46, %v10404_v26  ;;  %v7547_v26 = vld [vmem:[%s11272_s3 + $0x6b4] ss:$8 sps:$4 sm:$0xff]  }
 0x241   : > { %5404 = vmatprep.subr.bf16.mxu1 %v7508_v9  ;;  %v3056_v38 = vrot.slane %v3055_v10, 4  ;;  %v3020_v3 = vrot.slane %v3019_v54, 4  ;;  %v7532_v46 = vld [vmem:[%s11272_s3 + $0x714] ss:$8 sps:$4 sm:$0xff]   ;;  %v7545_v0 = vld [vmem:[%s11272_s3 + $0x6b0] ss:$8 sps:$4 sm:$0xff]  }
 0x242   : > { %5344 = vmatpush2.bf16.msra.mxu0 %v7527_v52  ;;  %v7550_v48 = vld [vmem:[%s11272_s3 + $0x6a4] ss:$8 sps:$4 sm:$0xff]   ;;  %v7530_v8 = vld [vmem:[%s11272_s3 + $0x710] ss:$8 sps:$4 sm:$0xff]   ;;  %v6562_v52 = vcombine.high %v10505_v63, %v10497_v15  ;;  %v7548_v17 = vld [vmem:[%s11272_s3 + $0x6a0] ss:$8 sps:$4 sm:$0xff]  }
 0x243   : > { %5297 = vmatmul.mubr.bf16.gmra.mxu1 %v6556_v13  ;;  %5345 = vmatprep.subr.bf16.mxu0 %v7535_v56  ;;  %v3065_v39 = vsel %vm10074_vm10, %v3056_v38, %v3064_v16  ;;  %v3029_v20 = vsel %vm10074_vm10, %v3020_v3, %v3028_v19  ;;  %v7538_v33 = vld [vmem:[%s11272_s3 + $0x704] ss:$8 sps:$4 sm:$0xff]   ;;  %v7553_v30 = vld [vmem:[%s11272_s3 + $0x694] ss:$8 sps:$4 sm:$0xff]   ;;  %v7536_v15 = vld [vmem:[%s11272_s3 + $0x700] ss:$8 sps:$4 sm:$0xff]  }
 0x244   : > { %5306 = vmatprep.mubr.bf16.mxu1 %v6560_v59  ;;  %5405 = vmatpush1.bf16.msra.mxu1 %v7506_v37  ;;  %v6563_v9 = vcombine.low %v3029_v20, %v3065_v39  ;;  %v7633_v63 = vmov 0   ;;  %v7551_v24 = vld [vmem:[%s11272_s3 + $0x690] ss:$8 sps:$4 sm:$0xff]   ;;  %v7556_v56 = vld [vmem:[%s11272_s3 + $0x684] ss:$8 sps:$4 sm:$0xff]   ;;  %v3147_v37 = vrot.slane %v10354_v28, 6  ;;  %v6564_v28 = vcombine.low %v10587_v41, %v10581_v50 }
 0x245   : > { %5406 = vmatprep.subr.bf16.mxu1 %v7514_v49  ;;  %v3073_v13 = vld [vmem:[#allocation2 + $0x50] sm:$0xc]  ;;  %v7554_v5 = vld [vmem:[%s11272_s3 + $0x680] ss:$8 sps:$4 sm:$0xff]   ;;  %v3071_v49 = vld [vmem:[#allocation2 + $0x38] sm:$0xc] }
 0x246   : > { %5346 = vmatpush2.bf16.msra.mxu0 %v7533_v61  ;;  %v3139_v51 = vrot.slane %v10313_v45, 6  ;;  %v6507_v31 = vrot.slane %v3073_v13, 10  ;;  %v6505_v10 = vrot.slane %v3071_v49, 10  ;;  %v3077_v60 = vld [vmem:[#allocation2 + $0x80] sm:$0xc]  ;;  %v3163_v4 = vrot.slane %v10462_v7, 6 }
 0x247   : > { %5347 = vmatprep.subr.bf16.mxu0 %v7541_v55  ;;  %v3075_v45 = vld [vmem:[#allocation2 + $0x68] sm:$0xc]  ;;  %v6511_v16 = vrot.slane %v3077_v60, 10  ;;  %v3179_v7 = vrot.slane %v10593_v43, 6  ;;  %v3677_v43 = vld [vmem:[%s11273_s4] sm:$0x3] }
 0x248   : > { %5407 = vmatpush1.bf16.msra.mxu1 %v7512_v36  ;;  %v3148_v59 = vsel %vm10488_vm13, %v6507_v31, %v3147_v37  ;;  %v3140_v61 = vsel %vm10488_vm13, %v6505_v10, %v3139_v51  ;;  %v6509_v55 = vrot.slane %v3075_v45, 10  ;;  %v11645_v39 = vld [vmem:[#allocation19_spill] sm:$0xff]  ;;  %vm5644_vm4 = vcmask 1047559  }
 0x249   : > { %5408 = vmatprep.subr.bf16.mxu1 %v7520_v21  ;;  %v6569_v54 = vcombine.low %v3140_v61, %v3148_v59  ;;  %v3164_v50 = vsel %vm10488_vm13, %v6511_v16, %v3163_v4  ;;  %v3081_v21 = vld [vmem:[#allocation2 + $0xb0] sm:$0xc]  ;;  %v3686_v22 = vrot.slane %v3677_v43, %v11645_v39 }
 0x24a   : > { %5348 = vmatpush2.bf16.msra.mxu0 %v7539_v14  ;;  %v6515_v19 = vrot.slane %v3081_v21, 10 }
 0x24b   : > { %5307 = vmatmul.mubr.bf16.gmra.mxu1 %v6559_v57  ;;  %5349 = vmatprep.subr.bf16.mxu0 %v7544_v6 }
 0x24c   : > { %5316 = vmatprep.mubr.bf16.mxu1 %v6563_v9  ;;  %5409 = vmatpush1.bf16.msra.mxu1 %v7518_v29  ;;  %v3180_v14 = vsel %vm10488_vm13, %v6515_v19, %v3179_v7 }
 0x24d   : > { %5410 = vmatprep.subr.bf16.mxu1 %v7526_v58 }
 0x24e   : > { %5350 = vmatpush2.bf16.msra.mxu0 %v7542_v62 }
 0x24f   : > { %5351 = vmatprep.subr.bf16.mxu0 %v7547_v26 }
 0x250   : > { %5411 = vmatpush1.bf16.msra.mxu1 %v7524_v40 }
 0x251   : > { %5412 = vmatprep.subr.bf16.mxu1 %v7532_v46 }
 0x252   : > { %5352 = vmatpush2.bf16.msra.mxu0 %v7545_v0 }
 0x253   : > { %5317 = vmatmul.mubr.bf16.gmra.mxu1 %v6562_v52  ;;  %5353 = vmatprep.subr.bf16.mxu0 %v7550_v48 }
 0x254   : > { %5413 = vmatpush1.bf16.msra.mxu1 %v7530_v8  ;;  %5432 = vmatprep.mubr.bf16.mxu1 %v7633_v63 }
 0x255   : > { %5414 = vmatprep.subr.bf16.mxu1 %v7538_v33 }
 0x256   : > { %5354 = vmatpush2.bf16.msra.mxu0 %v7548_v17 }
 0x257   : > { %5355 = vmatprep.subr.bf16.mxu0 %v7553_v30 }
 0x258   : > { %5415 = vmatpush1.bf16.msra.mxu1 %v7536_v15 }
 0x259   : > { %v4923_v3 = vpop.f32.mrf.mxu0 }
 0x25a   : > { %5356 = vmatpush2.bf16.msra.mxu0 %v7551_v24 }
 0x25b   : > { %5433 = vmatmul.mubr.bf16.vlgmr.msra.gmra.mxu1 %v6566_v12  ;;  %5357 = vmatprep.subr.bf16.mxu0 %v7556_v56  ;;  %v3155_v12 = vrot.slane %v10469_v18, 6  ;;  %v3079_v18 = vld [vmem:[#allocation2 + $0x98] sm:$0xc] }
 0x25c   : > { %5442 = vmatprep.mubr.bf16.mxu1 %v7633_v63  ;;  %v6513_v38 = vrot.slane %v3079_v18, 10 }
 0x25d   : > { %v3156_v41 = vsel %vm10488_vm13, %v6509_v55, %v3155_v12 }
 0x25e   : > { %5358 = vmatpush2.bf16.msra.mxu0 %v7554_v5  ;;  %v6572_v36 = vcombine.low %v3156_v41, %v3164_v50 }
 0x261   : > { %5360 = vmatmul.mubr.bf16.vlgmr.msra.gmra.mxu0 %v6564_v28 }
 0x262   : > { %5369 = vmatprep.mubr.bf16.mxu0 %v6568_v35  ;;  %v3171_v35 = vrot.slane %v10620_v1, 6  ;;  %v4925_v1 = vpop.f32.mrf.mxu0 }
 0x263   : > { %5443 = vmatmul.mubr.bf16.gmra.mxu1 %v6569_v54  ;;  %v4926_v34 = vadd.f32 %v4925_v1, %v3686_v22 }
 0x264   : > { %5452 = vmatprep.mubr.bf16.mxu1 %v7633_v63  ;;  %v3172_v44 = vsel %vm10488_vm13, %v6513_v38, %v3171_v35  ;;  %v4927_v6 = vpop.f32.mrf.mxu0 }
 0x265   : > { %v6575_v27 = vcombine.low %v3172_v44, %v3180_v14 }
 0x269   : > { %5370 = vmatmul.mubr.bf16.gmra.mxu0 %v6567_v47  ;;  %v11644_v47 = vld [vmem:[#allocation4_spill] sm:$0xff] }
 0x26a   : > { %5379 = vmatprep.mubr.bf16.mxu0 %v6571_v32  ;;  %v3682_v32 = vrot.slane %v3677_v43, %v11644_v47 }
 0x26b   : > { %5453 = vmatmul.mubr.bf16.gmra.mxu1 %v6572_v36 }
 0x26c   : > { %5462 = vmatprep.mubr.bf16.mxu1 %v7633_v63  ;;  %v4924_v29 = vadd.f32 %v4923_v3, %v3682_v32  ;;  %v4928_v58 = vadd.f32 %v4927_v6, %v3682_v32 }
 0x271   : > { %5380 = vmatmul.mubr.bf16.gmra.mxu0 %v6570_v23  ;;  %v4929_v23 = vpop.f32.mrf.mxu0 }
 0x272   : > { %5389 = vmatprep.mubr.bf16.mxu0 %v6574_v25  ;;  %v4930_v26 = vadd.f32 %v4929_v23, %v3686_v22 }
 0x273   : > { %5463 = vmatmul.mubr.bf16.gmra.mxu1 %v6575_v27 }
 0x277   : > { %v4933_v9 = vpop.f32.mrf.mxu0 }
 0x278   : > { %v4996_v53 = vpop.f32.mrf.mxu1  ;;  %v4934_v52 = vadd.f32 %v4933_v9, %v3682_v32  ;;  %v7558_v9 = vld [vmem:[%s11274_s5 + $0xf8] sm:$0xff]  }
 0x279   : > { %5390 = vmatmul.mubr.bf16.gmra.mxu0 %v6573_v42  ;;  %v10816_v57 = vadd.f32 %v4996_v53, %v4924_v29  ;;  %v4935_v48 = vpop.f32.mrf.mxu0  ;;  %6915 = vmatprep.subr.bf16.mxu0 %v7558_v9  ;;  %v7586_v9 = vld [vmem:[%s11274_s5 + $0xc0] sm:$0xff]  }
 0x27a   : > { %v4998_v20 = vpop.f32.mrf.mxu1  ;;  %v4936_v17 = vadd.f32 %v4935_v48, %v3686_v22 }
 0x27b   : > { %v10818_v25 = vadd.f32 %v4998_v20, %v4926_v34  ;;  %v4937_v2 = vpop.f32.mrf.mxu0 }
 0x27c   : > { %v5000_v62 = vpop.f32.mrf.mxu1  ;;  %v4938_v24 = vadd.f32 %v4937_v2, %v3682_v32  ;;  %v7561_v2 = vld [vmem:[%s11274_s5 + $0x70] sm:$0xff]  }
 0x27d   : > { %v10820_v40 = vadd.f32 %v5000_v62, %v4928_v58  ;;  %v4939_v11 = vpop.f32.mrf.mxu0  ;;  %v7559_v62 = vld [vmem:[%s11274_s5 + $0x38] sm:$0xff]  }
 0x27e   : > { %v5002_v46 = vpop.f32.mrf.mxu1  ;;  %v4940_v37 = vadd.f32 %v4939_v11, %v3686_v22  ;;  %v7562_v11 = vld [vmem:[%s11274_s5 + $0xf0] sm:$0xff]  }
 0x27f   : > { %v10822_v0 = vadd.f32 %v5002_v46, %v4930_v26  ;;  %v7560_v26 = vld [vmem:[%s11274_s5 + $0xb8] sm:$0xff]  }
 0x280   : > { %6916 = vmatpush3.bf16.msra.mxu0 %v7560_v26 }
 0x281   : > { %6917 = vmatprep.subr.bf16.mxu0 %v7562_v11  ;;  %v7588_v11 = vld [vmem:[%s11274_s5 + $0x80] sm:$0xff]  }
 0x28c   : > { %v4943_v42 = vpop.f32.mrf.mxu0 }
 0x28d   : > { %v4944_v59 = vadd.f32 %v4943_v42, %v3682_v32  ;;  %v7563_v42 = vld [vmem:[%s11274_s5 + $0x30] sm:$0xff]  }
 0x28e   : > { %v4945_v8 = vpop.f32.mrf.mxu0 }
 0x28f   : > { %v4946_v54 = vadd.f32 %v4945_v8, %v3686_v22  ;;  %v7564_v8 = vld [vmem:[%s11274_s5 + $0xb0] sm:$0xff]  }
 0x290   : > { %v5006_v33 = vpop.f32.mrf.mxu1  ;;  %v4947_v63 = vpop.f32.mrf.mxu0  ;;  %6918 = vmatpush3.bf16.msra.mxu0 %v7564_v8 }
 0x291   : > { %v10824_v30 = vadd.f32 %v5006_v33, %v4934_v52  ;;  %v4948_v45 = vadd.f32 %v4947_v63, %v3682_v32  ;;  %v7567_v63 = vld [vmem:[%s11274_s5 + $0x28] sm:$0xff]  }
 0x292   : > { %v5008_v15 = vpop.f32.mrf.mxu1  ;;  %v4949_v51 = vpop.f32.mrf.mxu0 }
 0x293   : > { %v10826_v56 = vadd.f32 %v5008_v15, %v4936_v17  ;;  %v4950_v50 = vadd.f32 %v4949_v51, %v3686_v22  ;;  %v7565_v17 = vld [vmem:[%s11274_s5 + $0x68] sm:$0xff]  }
 0x294   : > { %v5010_v13 = vpop.f32.mrf.mxu1  ;;  %v7566_v15 = vld [vmem:[%s11274_s5 + $0xe8] sm:$0xff]  }
 0x295   : > { %v10828_v5 = vadd.f32 %v5010_v13, %v4938_v24  ;;  %v4953_v10 = vpop.f32.mrf.mxu0  ;;  %v7568_v24 = vld [vmem:[%s11274_s5 + $0xa8] sm:$0xff]   ;;  %v7569_v13 = vld [vmem:[%s11274_s5 + $0x60] sm:$0xff]   ;;  %6919 = vmatprep.subr.bf16.mxu0 %v7566_v15 }
 0x296   : > { %v5012_v49 = vpop.f32.mrf.mxu1  ;;  %v4954_v18 = vadd.f32 %v4953_v10, %v3682_v32  ;;  %6920 = vmatpush3.bf16.msra.mxu0 %v7568_v24  ;;  %v7571_v10 = vld [vmem:[%s11274_s5 + $0x20] sm:$0xff]  }
 0x297   : > { %v10830_v31 = vadd.f32 %v5012_v49, %v4940_v37  ;;  %v4955_v61 = vpop.f32.mrf.mxu0  ;;  %v7570_v37 = vld [vmem:[%s11274_s5 + $0xe0] sm:$0xff]  }
 0x298   : > { %v4956_v38 = vadd.f32 %v4955_v61, %v3686_v22  ;;  %6921 = vmatprep.subr.bf16.mxu0 %v7570_v37  ;;  %v7574_v61 = vld [vmem:[%s11274_s5 + $0xd8] sm:$0xff]  }
 0x299   : > { %v4957_v55 = vpop.f32.mrf.mxu0 }
 0x29a   : > { %v4958_v44 = vadd.f32 %v4957_v55, %v3682_v32  ;;  %v7577_v55 = vld [vmem:[%s11274_s5 + $0x50] sm:$0xff]  }
 0x29b   : > { %v4959_v7 = vpop.f32.mrf.mxu0 }
 0x29c   : > { %v4960_v47 = vadd.f32 %v4959_v7, %v3686_v22  ;;  %v7557_v22 = vld [vmem:[%s11274_s5 + $0x78] sm:$0xff]  }
 0x29d   : > { %v5016_v28 = vpop.f32.mrf.mxu1  ;;  %6893 = vmatprep.subr.bf16.mxu1 %v7557_v22  ;;  %v7585_v22 = vld [vmem:[%s11274_s5 + $0x40] sm:$0xff]  }
 0x29e   : > { %v10832_v60 = vadd.f32 %v5016_v28, %v4944_v59  ;;  %6894 = vmatpush3.bf16.msra.mxu1 %v7559_v62  ;;  %v7572_v59 = vld [vmem:[%s11274_s5 + $0xa0] sm:$0xff]   ;;  %v7573_v28 = vld [vmem:[%s11274_s5 + $0x58] sm:$0xff]  }
 0x29f   : > { %v5018_v4 = vpop.f32.mrf.mxu1  ;;  %6895 = vmatprep.subr.bf16.mxu1 %v7561_v2  ;;  %6922 = vmatpush3.bf16.msra.mxu0 %v7572_v59  ;;  %v7587_v2 = vld [vmem:[%s11274_s5] sm:$0xff]  }
 0x2a0   : > { %v10834_v12 = vadd.f32 %v5018_v4, %v4946_v54  ;;  %6923 = vmatprep.subr.bf16.mxu0 %v7574_v61 }
 0x2a1   : > { %v5020_v16 = vpop.f32.mrf.mxu1  ;;  %v10840_v35 = vpop.f32.mrf.mxu0 }
 0x2a2   : > { %v10836_v41 = vadd.f32 %v5020_v16, %v4948_v45  ;;  %6896 = vmatpush3.bf16.msra.mxu1 %v7563_v42  ;;  %v7575_v45 = vld [vmem:[%s11274_s5 + $0x18] sm:$0xff]  }
 0x2a3   : > { %v5022_v36 = vpop.f32.mrf.mxu1  ;;  %v10846_v43 = vpop.f32.mrf.mxu0  ;;  %6897 = vmatprep.subr.bf16.mxu1 %v7565_v17  ;;  %v7576_v16 = vld [vmem:[%s11274_s5 + $0x98] sm:$0xff]  }
 0x2a4   : > { %v10838_v21 = vadd.f32 %v5022_v36, %v4950_v50  ;;  %v7578_v50 = vld [vmem:[%s11274_s5 + $0xd0] sm:$0xff]   ;;  %6924 = vmatpush3.bf16.msra.mxu0 %v7576_v16 }
 0x2a5   : > { %v10852_v53 = vpop.f32.mrf.mxu0  ;;  %6925 = vmatprep.subr.bf16.mxu0 %v7578_v50 }
 0x2a6   : > { %6898 = vmatpush3.bf16.msra.mxu1 %v7567_v63  ;;  %v11357_v63 = vmov 0.0  }
 0x2a7   : > { %v10854_v34 = vpop.f32.mrf.mxu0  ;;  %6899 = vmatprep.subr.bf16.mxu1 %v7569_v13 }
 0x2a9   : > { %v5026_v19 = vpop.f32.mrf.mxu1 }
 0x2aa   : > { %v10842_v14 = vadd.f32 %v5026_v19, %v4954_v18  ;;  %6900 = vmatpush3.bf16.msra.mxu1 %v7571_v10  ;;  %v7579_v18 = vld [vmem:[%s11274_s5 + $0x10] sm:$0xff]  }
 0x2ab   : > { %v5028_v3 = vpop.f32.mrf.mxu1  ;;  %6901 = vmatprep.subr.bf16.mxu1 %v7573_v28  ;;  %v7580_v19 = vld [vmem:[%s11274_s5 + $0x90] sm:$0xff]  }
 0x2ac   : > { %v10844_v27 = vadd.f32 %v5028_v3, %v4956_v38  ;;  %v7581_v38 = vld [vmem:[%s11274_s5 + $0x48] sm:$0xff]   ;;  %6926 = vmatpush3.bf16.msra.mxu0 %v7580_v19 }
 0x2ad   : > { %v5030_v1 = vpop.f32.mrf.mxu1  ;;  %v7582_v3 = vld [vmem:[%s11274_s5 + $0xc8] sm:$0xff]  }
 0x2ae   : > { %v10848_v39 = vadd.f32 %v5030_v1, %v4958_v44  ;;  %6902 = vmatpush3.bf16.msra.mxu1 %v7575_v45  ;;  %6927 = vmatprep.subr.bf16.mxu0 %v7582_v3 }
 0x2af   : > { %v5032_v6 = vpop.f32.mrf.mxu1  ;;  %v10856_v23 = vpop.f32.mrf.mxu0  ;;  %6903 = vmatprep.subr.bf16.mxu1 %v7577_v55 }
 0x2b0   : > { %11646 = vst [vmem:[#allocation5_spill] sm:$0xff] %v10848_v39  ;;  %v10850_v29 = vadd.f32 %v5032_v6, %v4960_v47  ;;  %v7583_v47 = vld [vmem:[%s11274_s5 + $0x8] sm:$0xff]  }
 0x2b1   : > { %v10858_v20 = vpop.f32.mrf.mxu0  ;;  %v7584_v6 = vld [vmem:[%s11274_s5 + $0x88] sm:$0xff]  }
 0x2b2   : > { %11647 = vst [vmem:[#allocation6_spill] sm:$0xff] %v10850_v29  ;;  %6904 = vmatpush3.bf16.msra.mxu1 %v7579_v18  ;;  %6928 = vmatpush3.bf16.msra.mxu0 %v7584_v6 }
 0x2b3   : > { %v10862_v58 = vpop.f32.mrf.mxu0  ;;  %6905 = vmatprep.subr.bf16.mxu1 %v7581_v38  ;;  %6929 = vmatprep.subr.bf16.mxu0 %v7586_v9 }
 0x2b5   : > { %v10878_v48 = vpop.f32.mrf.mxu0 }
 0x2b6   : > { %6906 = vmatpush3.bf16.msra.mxu1 %v7583_v47  ;;  %6930 = vmatpush3.bf16.msra.mxu0 %v7588_v11 }
 0x2b7   : > { %v10894_v33 = vpop.f32.mrf.mxu0  ;;  %6907 = vmatprep.subr.bf16.mxu1 %v7585_v22 }
 0x2b9   : > { %v10916_v51 = vpop.f32.mrf.mxu0 }
 0x2ba   : > { %6908 = vmatpush3.bf16.msra.mxu1 %v7587_v2 }
 0x2bb   : > { %v10860_v32 = vpop.f32.mrf.mxu1  ;;  %v10932_v4 = vpop.f32.mrf.mxu0  ;;  %6946 = vmatprep.subr.bf16.mxu1 %v11357_v63 }
 0x2bd   : > { %v10876_v46 = vpop.f32.mrf.mxu1  ;;  %v10948_v7 = vpop.f32.mrf.mxu0 }
 0x2bf   : > { %v10892_v52 = vpop.f32.mrf.mxu1  ;;  %v10964_v1 = vpop.f32.mrf.mxu0 }
 0x2c1   : > { %v10914_v49 = vpop.f32.mrf.mxu1  ;;  %v10980_v26 = vpop.f32.mrf.mxu0 }
 0x2c3   : > { %v10930_v54 = vpop.f32.mrf.mxu1  ;;  %v10990_v8 = vpop.f32.mrf.mxu0 }
 0x2c4   : > { %11648 = vst [vmem:[#allocation31_spill] sm:$0xff] %v10990_v8 }
 0x2c5   : > { %v10946_v36 = vpop.f32.mrf.mxu1  ;;  %v10994_v15 = vpop.f32.mrf.mxu0 }
 0x2c6   : > { %11650 = vst [vmem:[#allocation67_spill] sm:$0xff] %v10994_v15 }
 0x2c7   : > { %v10962_v44 = vpop.f32.mrf.mxu1 }
 0x2c9   : > { %v10978_v62 = vpop.f32.mrf.mxu1 }
 0x2cb   : > { %v10988_v42 = vpop.f32.mrf.mxu1 }
 0x2cd   : > { %v10992_v17 = vpop.f32.mrf.mxu1 }
 0x2ce   : > { %11649 = vst [vmem:[#allocation32_spill] sm:$0xff] %v10992_v17 }
 0x2cf   : > { %v10997_v13 = vpop.f32.mrf.mxu1 }
 0x2d0   : > { %11651 = vst [vmem:[#allocation36_spill] sm:$0xff] %v10997_v13 }
 0x2d1   : > { %v10999_v10 = vpop.f32.mrf.mxu1 }
 0x2d2   : > { %11652 = vst [vmem:[#allocation37_spill] sm:$0xff] %v10999_v10 }
 0x2d3   : > { %v11001_v28 = vpop.f32.mrf.mxu1 }
 0x2d4   : > { %11653 = vst [vmem:[#allocation7_spill] sm:$0xff] %v11001_v28 }
 0x2d5   : > { %v11003_v45 = vpop.f32.mrf.mxu1 }
 0x2d6   : > { %11654 = vst [vmem:[#allocation8_spill] sm:$0xff] %v11003_v45 }
 0x2d7   : > { %v11005_v55 = vpop.f32.mrf.mxu1 }
 0x2d8   : > { %11655 = vst [vmem:[#allocation39_spill] sm:$0xff] %v11005_v55 }
 0x2d9   : > { %v11009_v18 = vpop.f32.mrf.mxu1 }
 0x2da   : > { %11656 = vst [vmem:[#allocation40_spill] sm:$0xff] %v11009_v18 }
 0x2e1   : > { %v5215_v24 = vpop.f32.mrf.mxu0 }
 0x2e3   : > { %v5217_v37 = vpop.f32.mrf.mxu0 }
 0x2e5   : > { %v5219_v59 = vpop.f32.mrf.mxu0 }
 0x2e7   : > { %v5221_v61 = vpop.f32.mrf.mxu0 }
 0x2e9   : > { %v5225_v16 = vpop.f32.mrf.mxu0 }
 0x2eb   : > { %v11007_v50 = vpop.f32.mrf.mxu0 }
 0x2ed   : > { %v11011_v38 = vpop.f32.mrf.mxu0 }
 0x2ef   : > { %v11013_v6 = vpop.f32.mrf.mxu0 }
 0x2f1   : > { %v11015_v9 = vpop.f32.mrf.mxu0 }
 0x2f2   : > { %11657 = vst [vmem:[#allocation41_spill] sm:$0xff] %v11015_v9 }
 0x2f3   : > { %v11019_v63 = vpop.f32.mrf.mxu0 }
 0x2f4   : > { %11658 = vst [vmem:[#allocation38_spill] sm:$0xff] %v11019_v63 }
 0x2f5   : > { %v11025_v18 = vpop.f32.mrf.mxu0 }
 0x2f6   : > { %11660 = vst [vmem:[#allocation45_spill] sm:$0xff] %v11025_v18 }
 0x2f7   : > { %v11031_v15 = vpop.f32.mrf.mxu0 }
 0x2f8   : > { %11663 = vst [vmem:[#allocation47_spill] sm:$0xff] %v11031_v15 }
 0x2f9   : > { %v11037_v9 = vpop.f32.mrf.mxu0 }
 0x2fa   : > { %11666 = vst [vmem:[#allocation75_spill] sm:$0xff] %v11037_v9 }
 0x2fb   : > { %v5288_v19 = vpop.f32.mrf.mxu1  ;;  %v11043_v39 = vpop.f32.mrf.mxu0 }
 0x2fc   : > { %11669 = vst [vmem:[#allocation33_spill] sm:$0xff] %v11043_v39 }
 0x2fd   : > { %v5290_v3 = vpop.f32.mrf.mxu1  ;;  %v11051_v15 = vpop.f32.mrf.mxu0 }
 0x2fe   : > { %11672 = vst [vmem:[#allocation53_spill] sm:$0xff] %v11051_v15 }
 0x2ff   : > { %v5292_v47 = vpop.f32.mrf.mxu1 }
 0x301   : > { %v5294_v22 = vpop.f32.mrf.mxu1 }
 0x303   : > { %v5298_v2 = vpop.f32.mrf.mxu1 }
 0x305   : > { %v11017_v11 = vpop.f32.mrf.mxu1 }
 0x307   : > { %v11021_v55 = vpop.f32.mrf.mxu1 }
 0x309   : > { %v11023_v45 = vpop.f32.mrf.mxu1 }
 0x30a   : > { %11659 = vst [vmem:[#allocation44_spill] sm:$0xff] %v11023_v45 }
 0x30b   : > { %v11027_v28 = vpop.f32.mrf.mxu1 }
 0x30c   : > { %11661 = vst [vmem:[#allocation9_spill] sm:$0xff] %v11027_v28  ;;  %v11059_v28 = vpop.f32.mrf.mxu0 }
 0x30d   : > { %v11029_v10 = vpop.f32.mrf.mxu1 }
 0x30e   : > { %11662 = vst [vmem:[#allocation10_spill] sm:$0xff] %v11029_v10  ;;  %v5070_v10 = vadd.f32 %v10840_v35, %v10816_v57  ;;  %v5076_v57 = vadd.f32 %v10854_v34, %v10822_v0 }
 0x30f   : > { %v11033_v29 = vpop.f32.mrf.mxu1 }
 0x310   : > { %11664 = vst [vmem:[#allocation48_spill] sm:$0xff] %v11033_v29  ;;  %v5143_v9 = vadd.f32 %v10860_v32, %v5070_v10 }
 0x311   : > { %v11035_v13 = vpop.f32.mrf.mxu1 }
 0x312   : > { %11665 = vst [vmem:[#allocation42_spill] sm:$0xff] %v11035_v13  ;;  %v5072_v13 = vadd.f32 %v10846_v43, %v10818_v25  ;;  %v5080_v25 = vadd.f32 %v10856_v23, %v10824_v30  ;;  %v5084_v30 = vadd.f32 %v10862_v58, %v10828_v5 }
 0x313   : > { %v11039_v8 = vpop.f32.mrf.mxu1 }
 0x314   : > { %11667 = vst [vmem:[#allocation71_spill] sm:$0xff] %v11039_v8  ;;  %v5145_v39 = vadd.f32 %v10876_v46, %v5072_v13  ;;  %v5082_v13 = vadd.f32 %v10858_v20, %v10826_v56  ;;  %v5153_v10 = vadd.f32 %v10930_v54, %v5080_v25  ;;  %v5086_v56 = vadd.f32 %v10878_v48, %v10830_v31 }
 0x315   : > { %v11041_v63 = vpop.f32.mrf.mxu1  ;;  %v5157_v20 = vadd.f32 %v10962_v44, %v5084_v30 }
 0x316   : > { %11668 = vst [vmem:[#allocation76_spill] sm:$0xff] %v11041_v63  ;;  %v5074_v63 = vadd.f32 %v10852_v53, %v10820_v40  ;;  %v5218_v15 = vadd.f32 %v5217_v37, %v5145_v39  ;;  %v5149_v40 = vadd.f32 %v10914_v49, %v5076_v57  ;;  %v5155_v23 = vadd.f32 %v10946_v36, %v5082_v13  ;;  %v11679_v13 = vld [vmem:[#allocation6_spill] sm:$0xff] }
 0x317   : > { %v11045_v45 = vpop.f32.mrf.mxu1  ;;  %v5226_v37 = vadd.f32 %v5225_v16, %v5153_v10  ;;  %v5090_v36 = vadd.f32 %v10894_v33, %v10832_v60  ;;  %v5230_v16 = vadd.f32 %v11011_v38, %v5157_v20  ;;  %v5096_v60 = vadd.f32 %v10948_v7, %v10838_v21  ;;  %v11674_v21 = vld [vmem:[#allocation5_spill] sm:$0xff]  ;;  %v11675_v7 = vld [vmem:[#allocation31_spill] sm:$0xff]  ;;  %v11687_v20 = vld [vmem:[#allocation40_spill] sm:$0xff] }
 0x318   : > { %11670 = vst [vmem:[#allocation49_spill] sm:$0xff] %v11045_v45  ;;  %v5216_v45 = vadd.f32 %v5215_v24, %v5143_v9  ;;  %v5147_v35 = vadd.f32 %v10892_v52, %v5074_v63  ;;  %v5291_v46 = vadd.f32 %v5290_v3, %v5218_v15  ;;  %v5222_v52 = vadd.f32 %v5221_v61, %v5149_v40  ;;  %v11680_v10 = vld [vmem:[#allocation67_spill] sm:$0xff] }
 0x319   : > { %v11047_v18 = vpop.f32.mrf.mxu1  ;;  %v5228_v3 = vadd.f32 %v11007_v50, %v5155_v23  ;;  %v5163_v33 = vadd.f32 %v10988_v42, %v5090_v36  ;;  %v5104_v25 = vadd.f32 %v11675_v7, %v11674_v21  ;;  %v11683_v23 = vld [vmem:[#allocation38_spill] sm:$0xff] }
 0x31a   : > { %11671 = vst [vmem:[#allocation52_spill] sm:$0xff] %v11047_v18  ;;  %v5289_v17 = vadd.f32 %v5288_v19, %v5216_v45  ;;  %v5220_v53 = vadd.f32 %v5219_v59, %v5147_v35  ;;  %v5295_v15 = vadd.f32 %v5294_v22, %v5222_v52  ;;  %v11682_v52 = vld [vmem:[#allocation7_spill] sm:$0xff] }
 0x31b   : > { %v5434_v29 = vpop.f32.mrf.mxu1  ;;  %v5301_v44 = vadd.f32 %v11017_v11, %v5228_v3  ;;  %v11688_v3 = vld [vmem:[#allocation45_spill] sm:$0xff] }
 0x31c   : > { %v5293_v39 = vadd.f32 %v5292_v47, %v5220_v53  ;;  %v5299_v47 = vadd.f32 %v5298_v2, %v5226_v37  ;;  %v5094_v2 = vadd.f32 %v10932_v4, %v10836_v41  ;;  %v5102_v41 = vadd.f32 %v10980_v26, %v10844_v27  ;;  %v11673_v4 = vld [vmem:[#allocation32_spill] sm:$0xff]  ;;  %v11681_v26 = vld [vmem:[#allocation37_spill] sm:$0xff] }
 0x31d   : > { %v5436_v8 = vpop.f32.mrf.mxu1  ;;  %v5106_v27 = vadd.f32 %v11680_v10, %v11679_v13 }
 0x31f   : > { %v5438_v18 = vpop.f32.mrf.mxu1 }
 0x321   : > { %v5440_v43 = vpop.f32.mrf.mxu1  ;;  %v5361_v32 = vpop.f32.mrf.mxu0 }
 0x322   : > { %v5362_v24 = vadd.f32 %v5361_v32, %v5289_v17  ;;  %v11677_v32 = vld [vmem:[#allocation44_spill] sm:$0xff] }
 0x323   : > { %v5444_v0 = vpop.f32.mrf.mxu1  ;;  %v5363_v34 = vpop.f32.mrf.mxu0 }
 0x324   : > { %v5364_v63 = vadd.f32 %v5363_v34, %v5291_v46  ;;  %v5435_v17 = vadd.f32 %v5434_v29, %v5362_v24  ;;  %v5092_v29 = vadd.f32 %v10916_v51, %v10834_v12  ;;  %v5100_v12 = vadd.f32 %v10964_v1, %v10842_v14  ;;  %v11676_v14 = vld [vmem:[#allocation41_spill] sm:$0xff]  ;;  %v11678_v46 = vld [vmem:[#allocation36_spill] sm:$0xff] }
 0x325   : > { %v5446_v49 = vpop.f32.mrf.mxu1  ;;  %v5365_v59 = vpop.f32.mrf.mxu0  ;;  %v5236_v1 = vadd.f32 %v11676_v14, %v5163_v33  ;;  %v5167_v24 = vadd.f32 %v11678_v46, %v5094_v2  ;;  %v5169_v34 = vadd.f32 %v11681_v26, %v5096_v60 }
 0x326   : > { %v5437_v45 = vadd.f32 %v5436_v8, %v5364_v63  ;;  %v5366_v19 = vadd.f32 %v5365_v59, %v5293_v39  ;;  %v5159_v8 = vadd.f32 %v10978_v62, %v5086_v56  ;;  %v5165_v35 = vadd.f32 %v11673_v4, %v5092_v29  ;;  %v11684_v59 = vld [vmem:[#allocation9_spill] sm:$0xff] }
 0x327   : > { %v5448_v54 = vpop.f32.mrf.mxu1  ;;  %v5367_v61 = vpop.f32.mrf.mxu0  ;;  %v5173_v39 = vadd.f32 %v11682_v52, %v5100_v12  ;;  %v11690_v12 = vld [vmem:[#allocation47_spill] sm:$0xff] }
 0x328   : > { %v5473_v5 = vmax.f32 %v5435_v17, %v5437_v45  ;;  %v5368_v58 = vadd.f32 %v5367_v61, %v5295_v15  ;;  %v5439_v22 = vadd.f32 %v5438_v18, %v5366_v19  ;;  %v5232_v38 = vadd.f32 %v11013_v6, %v5159_v8  ;;  %v11686_v19 = vld [vmem:[#allocation39_spill] sm:$0xff] }
 0x329   : > { %v5450_v31 = vpop.f32.mrf.mxu1  ;;  %v5371_v48 = vpop.f32.mrf.mxu0  ;;  %v5303_v18 = vadd.f32 %v11021_v55, %v5230_v16  ;;  %v5238_v37 = vadd.f32 %v11683_v23, %v5165_v35  ;;  %v5309_v15 = vadd.f32 %v11684_v59, %v5236_v1  ;;  %v5177_v56 = vadd.f32 %v11686_v19, %v5104_v25  ;;  %v11689_v16 = vld [vmem:[#allocation10_spill] sm:$0xff]  ;;  %v11694_v1 = vld [vmem:[#allocation53_spill] sm:$0xff] }
 0x32a   : > { %5481 = vst [vmem:[#allocation3] sm:$0xff] %v5473_v5  ;;  %v5441_v50 = vadd.f32 %v5440_v43, %v5368_v58  ;;  %v5372_v9 = vadd.f32 %v5371_v48, %v5299_v47  ;;  %v5305_v40 = vadd.f32 %v11677_v32, %v5232_v38  ;;  %v5179_v61 = vadd.f32 %v11687_v20, %v5106_v27  ;;  %v11695_v32 = vld [vmem:[#allocation42_spill] sm:$0xff] }
 0x32b   : > { %v11091_v51 = vpop.f32.mrf.mxu1  ;;  %v5373_v62 = vpop.f32.mrf.mxu0  ;;  %v5240_v47 = vadd.f32 %v11688_v3, %v5167_v24  ;;  %v5311_v48 = vadd.f32 %v11689_v16, %v5238_v37  ;;  %v5242_v33 = vadd.f32 %v11690_v12, %v5169_v34  ;;  %v11698_v3 = vld [vmem:[#allocation49_spill] sm:$0xff] }
 0x32c   : > { %v5474_v11 = vmax.f32 %v5439_v22, %v5441_v50  ;;  %v5374_v57 = vadd.f32 %v5373_v62, %v5301_v44  ;;  %v5445_v6 = vadd.f32 %v5444_v0, %v5372_v9  ;;  %v11691_v62 = vld [vmem:[#allocation75_spill] sm:$0xff] }
 0x32d   : > { %v5456_v42 = vpop.f32.mrf.mxu1  ;;  %v5375_v43 = vpop.f32.mrf.mxu0  ;;  %v5246_v38 = vadd.f32 %v11691_v62, %v5173_v39 }
 0x32e   : > { %5482 = vst [vmem:[#allocation3 + $0x8] sm:$0xff] %v5474_v11  ;;  %v5447_v53 = vadd.f32 %v5446_v49, %v5374_v57  ;;  %v5376_v55 = vadd.f32 %v5375_v43, %v5303_v18  ;;  %v11685_v49 = vld [vmem:[#allocation8_spill] sm:$0xff]  ;;  %v5250_v43 = vadd.f32 %v11694_v1, %v5177_v56 }
 0x32f   : > { %v11107_v63 = vpop.f32.mrf.mxu1  ;;  %v5377_v30 = vpop.f32.mrf.mxu0  ;;  %v5175_v45 = vadd.f32 %v11685_v49, %v5102_v41  ;;  %v11692_v41 = vld [vmem:[#allocation48_spill] sm:$0xff] }
 0x330   : > { %v5475_v17 = vmax.f32 %v5445_v6, %v5447_v53  ;;  %v5378_v0 = vadd.f32 %v5377_v30, %v5305_v40  ;;  %v5449_v44 = vadd.f32 %v5448_v54, %v5376_v55  ;;  %v5313_v4 = vadd.f32 %v11692_v41, %v5240_v47  ;;  %v11693_v54 = vld [vmem:[#allocation33_spill] sm:$0xff]  ;;  %v11696_v6 = vld [vmem:[#allocation71_spill] sm:$0xff] }
 0x331   : > { %v5460_v5 = vpop.f32.mrf.mxu1  ;;  %v5381_v58 = vpop.f32.mrf.mxu0  ;;  %v5489_v36 = vld [vmem:[#allocation3] sm:$0x1]  ;;  %v5497_v29 = vld [vmem:[#allocation3 + $0x1] sm:$0x1]  ;;  %v5521_v8 = vld [vmem:[#allocation3 + $0x2] sm:$0x1]  ;;  %v5315_v40 = vadd.f32 %v11695_v32, %v5242_v33  ;;  %v5319_v53 = vadd.f32 %v11696_v6, %v5246_v38  ;;  %v5323_v47 = vadd.f32 %v11698_v3, %v5250_v43 }
 0x332   : > { %5483 = vst [vmem:[#allocation3 + $0x10] sm:$0xff] %v5475_v17  ;;  %v5451_v22 = vadd.f32 %v5450_v31, %v5378_v0  ;;  %v5382_v50 = vadd.f32 %v5381_v58, %v5309_v15  ;;  %v5529_v9 = vld [vmem:[#allocation3 + $0x3] sm:$0x1]  ;;  %v5553_v2 = vld [vmem:[#allocation3 + $0x4] sm:$0x1]  ;;  %v5505_v11 = vmax.f32 %v5489_v36, %v5497_v29  ;;  %v5248_v31 = vadd.f32 %v11693_v54, %v5175_v45 }
 0x333   : > { %v5561_v60 = vld [vmem:[#allocation3 + $0x5] sm:$0x1]  ;;  %v5383_v18 = vpop.f32.mrf.mxu0  ;;  %v5537_v57 = vmax.f32 %v5521_v8, %v5529_v9  ;;  %v5585_v25 = vld [vmem:[#allocation3 + $0x6] sm:$0x1]  ;;  %v5593_v14 = vld [vmem:[#allocation3 + $0x7] sm:$0x1]  ;;  %v5464_v55 = vpop.f32.mrf.mxu1 }
 0x334   : > { %v5476_v35 = vmax.f32 %v5449_v44, %v5451_v22  ;;  %v5384_v21 = vadd.f32 %v5383_v18, %v5311_v48  ;;  %v5569_v7 = vmax.f32 %v5553_v2, %v5561_v60  ;;  %v5455_v27 = vadd.f32 %v11091_v51, %v5382_v50 }
 0x335   : > { %v5385_v46 = vpop.f32.mrf.mxu0  ;;  %v5490_v24 = vld [vmem:[#allocation3 + $0x8] sm:$0x1]  ;;  %v5498_v13 = vld [vmem:[#allocation3 + $0x9] sm:$0x1]  ;;  %v5522_v10 = vld [vmem:[#allocation3 + $0xa] sm:$0x1]  ;;  %v5601_v0 = vmax.f32 %v5585_v25, %v5593_v14  ;;  %v5252_v51 = vadd.f32 %v11059_v28, %v5179_v61  ;;  %v5466_v58 = vpop.f32.mrf.mxu1 }
 0x336   : > { %5484 = vst [vmem:[#allocation3 + $0x18] sm:$0xff] %v5476_v35  ;;  %v5457_v26 = vadd.f32 %v5456_v42, %v5384_v21  ;;  %v5386_v34 = vadd.f32 %v5385_v46, %v5313_v4  ;;  %v5506_v52 = vmax.f32 %v5490_v24, %v5498_v13  ;;  %v5530_v39 = vld [vmem:[#allocation3 + $0xb] sm:$0x1]  ;;  %v5554_v30 = vld [vmem:[#allocation3 + $0xc] sm:$0x1]  ;;  %v11124_v37 = vmax.f32 %v5505_v11, 0.0 }
 0x337   : > { %v5387_v23 = vpop.f32.mrf.mxu0  ;;  %v5538_v59 = vmax.f32 %v5522_v10, %v5530_v39  ;;  %v11126_v15 = vmax.f32 %v5537_v57, 0.0  ;;  %v5562_v17 = vld [vmem:[#allocation3 + $0xd] sm:$0x1]  ;;  %v11130_v56 = vmax.f32 %v5569_v7, 0.0  ;;  %v11697_v42 = vld [vmem:[#allocation76_spill] sm:$0xff]  ;;  %v11140_v38 = vmax.f32 %v5601_v0, 0.0  ;;  %v5468_v4 = vpop.f32.mrf.mxu1 }
 0x338   : > { %v5477_v49 = vmax.f32 %v5455_v27, %v5457_v26  ;;  %v5388_v45 = vadd.f32 %v5387_v23, %v5315_v40  ;;  %v11128_v19 = vmax.f32 %v5506_v52, 0.0  ;;  %v5321_v20 = vadd.f32 %v11697_v42, %v5248_v31  ;;  %v11151_v39 = vld [vmem:[#allocation3 + $0xf] sm:$0x1] }
 0x339   : > { %v5391_v36 = vpop.f32.mrf.mxu0  ;;  %v5491_v29 = vld [vmem:[#allocation3 + $0x10] sm:$0x1]  ;;  %v5499_v8 = vld [vmem:[#allocation3 + $0x11] sm:$0x1]  ;;  %v5523_v16 = vld [vmem:[#allocation3 + $0x12] sm:$0x1]  ;;  %v5570_v48 = vmax.f32 %v5554_v30, %v5562_v17  ;;  %v5459_v44 = vadd.f32 %v11107_v63, %v5386_v34  ;;  %v5470_v30 = vpop.f32.mrf.mxu1 }
 0x33a   : > { %5485 = vst [vmem:[#allocation3 + $0x20] sm:$0xff] %v5477_v49  ;;  %v5461_v22 = vadd.f32 %v5460_v5, %v5388_v45  ;;  %v5392_v50 = vadd.f32 %v5391_v36, %v5319_v53  ;;  %v5507_v9 = vmax.f32 %v5491_v29, %v5499_v8  ;;  %v5531_v2 = vld [vmem:[#allocation3 + $0x13] sm:$0x1]  ;;  %v5555_v60 = vld [vmem:[#allocation3 + $0x14] sm:$0x1]  ;;  %v11136_v12 = vmax.f32 %v5538_v59, 0.0 }
 0x33b   : > { %v5393_v28 = vpop.f32.mrf.mxu0  ;;  %v5539_v61 = vmax.f32 %v5523_v16, %v5531_v2  ;;  %v5563_v33 = vld [vmem:[#allocation3 + $0x15] sm:$0x1]  ;;  %v11138_v62 = vmax.f32 %v5570_v48, 0.0  ;;  %v5625_v63 = vrot.slane %v11128_v19, 7  ;;  %v11699_v5 = vld [vmem:[#allocation52_spill] sm:$0xff] }
 0x33c   : > { %v5478_v18 = vmax.f32 %v5459_v44, %v5461_v22  ;;  %v5394_v11 = vadd.f32 %v5393_v28, %v5321_v20  ;;  %v5515_v57 = vmax.f32 %v5507_v9, 0.0  ;;  %v5325_v41 = vadd.f32 %v11699_v5, %v5252_v51  ;;  %v11161_v22 = vld [vmem:[#allocation3 + $0x16] sm:$0x1]  ;;  %v11165_v9 = vld [vmem:[#allocation3 + $0x17] sm:$0x1] }
 0x33d   : > { %v5395_v35 = vpop.f32.mrf.mxu0  ;;  %v5492_v21 = vld [vmem:[#allocation3 + $0x18] sm:$0x1]  ;;  %v5500_v7 = vld [vmem:[#allocation3 + $0x19] sm:$0x1]  ;;  %v5524_v25 = vld [vmem:[#allocation3 + $0x1a] sm:$0x1]  ;;  %v5571_v14 = vmax.f32 %v5555_v60, %v5563_v33  ;;  %v5465_v54 = vadd.f32 %v5464_v55, %v5392_v50  ;;  %v5627_v49 = vsel %vm5626_vm14, %v5625_v63, %v11124_v37 }
 0x33e   : > { %5486 = vst [vmem:[#allocation3 + $0x28] sm:$0xff] %v5478_v18  ;;  %v5467_v31 = vadd.f32 %v5466_v58, %v5394_v11  ;;  %v5396_v1 = vadd.f32 %v5395_v35, %v5323_v47  ;;  %v5508_v43 = vmax.f32 %v5492_v21, %v5500_v7  ;;  %v5532_v32 = vld [vmem:[#allocation3 + $0x1b] sm:$0x1]  ;;  %v5556_v40 = vld [vmem:[#allocation3 + $0x1c] sm:$0x1]  ;;  %v11144_v46 = vmax.f32 %v5539_v61, 0.0 }
 0x33f   : > { %v5397_v6 = vpop.f32.mrf.mxu0  ;;  %v5540_v53 = vmax.f32 %v5524_v25, %v5532_v32  ;;  %v5564_v24 = vld [vmem:[#allocation3 + $0x1d] sm:$0x1]  ;;  %v11146_v13 = vmax.f32 %v5571_v14, 0.0  ;;  %v5628_v10 = vrot.slane %v5515_v57, 6  ;;  %v5655_v52 = vrot.slane %v11136_v12, 7 }
 0x340   : > { %v5479_v27 = vmax.f32 %v5465_v54, %v5467_v31  ;;  %v5398_v26 = vadd.f32 %v5397_v6, %v5325_v41  ;;  %v5516_v34 = vmax.f32 %v5508_v43, 0.0  ;;  %v11149_v55 = vld [vmem:[#allocation3 + $0xe] sm:$0x1]  ;;  %v5572_v0 = vmax.f32 %v5556_v40, %v5564_v24  ;;  %v11163_v50 = vld [vmem:[#allocation3 + $0x1e] sm:$0x1] }
 0x341   : > { %v5493_v23 = vld [vmem:[#allocation3 + $0x20] sm:$0x1]  ;;  %v5501_v59 = vld [vmem:[#allocation3 + $0x21] sm:$0x1]  ;;  %v5525_v17 = vld [vmem:[#allocation3 + $0x22] sm:$0x1]  ;;  %v5469_v45 = vadd.f32 %v5468_v4, %v5396_v1  ;;  %v5630_v12 = vsel %vm5629_vm15, %v5628_v10, %v5627_v49  ;;  %v5602_v33 = vmax.f32 %v11149_v55, %v11151_v39  ;;  %v5656_v5 = vsel %vm5626_vm14, %v5655_v52, %v11126_v15 }
 0x342   : > { %5487 = vst [vmem:[#allocation3 + $0x30] sm:$0xff] %v5479_v27  ;;  %v5471_v19 = vadd.f32 %v5470_v30, %v5398_v26  ;;  %v5509_v51 = vmax.f32 %v5493_v23, %v5501_v59  ;;  %v5533_v42 = vld [vmem:[#allocation3 + $0x23] sm:$0x1]  ;;  %v5548_v20 = vmax.f32 %v5540_v53, 0.0  ;;  %v5557_v3 = vld [vmem:[#allocation3 + $0x24] sm:$0x1] }
 0x343   : > { %v5541_v47 = vmax.f32 %v5525_v17, %v5533_v42  ;;  %v5565_v58 = vld [vmem:[#allocation3 + $0x25] sm:$0x1]  ;;  %v11155_v36 = vmax.f32 %v5572_v0, 0.0  ;;  %v5631_v29 = vrot.slane %v5516_v34, 5  ;;  %v5657_v8 = vrot.slane %v11144_v46, 6 }
 0x344   : > { %v5480_v16 = vmax.f32 %v5469_v45, %v5471_v19  ;;  %v11158_v48 = vmax.f32 %v5509_v51, 0.0  ;;  %v5573_v44 = vmax.f32 %v5557_v3, %v5565_v58  ;;  %v5678_v37 = vrot.slane %v11138_v62, 7  ;;  %v11167_v2 = vld [vmem:[#allocation3 + $0x1f] sm:$0x1]  ;;  %v11179_v1 = vld [vmem:[#allocation3 + $0x26] sm:$0x1] }
 0x345   : > { %v5494_v60 = vld [vmem:[#allocation3 + $0x28] sm:$0x1]  ;;  %v5502_v28 = vld [vmem:[#allocation3 + $0x29] sm:$0x1]  ;;  %v5526_v61 = vld [vmem:[#allocation3 + $0x2a] sm:$0x1]  ;;  %v5633_v6 = vsel %vm5632_vm0, %v5631_v29, %v5630_v12  ;;  %v5658_v53 = vsel %vm5629_vm15, %v5657_v8, %v5656_v5  ;;  %v5603_v46 = vmax.f32 %v11161_v22, %v11165_v9  ;;  %v5604_v24 = vmax.f32 %v11163_v50, %v11167_v2 }
 0x346   : > { %5488 = vst [vmem:[#allocation3 + $0x38] sm:$0xff] %v5480_v16  ;;  %v5510_v18 = vmax.f32 %v5494_v60, %v5502_v28  ;;  %v5534_v11 = vld [vmem:[#allocation3 + $0x2b] sm:$0x1]  ;;  %v5549_v62 = vmax.f32 %v5541_v47, 0.0  ;;  %v5558_v57 = vld [vmem:[#allocation3 + $0x2c] sm:$0x1]  ;;  %v5679_v52 = vsel %vm5626_vm14, %v5678_v37, %v11130_v56 }
 0x347   : > { %v11172_v63 = vmax.f32 %v5573_v44, 0.0  ;;  %v5542_v41 = vmax.f32 %v5526_v61, %v5534_v11  ;;  %v5566_v4 = vld [vmem:[#allocation3 + $0x2d] sm:$0x1]  ;;  %v5634_v35 = vrot.slane %v11158_v48, 4  ;;  %v5659_v21 = vrot.slane %v5548_v20, 5 }
 0x348   : > { %v5680_v7 = vrot.slane %v11146_v13, 6  ;;  %v5518_v25 = vmax.f32 %v5510_v18, 0.0  ;;  %v5574_v14 = vmax.f32 %v5558_v57, %v5566_v4  ;;  %v5661_v54 = vrot.slane %v5549_v62, 4  ;;  %v11181_v43 = vld [vmem:[#allocation3 + $0x27] sm:$0x1] }
 0x349   : > { %v5682_v31 = vrot.slane %v11155_v36, 5  ;;  %v5495_v32 = vld [vmem:[#allocation3 + $0x30] sm:$0x1]  ;;  %v5503_v40 = vld [vmem:[#allocation3 + $0x31] sm:$0x1]  ;;  %v5550_v27 = vmax.f32 %v5542_v41, 0.0  ;;  %v5660_v17 = vsel %vm5632_vm0, %v5659_v21, %v5658_v53  ;;  %v5636_v56 = vsel %vm5635_vm1, %v5634_v35, %v5633_v6 }
 0x34a   : > { %v5527_v15 = vld [vmem:[#allocation3 + $0x32] sm:$0x1]  ;;  %v5511_v13 = vmax.f32 %v5495_v32, %v5503_v40  ;;  %v5535_v10 = vld [vmem:[#allocation3 + $0x33] sm:$0x1]  ;;  %v5559_v26 = vld [vmem:[#allocation3 + $0x34] sm:$0x1]  ;;  %v5662_v29 = vsel %vm5635_vm1, %v5661_v54, %v5660_v17  ;;  %v5681_v8 = vsel %vm5629_vm15, %v5680_v7, %v5679_v52  ;;  %v5605_v16 = vmax.f32 %v11179_v1, %v11181_v43 }
 0x34b   : > { %v11189_v34 = vmax.f32 %v5574_v14, 0.0  ;;  %v5543_v30 = vmax.f32 %v5527_v15, %v5535_v10  ;;  %v5567_v23 = vld [vmem:[#allocation3 + $0x35] sm:$0x1]  ;;  %v5637_v59 = vrot.slane %v5518_v25, 3  ;;  %v5684_v0 = vrot.slane %v11172_v63, 4 }
 0x34c   : > { %v5590_v49 = vld [vmem:[#allocation3 + $0x2e] sm:$0x1]  ;;  %v5519_v45 = vmax.f32 %v5511_v13, 0.0  ;;  %v5575_v19 = vmax.f32 %v5559_v26, %v5567_v23  ;;  %v5663_v51 = vrot.slane %v5550_v27, 3  ;;  %v5591_v20 = vld [vmem:[#allocation3 + $0x36] sm:$0x1]  ;;  %v5683_v9 = vsel %vm5632_vm0, %v5682_v31, %v5681_v8 }
 0x34d   : > { %v5686_v42 = vrot.slane %v11189_v34, 3  ;;  %v5598_v3 = vld [vmem:[#allocation3 + $0x2f] sm:$0x1]  ;;  %v5496_v47 = vld [vmem:[#allocation3 + $0x38] sm:$0x1]  ;;  %v5551_v37 = vmax.f32 %v5543_v30, 0.0  ;;  %v5639_v28 = vsel %vm5638_vm2, %v5637_v59, %v5636_v56 }
 0x34e   : > { %v5504_v58 = vld [vmem:[#allocation3 + $0x39] sm:$0x1]  ;;  %v5528_v36 = vld [vmem:[#allocation3 + $0x3a] sm:$0x1]  ;;  %v5536_v44 = vld [vmem:[#allocation3 + $0x3b] sm:$0x1]  ;;  %v5606_v12 = vmax.f32 %v5590_v49, %v5598_v3  ;;  %v5664_v62 = vsel %vm5638_vm2, %v5663_v51, %v5662_v29 }
 0x34f   : > { %v5512_v48 = vmax.f32 %v5496_v47, %v5504_v58  ;;  %v5560_v22 = vld [vmem:[#allocation3 + $0x3c] sm:$0x1]  ;;  %v5583_v50 = vmax.f32 %v5575_v19, 0.0  ;;  %v5544_v2 = vmax.f32 %v5528_v36, %v5536_v44  ;;  %v5568_v60 = vld [vmem:[#allocation3 + $0x3d] sm:$0x1]  ;;  %v5640_v61 = vrot.slane %v5519_v45, 2 }
 0x350   : > { %v5576_v11 = vmax.f32 %v5560_v22, %v5568_v60  ;;  %v5665_v57 = vrot.slane %v5551_v37, 2  ;;  %v5592_v63 = vld [vmem:[#allocation3 + $0x3e] sm:$0x1]  ;;  %v5599_v5 = vld [vmem:[#allocation3 + $0x37] sm:$0x1]  ;;  %v5610_v7 = vmax.f32 %v5602_v33, 0.0 }
 0x351   : > { %v5520_v18 = vmax.f32 %v5512_v48, 0.0  ;;  %v5552_v41 = vmax.f32 %v5544_v2, 0.0  ;;  %v5688_v4 = vrot.slane %v5583_v50, 2  ;;  %v5600_v35 = vld [vmem:[#allocation3 + $0x3f] sm:$0x1]  ;;  %v5607_v21 = vmax.f32 %v5591_v20, %v5599_v5  ;;  %v7591_v8 = vld [vmem:[%s11276_s7 + $0x28] sm:$0xff]  }
 0x352   : > { %v5584_v25 = vmax.f32 %v5576_v11, 0.0  ;;  %v5642_v14 = vsel %vm5641_vm3, %v5640_v61, %v5639_v28  ;;  %v5611_v31 = vmax.f32 %v5603_v46, 0.0  ;;  %v5608_v43 = vmax.f32 %v5592_v63, %v5600_v35  ;;  %v7589_v46 = vld [vmem:[%s11276_s7 + $0x38] sm:$0xff]   ;;  %v7594_v44 = vld [vmem:[%s11276_s7 + $0x10] sm:$0xff]   ;;  %v7595_v37 = vld [vmem:[%s11276_s7 + $0x8] sm:$0xff]  }
 0x353   : > { %v5643_v54 = vrot.slane %v5520_v18, 1  ;;  %v5667_v1 = vrot.slane %v5552_v41, 1  ;;  %v5612_v32 = vmax.f32 %v5604_v24, 0.0  ;;  %v5613_v40 = vmax.f32 %v5605_v16, 0.0  ;;  %v7592_v16 = vld [vmem:[%s11276_s7 + $0x20] sm:$0xff]   ;;  %v7593_v48 = vld [vmem:[%s11276_s7 + $0x18] sm:$0xff]  }
 0x354   : > { %v5666_v6 = vsel %vm5641_vm3, %v5665_v57, %v5664_v62  ;;  %v5614_v53 = vmax.f32 %v5606_v12, 0.0  ;;  %v5615_v13 = vmax.f32 %v5607_v21, 0.0  ;;  %v5616_v55 = vmax.f32 %v5608_v43, 0.0  ;;  %v7596_v22 = vld [vmem:[%s11276_s7] sm:$0xff]  }
 0x355   : > { %v5645_v15 = vsel %vm5644_vm4, %v5643_v54, %v5642_v14  ;;  %v5668_v10 = vsel %vm5644_vm4, %v5667_v1, %v5666_v6  ;;  %v5701_v39 = vrot.slane %v5610_v7, 7  ;;  %v5690_v33 = vrot.slane %v5584_v25, 1  ;;  %v6816_v28 = vld [vmem:[%s11275_s6] ss:$0 sm:$0xff] }
 0x356   : > { %v5716_v27 = vpack.c.bf16 %v5645_v15, %v5645_v15  ;;  %v5717_v26 = vpack.c.bf16 %v5668_v10, %v5668_v10  ;;  %v5703_v34 = vrot.slane %v5611_v31, 6  ;;  %v5705_v52 = vrot.slane %v5612_v32, 5  ;;  %v6849_v35 = vld [vmem:[%s11277_s8] ss:$0 sm:$0xff] }
 0x357   : > { %v5685_v24 = vsel %vm5635_vm1, %v5684_v0, %v5683_v9  ;;  %v5702_v30 = vsel %vm5626_vm14, %v5701_v39, %v11140_v38  ;;  %v5707_v23 = vrot.slane %v5613_v40, 4  ;;  %v5709_v59 = vrot.slane %v5614_v53, 3  ;;  %v7590_v38 = vld [vmem:[%s11276_s7 + $0x30] sm:$0xff]  }
 0x358   : > { %v5687_v17 = vsel %vm5638_vm2, %v5686_v42, %v5685_v24  ;;  %6015 = vmatprep.mubr.bf16.mxu1 %v5717_v26  ;;  %v5704_v49 = vsel %vm5629_vm15, %v5703_v34, %v5702_v30  ;;  %v5711_v45 = vrot.slane %v5615_v13, 2  ;;  %v5713_v20 = vrot.slane %v5616_v55, 1 }
 0x359   : > { %v5689_v19 = vsel %vm5641_vm3, %v5688_v4, %v5687_v17  ;;  %v5706_v51 = vsel %vm5632_vm0, %v5705_v52, %v5704_v49  ;;  %6016 = vmatmul.mubr.bf16.vlgmr.msra.gmra.mxu1 %v5716_v27  ;;  %v11700_v47 = vmov 0.0  }
 0x35a   : > { %v5691_v3 = vsel %vm5644_vm4, %v5690_v33, %v5689_v19  ;;  %v5708_v0 = vsel %vm5635_vm1, %v5707_v23, %v5706_v51  ;;  %6947 = vmatpush3.bf16.msra.mxu1 %v7589_v46  ;;  %6962 = vmatprep.mubr.msk.bf16.mxu1 %vm7635_vm5, %v11700_v47 }
 0x35b   : > { %v5710_v42 = vsel %vm5638_vm2, %v5709_v59, %v5708_v0  ;;  %6948 = vmatprep.subr.bf16.mxu1 %v11700_v47  ;;  %v5718_v36 = vpack.c.bf16 %v5691_v3, %v5691_v3 }
 0x35c   : > { %v5712_v58 = vsel %vm5641_vm3, %v5711_v45, %v5710_v42 }
 0x35d   : > { %v5714_v56 = vsel %vm5644_vm4, %v5713_v20, %v5712_v58 }
 0x35e   : > { %v5719_v29 = vpack.c.bf16 %v5714_v56, %v5714_v56  ;;  %6949 = vmatpush3.bf16.msra.mxu1 %v7590_v38 }
 0x35f   : > { %6950 = vmatprep.subr.bf16.mxu1 %v11700_v47 }
 0x360   : > { %6055 = vmatprep.mubr.bf16.mxu0 %v5719_v29 }
 0x361   : > { %6056 = vmatmul.mubr.bf16.vlgmr.msra.gmra.mxu0 %v5718_v36 }
 0x362   : > { %6951 = vmatpush3.bf16.msra.mxu1 %v7591_v8 }
 0x363   : > { %6952 = vmatprep.subr.bf16.mxu1 %v11700_v47 }
 0x366   : > { %6953 = vmatpush3.bf16.msra.mxu1 %v7592_v16 }
 0x367   : > { %6954 = vmatprep.subr.bf16.mxu1 %v11700_v47 }
 0x36a   : > { %6955 = vmatpush3.bf16.msra.mxu1 %v7593_v48 }
 0x36b   : > { %6956 = vmatprep.subr.bf16.mxu1 %v11700_v47 }
 0x36e   : > { %6957 = vmatpush3.bf16.msra.mxu1 %v7594_v44 }
 0x36f   : > { %6958 = vmatprep.subr.bf16.mxu1 %v11700_v47 }
 0x372   : > { %6959 = vmatpush3.bf16.msra.mxu1 %v7595_v37 }
 0x373   : > { %6960 = vmatprep.subr.bf16.mxu1 %v11700_v47 }
 0x376   : > { %6961 = vmatpush3.bf16.msra.mxu1 %v7596_v22 }
 0x419   : > { %v6909_v50 = vpop.f32.mrf.mxu1 }
 0x41b   : > { %v6910_v9 = vpop.f32.mrf.mxu1 }
 0x41c   : > { %v6911_v60 = vadd.f32 %v6910_v9, %v6909_v50 }
 0x41d   : > { %v6912_v2 = vpop.f32.mrf.mxu1 }
 0x41e   : > { %v6018_v18 = vadd.f32 %v6911_v60, %v6816_v28 }
 0x41f   : > { %v6913_v61 = vpop.f32.mrf.mxu1 }
 0x421   : > { %v6931_v12 = vpop.f32.mrf.mxu0 }
 0x423   : > { %v6932_v11 = vpop.f32.mrf.mxu0 }
 0x424   : > { %v6933_v62 = vadd.f32 %v6932_v11, %v6931_v12 }
 0x425   : > { %v6934_v57 = vpop.f32.mrf.mxu0 }
 0x426   : > { %v6058_v63 = vadd.f32 %v6933_v62, %v6018_v18 }
 0x427   : > { %v6935_v5 = vpop.f32.mrf.mxu0 }
 0x428   : > { %v6063_v41 = vmax.f32 %v6058_v63, 0.0 }
 0x42a   : > { %v6064_v4 = vpack.c.bf16 %v6063_v41, %v6063_v41 }
 0x42c   : > { %6963 = vmatmul.mubr.bf16.vlgmr.msra.gmra.mxu1 %v6064_v4 }
 0x4ec   : > { %v6170_v21 = vpop.f32.mrf.mxu1 }
 0x4ed   : > { %v6171_v7 = vadd.f32 %v6849_v35, %v6170_v21 }
 0x4ee   : > { %v6964_v25 = vpop.f32.mrf.mxu1 }
 0x4ef   : > { %6176 = vmax.xlane.f32.xlu0 %v6171_v7 }
 0x4f0   : > { %v6173_v14 = vpop.f32.mrf.mxu1 }
 0x4f2   : > { %v6965_v54 = vpop.f32.mrf.mxu1 }
 0x578   : > { %v6177_v31 = vpop.xlane.xlu0 %6176 }
 0x579   : > { %v6178_v1 = vsub.f32 %v6171_v7, %v6177_v31 }
 0x57b   : > { %v6179_v43 = vmul.f32 1.442695, %v6178_v1 }
 0x57d   : > { %7597 = vpow2.f32 %v6179_v43 }
 0x58a   : > { %v7598_v32 = vpop.eup %7597 }
 0x58b   : > { %6181 = vadd.xlane.f32.xlu0 %v7598_v32 }
 0x614   : > { %v6182_v40 = vpop.xlane.xlu0 %6181 }
 0x615   : > { %7599 = vlog2.f32 %v6182_v40 }
 0x622   : > { %v7600_v15 = vpop.eup %7599 }
 0x623   : > { %v6184_v6 = vmul.f32 0.6931472, %v7600_v15 }
 0x625   : > { %v6185_v53 = vadd.f32 %v6184_v6, %v6177_v31 }
 0x627   : > { %v6186_v13 = vsub.f32 %v6171_v7, %v6185_v53 }
 0x629   : > { %6187 = vst [vmem:[%s335_s18] sm:$0xff] %v6186_v13 }
 0x62a PF: > { %s19_s30 = sadd.s32 1, %s7631_s30  }
 0x62b   : > { %p16_p5 = scmp.ge.s32.totalorder %s19_s30, 4  }
 0x62d   :  { %18 = sbr.rel (!%p16_p5) target bundleno = 1 (0x1), region = 86 }

</bundles_post_ra>
